<compile_context>
chip_gen: v7x
topology: tpu7x:2x2x1
jax: 0.10.0
libtpu: 0.0.40
codegen_flags: <defaults>
</compile_context>

<pallas_src>
import functools

import jax
import jax.numpy as jnp
from jax import lax
from jax.experimental import pallas as pl
from jax.experimental.pallas import tpu as pltpu

LANE = 128            # lane width  -> pad nhid / gate widths to this
SUBLANE_BF16 = 16     # bf16 sublane packing -> pad batch to this


def _round_up(x, m):
    return (x + m - 1) // m * m


# ----------------------------------------------------------------------------
# Generation-aware budgets: v5e/v6e have 128 MiB physical VMEM -> big scoped
# budget + deeper unroll; v7x (64 MiB) / unknown -> conservative.
# ----------------------------------------------------------------------------
def _vmem_capacity_bytes():
    try:
        return int(pltpu.get_tpu_info().vmem_capacity_bytes)
    except Exception:
        return 64 * 1024 * 1024


_VMEM_PHYS = _vmem_capacity_bytes()
if _VMEM_PHYS >= 100 * 1024 * 1024:          # v5e / v6e class
    VMEM_LIMIT = 96 * 1024 * 1024
    UNROLL = 16
else:                                        # v7x class or unknown
    VMEM_LIMIT = 48 * 1024 * 1024
    UNROLL = 8


def _num_tensorcores():
    """v7x exposes 2 TensorCores per chip; use a parallel batch axis there."""
    try:
        kind = jax.devices()[0].device_kind.lower()
        if "v7" in kind or "7x" in kind:
            return 2
    except Exception:
        pass
    return 1


_NUM_TC = _num_tensorcores()


# ----------------------------------------------------------------------------
# One-time probe: is pipeline_mode=pl.Buffered(1) (single-buffered invariant
# operands) supported AND numerically correct on this jax/libtpu?  If not,
# silently fall back to default double-buffering.
# ----------------------------------------------------------------------------
def _probe_single_buffering():
    try:
        def k(x_ref, w_ref, o_ref):
            o_ref[...] = x_ref[...] + w_ref[...]

        f = pl.pallas_call(
            k,
            out_shape=jax.ShapeDtypeStruct((16, 128), jnp.float32),
            grid=(2,),
            in_specs=[
                pl.BlockSpec((8, 128), lambda i: (i, 0)),
                pl.BlockSpec((8, 128), lambda i: (0, 0),
                             pipeline_mode=pl.Buffered(1)),
            ],
            out_specs=pl.BlockSpec((8, 128), lambda i: (i, 0)),
        )
        x = jnp.arange(16 * 128, dtype=jnp.float32).reshape(16, 128)
        w = jnp.ones((8, 128), jnp.float32)
        out = jax.block_until_ready(f(x, w))
        return bool(jnp.allclose(out, x + 1.0))
    except Exception:
        return False


_SINGLE_BUFFER_OK = _probe_single_buffering()


def _invariant_spec(block_shape, index_map):
    """BlockSpec for a grid-invariant operand; single-buffered when supported."""
    if _SINGLE_BUFFER_OK:
        return pl.BlockSpec(block_shape, index_map, pipeline_mode=pl.Buffered(1))
    return pl.BlockSpec(block_shape, index_map)


# ----------------------------------------------------------------------------
# Tiled linear kernel:  y = x @ w_t + b   (bf16 operands on the MXU, f32 accum)
# Used for the hoisted GRU input projections (bf16 output) and the decoder
# (f32 output).  Weights arrive pre-padded / pre-transposed / pre-cast.
# ----------------------------------------------------------------------------
def _linear_kernel(x_ref, wt_ref, b_ref, o_ref):
    acc = jnp.dot(x_ref[...], wt_ref[...], preferred_element_type=jnp.float32)
    o_ref[...] = (acc + b_ref[...]).astype(o_ref.dtype)


def _pick_tn(np_total, desired):
    """Largest 128-multiple tile <= desired that divides np_total."""
    if np_total <= desired:
        return np_total
    for cand in (desired, 512, 384, 256, 128):
        if cand <= desired and np_total % cand == 0:
            return cand
    return 128


def pallas_linear(x, w_t, b_row, *, out_dtype=jnp.float32, tm=512, tn=512):
    """y = x @ w_t + b_row.

    x: (M, K) (any float dtype; cast to bf16 here).  w_t: (K, Np) bf16,
    pre-packed.  b_row: (1, Np) f32.  Returns (M, Np) in out_dtype.
    """
    M, K = x.shape
    Np = w_t.shape[1]
    tn = _pick_tn(Np, tn)
    tm = min(tm, _round_up(M, SUBLANE_BF16))     # multiple of 16 (bf16 x)
    Mp = _round_up(M, tm)

    # Cast activations to bf16 in the wrapper: halves the x DMA and VMEM tile.
    xp = jnp.pad(x.astype(jnp.bfloat16), ((0, Mp - M), (0, 0)))

    out = pl.pallas_call(
        _linear_kernel,
        out_shape=jax.ShapeDtypeStruct((Mp, Np), out_dtype),
        grid_spec=pltpu.PrefetchScalarGridSpec(
            num_scalar_prefetch=0,
            grid=(Mp // tm, Np // tn),
            in_specs=[
                pl.BlockSpec((tm, K), lambda i, j: (i, 0)),
                pl.BlockSpec((K, tn), lambda i, j: (0, j)),
                pl.BlockSpec((1, tn), lambda i, j: (0, j)),
            ],
            out_specs=pl.BlockSpec((tm, tn), lambda i, j: (i, j)),
        ),
        compiler_params=pltpu.CompilerParams(
            dimension_semantics=("parallel", "parallel"),
            vmem_limit_bytes=VMEM_LIMIT,
        ),
    )(xp, w_t, b_row)
    if Mp != M:
        out = out[:M]
    return out


# ----------------------------------------------------------------------------
# Sequential GRU kernel: only the recurrent half (gh = h @ W_hh.T) runs here.
# grid = (batch_blocks, seq_blocks): the seq axis is a true sequential
# recurrence ("arbitrary"); the batch axis is "parallel" (v7x megacore).
# Hidden state is carried f32 in VMEM scratch; trajectory is stored bf16; the
# exact f32 hidden after the last REAL timestep goes to a second output.
# ----------------------------------------------------------------------------
def _gru_seq_kernel(gi_ref, h0_ref, whh_ref, bhh_ref, out_ref, hlast_ref,
                    h_scratch, *, unroll, nh, last_t, last_u):
    t = pl.program_id(1)

    @pl.when(t == 0)
    def _():
        h_scratch[...] = h0_ref[...]

    w_hh = whh_ref[...]                      # (NH, 3*NH) bf16, grid-invariant
    b_hh = bhh_ref[...]                      # (1, 3*NH) f32
    is_last_block = t == last_t

    def step(u, h):
        gh = jnp.dot(h.astype(jnp.bfloat16), w_hh,
                     preferred_element_type=jnp.float32) + b_hh
        gi = gi_ref[u].astype(jnp.float32)   # (B, 3*NH) bf16 -> f32
        # r and z fused into one logistic over a lane-aligned (B, 2*nh) slice;
        # sigmoid(x) = 0.5*(tanh(0.5*x)+1)  -> a single EUP op.
        rz = 0.5 * (jnp.tanh(0.5 * (gi[:, :2 * nh] + gh[:, :2 * nh])) + 1.0)
        r = rz[:, :nh]
        z = rz[:, nh:]
        n = jnp.tanh(gi[:, 2 * nh:] + r * gh[:, 2 * nh:])
        h_new = n + z * (h - n)
        out_ref[u] = h_new.astype(out_ref.dtype)

        # Exact f32 final hidden: written only at the last REAL timestep
        # (padded timesteps beyond seq never reach hlast).
        @pl.when(jnp.logical_and(is_last_block, u == last_u))
        def _():
            hlast_ref[...] = h_new

        return h_new

    h = lax.fori_loop(0, unroll, step, h_scratch[...], unroll=True)
    h_scratch[...] = h


def gru_recurrent(gi, h0, w_hh_t, b_hh_row, *, unroll, seq, nb):
    """gi: (Sp, B, 3*NH) bf16 precomputed input projection (+b_ih).
    h0: (B, NH) f32.  w_hh_t: (NH, 3*NH) bf16.  b_hh_row: (1, 3*NH) f32.
    Returns (out bf16 (Sp,B,NH) with out[t]==h_{t+1},  h_last f32 (B,NH))."""
    Sp, B, G = gi.shape
    NH = h0.shape[-1]
    T = Sp // unroll
    Bblk = B // nb
    last_t = (seq - 1) // unroll
    last_u = (seq - 1) % unroll

    kernel = functools.partial(_gru_seq_kernel, unroll=unroll, nh=NH,
                               last_t=last_t, last_u=last_u)

    grid_spec = pltpu.PrefetchScalarGridSpec(
        num_scalar_prefetch=0,
        grid=(nb, T),
        in_specs=[
            pl.BlockSpec((unroll, Bblk, G), lambda b, t: (t, b, 0)),
            pl.BlockSpec((Bblk, NH), lambda b, t: (b, 0)),
            # Grid-invariant weight/bias: fetched once; single-buffered when
            # supported to avoid double-buffered VMEM (matters on v7x).
            _invariant_spec((NH, G), lambda b, t: (0, 0)),
            _invariant_spec((1, G), lambda b, t: (0, 0)),
        ],
        out_specs=[
            pl.BlockSpec((unroll, Bblk, NH), lambda b, t: (t, b, 0)),
            pl.BlockSpec((Bblk, NH), lambda b, t: (b, 0)),
        ],
        scratch_shapes=[pltpu.VMEM((Bblk, NH), jnp.float32)],
    )
    out, h_last = pl.pallas_call(
        kernel,
        out_shape=(jax.ShapeDtypeStruct((Sp, B, NH), jnp.bfloat16),
                   jax.ShapeDtypeStruct((B, NH), jnp.float32)),
        grid_spec=grid_spec,
        compiler_params=pltpu.CompilerParams(
            dimension_semantics=("parallel", "arbitrary"),
            vmem_limit_bytes=VMEM_LIMIT,
        ),
    )(gi, h0, w_hh_t, b_hh_row)
    return out, h_last


# ----------------------------------------------------------------------------
# Parameter init + one-time packing (padding / transpose / bf16 cast hoisted
# out of the jitted forward).
# ----------------------------------------------------------------------------
def init_params(key, ntoken, ninp, nhid, nlayers):
    ks = jax.random.split(key, 2 + 4 * nlayers)
    params = {}
    initrange = 0.1
    params["encoder_weight"] = jax.random.uniform(
        ks[0], (ntoken, ninp), jnp.float32, -initrange, initrange)
    params["decoder_weight"] = jax.random.uniform(
        ks[1], (ntoken, nhid), jnp.float32, -initrange, initrange)
    params["decoder_bias"] = jnp.zeros((ntoken,), jnp.float32)
    stdv = 1.0 / (nhid ** 0.5)
    gru = []
    for l in range(nlayers):
        in_dim = ninp if l == 0 else nhid
        k0, k1, k2, k3 = ks[2 + 4 * l:2 + 4 * l + 4]
        gru.append(dict(
            w_ih=jax.random.uniform(k0, (3 * nhid, in_dim), jnp.float32, -stdv, stdv),
            w_hh=jax.random.uniform(k1, (3 * nhid, nhid), jnp.float32, -stdv, stdv),
            b_ih=jax.random.uniform(k2, (3 * nhid,), jnp.float32, -stdv, stdv),
            b_hh=jax.random.uniform(k3, (3 * nhid,), jnp.float32, -stdv, stdv),
        ))
    params["gru"] = gru
    return params


def _pad_gate_rows(w, nhid, NH):
    """(3*nhid, ...) -> (3*NH, ...): zero-pad each r/z/n gate block so each
    gate occupies a lane-aligned NH-wide slot."""
    if NH == nhid:
        return w
    pad = [(0, NH - nhid)] + [(0, 0)] * (w.ndim - 1)
    return jnp.concatenate(
        [jnp.pad(w[g * nhid:(g + 1) * nhid], pad) for g in range(3)], axis=0)


def pack_rnn_params(params):
    """One-time: lane-align, K-pad, transpose and bf16-cast all weights."""
    nhid = params["gru"][0]["w_hh"].shape[1]
    ninp = params["encoder_weight"].shape[1]
    ntoken = params["decoder_weight"].shape[0]
    NH = _round_up(nhid, LANE)
    G = 3 * NH

    packed = {"encoder_weight": params["encoder_weight"].astype(jnp.float32)}
    gru = []
    for l, p in enumerate(params["gru"]):
        in_dim = ninp if l == 0 else NH
        w_ih = _pad_gate_rows(p["w_ih"], nhid, NH)                 # (G, in_raw)
        if w_ih.shape[1] != in_dim:                                # layers>0: pad K
            w_ih = jnp.pad(w_ih, ((0, 0), (0, in_dim - w_ih.shape[1])))
        w_hh = _pad_gate_rows(p["w_hh"], nhid, NH)                 # (G, nhid)
        w_hh = jnp.pad(w_hh, ((0, 0), (0, NH - nhid)))             # (G, NH)
        gru.append(dict(
            w_ih_t=w_ih.T.astype(jnp.bfloat16),                    # (in_dim, G)
            b_ih=_pad_gate_rows(p["b_ih"], nhid, NH).astype(jnp.float32).reshape(1, G),
            w_hh_t=w_hh.T.astype(jnp.bfloat16),                    # (NH, G)
            b_hh=_pad_gate_rows(p["b_hh"], nhid, NH).astype(jnp.float32).reshape(1, G),
        ))
    packed["gru"] = gru

    Np = _round_up(ntoken, LANE)
    dec_w = jnp.pad(params["decoder_weight"], ((0, Np - ntoken), (0, NH - nhid)))
    packed["dec_w_t"] = dec_w.T.astype(jnp.bfloat16)               # (NH, Np)
    packed["dec_b"] = jnp.pad(params["decoder_bias"].astype(jnp.float32),
                              (0, Np - ntoken)).reshape(1, Np)
    return packed


# ----------------------------------------------------------------------------
# RNNModel forward (Pallas-backed); takes pre-packed parameters.
# ----------------------------------------------------------------------------
def rnn_model_forward(packed, tokens, hidden):
    """tokens: (seq, batch) int32, hidden: (nlayers, batch, nhid) f32."""
    ntoken, ninp = packed["encoder_weight"].shape
    nlayers, batch, nhid = hidden.shape
    seq = tokens.shape[0]
    NH = packed["gru"][0]["w_hh_t"].shape[0]
    G = 3 * NH

    B = _round_up(batch, SUBLANE_BF16)             # bf16 sublane-aligned batch
    nb = 2 if (_NUM_TC >= 2 and B % (2 * SUBLANE_BF16) == 0) else 1
    U = min(UNROLL, seq)
    Sp = _round_up(seq, U)

    # Embedding lookup (plain-JAX gather glue) + dropout as identity.
    emb = jnp.take(packed["encoder_weight"], tokens, axis=0)       # (seq,batch,ninp)
    x = jnp.pad(emb, ((0, Sp - seq), (0, B - batch), (0, 0)))      # (Sp, B, ninp)

    h_finals = []
    for l, layer in enumerate(packed["gru"]):
        in_dim = x.shape[-1]
        # Hoisted input projection: one big MXU GEMM over all timesteps (bf16 out).
        gi = pallas_linear(x.reshape(Sp * B, in_dim), layer["w_ih_t"], layer["b_ih"],
                           out_dtype=jnp.bfloat16, tm=512)
        gi = gi.reshape(Sp, B, G)

        h0 = jnp.pad(hidden[l], ((0, B - batch), (0, NH - nhid)))  # (B, NH) f32
        out, h_last = gru_recurrent(gi, h0, layer["w_hh_t"], layer["b_hh"],
                                    unroll=U, seq=seq, nb=nb)
        h_finals.append(h_last[:batch, :nhid])                     # exact f32
        x = out                                                    # bf16, next layer

    new_hidden = jnp.stack(h_finals, axis=0)                       # (nlayers,batch,nhid)

    # Decoder: large tm so the vocab weight is re-streamed few times.
    Np = packed["dec_w_t"].shape[1]
    decoded = pallas_linear(x.reshape(Sp * B, NH), packed["dec_w_t"], packed["dec_b"],
                            out_dtype=jnp.float32, tm=1024)
    decoded = decoded.reshape(Sp, B, Np)[:seq, :batch, :ntoken]
    return decoded, new_hidden


# ----------------------------------------------------------------------------
# Pure-JAX f32 reference for validation
# ----------------------------------------------------------------------------
def rnn_model_reference(params, tokens, hidden):
    emb = jnp.take(params["encoder_weight"], tokens, axis=0)
    x = emb
    h_finals = []
    for l, p in enumerate(params["gru"]):
        nhid = p["w_hh"].shape[1]

        def step(h, xt, p=p, nhid=nhid):
            gi = xt @ p["w_ih"].T + p["b_ih"]
            gh = h @ p["w_hh"].T + p["b_hh"]
            i_r, i_z, i_n = gi[:, :nhid], gi[:, nhid:2 * nhid], gi[:, 2 * nhid:]
            h_r, h_z, h_n = gh[:, :nhid], gh[:, nhid:2 * nhid], gh[:, 2 * nhid:]
            r = jax.nn.sigmoid(i_r + h_r)
            z = jax.nn.sigmoid(i_z + h_z)
            n = jnp.tanh(i_n + r * h_n)
            h_new = (1.0 - z) * n + z * h
            return h_new, h_new

        h_last, outs = jax.lax.scan(step, hidden[l], x)
        x = outs
        h_finals.append(h_last)
    decoded = x @ params["decoder_weight"].T + params["decoder_bias"]
    return decoded, jnp.stack(h_finals, axis=0)


if __name__ == "__main__":
    ntoken, ninp, nhid, nlayers = 32, 16, 32, 2
    seq, batch = 8, 2

    key = jax.random.PRNGKey(0)
    kp, kt = jax.random.split(key)
    params = init_params(kp, ntoken, ninp, nhid, nlayers)
    packed = pack_rnn_params(params)          # one-time weight packing

    tokens = jax.random.randint(kt, (seq, batch), 0, ntoken, dtype=jnp.int32)
    hidden = jnp.zeros((nlayers, batch, nhid), jnp.float32)   # init_hidden(bsz)

    fwd = jax.jit(rnn_model_forward)
    decoded, new_hidden = fwd(packed, tokens, hidden)
    decoded = jax.block_until_ready(decoded)
    new_hidden = jax.block_until_ready(new_hidden)

    ref_decoded, ref_hidden = rnn_model_reference(params, tokens, hidden)
    assert decoded.shape == (seq, batch, ntoken)
    assert new_hidden.shape == (nlayers, batch, nhid)
    # bf16 MXU operands + bf16 gi/out trajectory (f32 carried state), so
    # compare against the f32 reference with bf16-appropriate tolerances.
    assert jnp.allclose(decoded, ref_decoded, atol=4e-2, rtol=4e-2), (
        float(jnp.max(jnp.abs(decoded - ref_decoded))))
    assert jnp.allclose(new_hidden, ref_hidden, atol=4e-2, rtol=4e-2), (
        float(jnp.max(jnp.abs(new_hidden - ref_hidden))))

    print("KERNEL_OK")
</pallas_src>

<mosaic_0001>
module attributes {stable_mosaic.version = 11 : i64} {
  func.func @k(%arg0: i32, %arg1: memref<8x128xf32, #tpu.memory_space<vmem>>, %arg2: memref<8x128xf32, #tpu.memory_space<vmem>>, %arg3: memref<8x128xf32, #tpu.memory_space<vmem>>) attributes {dimension_semantics = [#tpu.dimension_semantics<arbitrary>], iteration_bounds = array<i64: 2>, scalar_prefetch = 0 : i64, scratch_operands = 0 : i64, tpu.core_type = #tpu.core_type<tc>, window_params = [{transform_indices = @transform_0, window_bounds = array<i64: 8, 128>}, {pipeline_mode = #tpu.pipeline_mode<synchronous>, transform_indices = @transform_1, window_bounds = array<i64: 8, 128>}, {transform_indices = @transform_2, window_bounds = array<i64: 8, 128>}]} {
    %c0 = arith.constant 0 : index
    %c0_0 = arith.constant 0 : index
    %0 = vector.load %arg1[%c0, %c0_0] : memref<8x128xf32, #tpu.memory_space<vmem>>, vector<8x128xf32>
    %c0_1 = arith.constant 0 : index
    %c0_2 = arith.constant 0 : index
    %1 = vector.load %arg2[%c0_1, %c0_2] : memref<8x128xf32, #tpu.memory_space<vmem>>, vector<8x128xf32>
    %2 = arith.addf %0, %1 : vector<8x128xf32>
    %c0_3 = arith.constant 0 : index
    %c0_4 = arith.constant 0 : index
    %3 = vector.load %arg3[%c0_3, %c0_4] : memref<8x128xf32, #tpu.memory_space<vmem>>, vector<8x128xf32>
    tpu.vector_store %arg3[%c0_3, %c0_4], %2 {strides = array<i32>} : memref<8x128xf32, #tpu.memory_space<vmem>>, vector<8x128xf32>,
    return
  }
  func.func @transform_0(%arg0: i32) -> (i32, i32) {
    %c0_i32 = arith.constant 0 : i32
    %c0_i32_0 = arith.constant 0 : i32
    return %arg0, %c0_i32 : i32, i32
  }
  func.func @transform_1(%arg0: i32) -> (i32, i32) {
    %c0_i32 = arith.constant 0 : i32
    %c0_i32_0 = arith.constant 0 : i32
    %c0_i32_1 = arith.constant 0 : i32
    return %c0_i32, %c0_i32_0 : i32, i32
  }
  func.func @transform_2(%arg0: i32) -> (i32, i32) {
    %c0_i32 = arith.constant 0 : i32
    %c0_i32_0 = arith.constant 0 : i32
    return %arg0, %c0_i32 : i32, i32
  }
}

module attributes {stable_mosaic.version = 11 : i64} {
  func.func @_gru_seq_kernel(%arg0: i32, %arg1: i32, %arg2: memref<8x16x384xbf16, #tpu.memory_space<vmem>>, %arg3: memref<16x128xf32, #tpu.memory_space<vmem>>, %arg4: memref<128x384xbf16, #tpu.memory_space<vmem>>, %arg5: memref<1x384xf32, #tpu.memory_space<vmem>>, %arg6: memref<8x16x128xbf16, #tpu.memory_space<vmem>>, %arg7: memref<16x128xf32, #tpu.memory_space<vmem>>, %arg8: memref<16x128xf32, #tpu.memory_space<vmem>>) attributes {dimension_semantics = [#tpu.dimension_semantics<parallel>, #tpu.dimension_semantics<arbitrary>], iteration_bounds = array<i64: 1, 1>, scalar_prefetch = 0 : i64, scratch_operands = 1 : i64, tpu.core_type = #tpu.core_type<tc>, window_params = [{transform_indices = @transform_0, window_bounds = array<i64: 8, 16, 384>}, {transform_indices = @transform_1, window_bounds = array<i64: 16, 128>}, {pipeline_mode = #tpu.pipeline_mode<synchronous>, transform_indices = @transform_2, window_bounds = array<i64: 128, 384>}, {pipeline_mode = #tpu.pipeline_mode<synchronous>, transform_indices = @transform_3, window_bounds = array<i64: 1, 384>}, {transform_indices = @transform_4, window_bounds = array<i64: 8, 16, 128>}, {transform_indices = @transform_5, window_bounds = array<i64: 16, 128>}]} {
    %c0_i32 = arith.constant 0 : i32
    %0 = arith.cmpi eq, %arg1, %c0_i32 : i32
    %1 = arith.extui %0 : i1 to i32
    %c0_i32_0 = arith.constant 0 : i32
    %2 = arith.cmpi ne, %1, %c0_i32_0 : i32
    scf.if %2 {
      %c0_89 = arith.constant 0 : index
      %c0_90 = arith.constant 0 : index
      %304 = vector.load %arg3[%c0_89, %c0_90] : memref<16x128xf32, #tpu.memory_space<vmem>>, vector<16x128xf32>
      %c0_91 = arith.constant 0 : index
      %c0_92 = arith.constant 0 : index
      %305 = vector.load %arg8[%c0_91, %c0_92] : memref<16x128xf32, #tpu.memory_space<vmem>>, vector<16x128xf32>
      tpu.vector_store %arg8[%c0_91, %c0_92], %304 {strides = array<i32>} : memref<16x128xf32, #tpu.memory_space<vmem>>, vector<16x128xf32>,
    } else {
    }
    %c0 = arith.constant 0 : index
    %c0_1 = arith.constant 0 : index
    %3 = vector.load %arg4[%c0, %c0_1] : memref<128x384xbf16, #tpu.memory_space<vmem>>, vector<128x384xbf16>
    %c0_2 = arith.constant 0 : index
    %c0_3 = arith.constant 0 : index
    %4 = vector.load %arg5[%c0_2, %c0_3] : memref<1x384xf32, #tpu.memory_space<vmem>>, vector<1x384xf32>
    %c0_i32_4 = arith.constant 0 : i32
    %5 = arith.cmpi eq, %arg1, %c0_i32_4 : i32
    %c0_5 = arith.constant 0 : index
    %c0_6 = arith.constant 0 : index
    %6 = vector.load %arg8[%c0_5, %c0_6] : memref<16x128xf32, #tpu.memory_space<vmem>>, vector<16x128xf32>
    %c0_i32_7 = arith.constant 0 : i32
    %7 = arith.truncf %6 : vector<16x128xf32> to vector<16x128xbf16>
    %cst = arith.constant dense<0.000000e+00> : vector<16x384xf32>
    %8 = tpu.matmul %7, %3, %cst {dimension_numbers = #tpu.dot_dimension_numbers<[1], [0], [0], [1], [0, 0, 1, 1], [], []>} : vector<16x128xbf16>, vector<128x384xbf16>, vector<16x384xf32> -> vector<16x384xf32>
    %9 = vector.broadcast %4 : vector<1x384xf32> to vector<16x384xf32>
    %10 = arith.addf %8, %9 : vector<16x384xf32>
    %11 = arith.index_cast %c0_i32_7 : i32 to index
    %c0_8 = arith.constant 0 : index
    %c0_9 = arith.constant 0 : index
    %12 = vector.load %arg2[%11, %c0_8, %c0_9] : memref<8x16x384xbf16, #tpu.memory_space<vmem>>, vector<1x16x384xbf16>
    %13 = vector.shape_cast %12 : vector<1x16x384xbf16> to vector<16x384xbf16>
    %14 = arith.extf %13 : vector<16x384xbf16> to vector<16x384xf32>
    %15 = vector.extract_strided_slice %14 {offsets = [0, 0], sizes = [16, 256], strides = [1, 1]} : vector<16x384xf32> to vector<16x256xf32>
    %16 = vector.extract_strided_slice %10 {offsets = [0, 0], sizes = [16, 256], strides = [1, 1]} : vector<16x384xf32> to vector<16x256xf32>
    %17 = arith.addf %15, %16 : vector<16x256xf32>
    %cst_10 = arith.constant 5.000000e-01 : f32
    %18 = vector.broadcast %cst_10 : f32 to vector<16x256xf32>
    %19 = arith.mulf %18, %17 : vector<16x256xf32>
    %20 = math.tanh %19 : vector<16x256xf32>
    %cst_11 = arith.constant 1.000000e+00 : f32
    %21 = vector.broadcast %cst_11 : f32 to vector<16x256xf32>
    %22 = arith.addf %20, %21 : vector<16x256xf32>
    %cst_12 = arith.constant 5.000000e-01 : f32
    %23 = vector.broadcast %cst_12 : f32 to vector<16x256xf32>
    %24 = arith.mulf %23, %22 : vector<16x256xf32>
    %25 = vector.extract_strided_slice %24 {offsets = [0, 0], sizes = [16, 128], strides = [1, 1]} : vector<16x256xf32> to vector<16x128xf32>
    %26 = vector.extract_strided_slice %24 {offsets = [0, 128], sizes = [16, 128], strides = [1, 1]} : vector<16x256xf32> to vector<16x128xf32>
    %27 = vector.extract_strided_slice %14 {offsets = [0, 256], sizes = [16, 128], strides = [1, 1]} : vector<16x384xf32> to vector<16x128xf32>
    %28 = vector.extract_strided_slice %10 {offsets = [0, 256], sizes = [16, 128], strides = [1, 1]} : vector<16x384xf32> to vector<16x128xf32>
    %29 = arith.mulf %25, %28 : vector<16x128xf32>
    %30 = arith.addf %27, %29 : vector<16x128xf32>
    %31 = math.tanh %30 : vector<16x128xf32>
    %32 = arith.subf %6, %31 : vector<16x128xf32>
    %33 = arith.mulf %26, %32 : vector<16x128xf32>
    %34 = arith.addf %31, %33 : vector<16x128xf32>
    %35 = arith.truncf %34 : vector<16x128xf32> to vector<16x128xbf16>
    %36 = arith.index_cast %c0_i32_7 : i32 to index
    %c0_13 = arith.constant 0 : index
    %c0_14 = arith.constant 0 : index
    %37 = vector.load %arg6[%36, %c0_13, %c0_14] : memref<8x16x128xbf16, #tpu.memory_space<vmem>>, vector<1x16x128xbf16>
    %38 = vector.shape_cast %37 : vector<1x16x128xbf16> to vector<16x128xbf16>
    %39 = vector.shape_cast %35 : vector<16x128xbf16> to vector<1x16x128xbf16>
    tpu.vector_store %arg6[%36, %c0_13, %c0_14], %39 {strides = array<i32>} : memref<8x16x128xbf16, #tpu.memory_space<vmem>>, vector<1x16x128xbf16>,
    %c7_i32 = arith.constant 7 : i32
    %40 = arith.cmpi eq, %c0_i32_7, %c7_i32 : i32
    %41 = arith.andi %5, %40 : i1
    %42 = arith.extui %41 : i1 to i32
    %c0_i32_15 = arith.constant 0 : i32
    %43 = arith.cmpi ne, %42, %c0_i32_15 : i32
    scf.if %43 {
      %c0_89 = arith.constant 0 : index
      %c0_90 = arith.constant 0 : index
      %304 = vector.load %arg7[%c0_89, %c0_90] : memref<16x128xf32, #tpu.memory_space<vmem>>, vector<16x128xf32>
      tpu.vector_store %arg7[%c0_89, %c0_90], %34 {strides = array<i32>} : memref<16x128xf32, #tpu.memory_space<vmem>>, vector<16x128xf32>,
    } else {
    }
    %c1_i32 = arith.constant 1 : i32
    %44 = arith.truncf %34 : vector<16x128xf32> to vector<16x128xbf16>
    %cst_16 = arith.constant dense<0.000000e+00> : vector<16x384xf32>
    %45 = tpu.matmul %44, %3, %cst_16 {dimension_numbers = #tpu.dot_dimension_numbers<[1], [0], [0], [1], [0, 0, 1, 1], [], []>} : vector<16x128xbf16>, vector<128x384xbf16>, vector<16x384xf32> -> vector<16x384xf32>
    %46 = vector.broadcast %4 : vector<1x384xf32> to vector<16x384xf32>
    %47 = arith.addf %45, %46 : vector<16x384xf32>
    %48 = arith.index_cast %c1_i32 : i32 to index
    %c0_17 = arith.constant 0 : index
    %c0_18 = arith.constant 0 : index
    %49 = vector.load %arg2[%48, %c0_17, %c0_18] : memref<8x16x384xbf16, #tpu.memory_space<vmem>>, vector<1x16x384xbf16>
    %50 = vector.shape_cast %49 : vector<1x16x384xbf16> to vector<16x384xbf16>
    %51 = arith.extf %50 : vector<16x384xbf16> to vector<16x384xf32>
    %52 = vector.extract_strided_slice %51 {offsets = [0, 0], sizes = [16, 256], strides = [1, 1]} : vector<16x384xf32> to vector<16x256xf32>
    %53 = vector.extract_strided_slice %47 {offsets = [0, 0], sizes = [16, 256], strides = [1, 1]} : vector<16x384xf32> to vector<16x256xf32>
    %54 = arith.addf %52, %53 : vector<16x256xf32>
    %cst_19 = arith.constant 5.000000e-01 : f32
    %55 = vector.broadcast %cst_19 : f32 to vector<16x256xf32>
    %56 = arith.mulf %55, %54 : vector<16x256xf32>
    %57 = math.tanh %56 : vector<16x256xf32>
    %cst_20 = arith.constant 1.000000e+00 : f32
    %58 = vector.broadcast %cst_20 : f32 to vector<16x256xf32>
    %59 = arith.addf %57, %58 : vector<16x256xf32>
    %cst_21 = arith.constant 5.000000e-01 : f32
    %60 = vector.broadcast %cst_21 : f32 to vector<16x256xf32>
    %61 = arith.mulf %60, %59 : vector<16x256xf32>
    %62 = vector.extract_strided_slice %61 {offsets = [0, 0], sizes = [16, 128], strides = [1, 1]} : vector<16x256xf32> to vector<16x128xf32>
    %63 = vector.extract_strided_slice %61 {offsets = [0, 128], sizes = [16, 128], strides = [1, 1]} : vector<16x256xf32> to vector<16x128xf32>
    %64 = vector.extract_strided_slice %51 {offsets = [0, 256], sizes = [16, 128], strides = [1, 1]} : vector<16x384xf32> to vector<16x128xf32>
    %65 = vector.extract_strided_slice %47 {offsets = [0, 256], sizes = [16, 128], strides = [1, 1]} : vector<16x384xf32> to vector<16x128xf32>
    %66 = arith.mulf %62, %65 : vector<16x128xf32>
    %67 = arith.addf %64, %66 : vector<16x128xf32>
    %68 = math.tanh %67 : vector<16x128xf32>
    %69 = arith.subf %34, %68 : vector<16x128xf32>
    %70 = arith.mulf %63, %69 : vector<16x128xf32>
    %71 = arith.addf %68, %70 : vector<16x128xf32>
    %72 = arith.truncf %71 : vector<16x128xf32> to vector<16x128xbf16>
    %73 = arith.index_cast %c1_i32 : i32 to index
    %c0_22 = arith.constant 0 : index
    %c0_23 = arith.constant 0 : index
    %74 = vector.load %arg6[%73, %c0_22, %c0_23] : memref<8x16x128xbf16, #tpu.memory_space<vmem>>, vector<1x16x128xbf16>
    %75 = vector.shape_cast %74 : vector<1x16x128xbf16> to vector<16x128xbf16>
    %76 = vector.shape_cast %72 : vector<16x128xbf16> to vector<1x16x128xbf16>
    tpu.vector_store %arg6[%73, %c0_22, %c0_23], %76 {strides = array<i32>} : memref<8x16x128xbf16, #tpu.memory_space<vmem>>, vector<1x16x128xbf16>,
    %c7_i32_24 = arith.constant 7 : i32
    %77 = arith.cmpi eq, %c1_i32, %c7_i32_24 : i32
    %78 = arith.andi %5, %77 : i1
    %79 = arith.extui %78 : i1 to i32
    %c0_i32_25 = arith.constant 0 : i32
    %80 = arith.cmpi ne, %79, %c0_i32_25 : i32
    scf.if %80 {
      %c0_89 = arith.constant 0 : index
      %c0_90 = arith.constant 0 : index
      %304 = vector.load %arg7[%c0_89, %c0_90] : memref<16x128xf32, #tpu.memory_space<vmem>>, vector<16x128xf32>
      tpu.vector_store %arg7[%c0_89, %c0_90], %71 {strides = array<i32>} : memref<16x128xf32, #tpu.memory_space<vmem>>, vector<16x128xf32>,
    } else {
    }
    %c2_i32 = arith.constant 2 : i32
    %81 = arith.truncf %71 : vector<16x128xf32> to vector<16x128xbf16>
    %cst_26 = arith.constant dense<0.000000e+00> : vector<16x384xf32>
    %82 = tpu.matmul %81, %3, %cst_26 {dimension_numbers = #tpu.dot_dimension_numbers<[1], [0], [0], [1], [0, 0, 1, 1], [], []>} : vector<16x128xbf16>, vector<128x384xbf16>, vector<16x384xf32> -> vector<16x384xf32>
    %83 = vector.broadcast %4 : vector<1x384xf32> to vector<16x384xf32>
    %84 = arith.addf %82, %83 : vector<16x384xf32>
    %85 = arith.index_cast %c2_i32 : i32 to index
    %c0_27 = arith.constant 0 : index
    %c0_28 = arith.constant 0 : index
    %86 = vector.load %arg2[%85, %c0_27, %c0_28] : memref<8x16x384xbf16, #tpu.memory_space<vmem>>, vector<1x16x384xbf16>
    %87 = vector.shape_cast %86 : vector<1x16x384xbf16> to vector<16x384xbf16>
    %88 = arith.extf %87 : vector<16x384xbf16> to vector<16x384xf32>
    %89 = vector.extract_strided_slice %88 {offsets = [0, 0], sizes = [16, 256], strides = [1, 1]} : vector<16x384xf32> to vector<16x256xf32>
    %90 = vector.extract_strided_slice %84 {offsets = [0, 0], sizes = [16, 256], strides = [1, 1]} : vector<16x384xf32> to vector<16x256xf32>
    %91 = arith.addf %89, %90 : vector<16x256xf32>
    %cst_29 = arith.constant 5.000000e-01 : f32
    %92 = vector.broadcast %cst_29 : f32 to vector<16x256xf32>
    %93 = arith.mulf %92, %91 : vector<16x256xf32>
    %94 = math.tanh %93 : vector<16x256xf32>
    %cst_30 = arith.constant 1.000000e+00 : f32
    %95 = vector.broadcast %cst_30 : f32 to vector<16x256xf32>
    %96 = arith.addf %94, %95 : vector<16x256xf32>
    %cst_31 = arith.constant 5.000000e-01 : f32
    %97 = vector.broadcast %cst_31 : f32 to vector<16x256xf32>
    %98 = arith.mulf %97, %96 : vector<16x256xf32>
    %99 = vector.extract_strided_slice %98 {offsets = [0, 0], sizes = [16, 128], strides = [1, 1]} : vector<16x256xf32> to vector<16x128xf32>
    %100 = vector.extract_strided_slice %98 {offsets = [0, 128], sizes = [16, 128], strides = [1, 1]} : vector<16x256xf32> to vector<16x128xf32>
    %101 = vector.extract_strided_slice %88 {offsets = [0, 256], sizes = [16, 128], strides = [1, 1]} : vector<16x384xf32> to vector<16x128xf32>
    %102 = vector.extract_strided_slice %84 {offsets = [0, 256], sizes = [16, 128], strides = [1, 1]} : vector<16x384xf32> to vector<16x128xf32>
    %103 = arith.mulf %99, %102 : vector<16x128xf32>
    %104 = arith.addf %101, %103 : vector<16x128xf32>
    %105 = math.tanh %104 : vector<16x128xf32>
    %106 = arith.subf %71, %105 : vector<16x128xf32>
    %107 = arith.mulf %100, %106 : vector<16x128xf32>
    %108 = arith.addf %105, %107 : vector<16x128xf32>
    %109 = arith.truncf %108 : vector<16x128xf32> to vector<16x128xbf16>
    %110 = arith.index_cast %c2_i32 : i32 to index
    %c0_32 = arith.constant 0 : index
    %c0_33 = arith.constant 0 : index
    %111 = vector.load %arg6[%110, %c0_32, %c0_33] : memref<8x16x128xbf16, #tpu.memory_space<vmem>>, vector<1x16x128xbf16>
    %112 = vector.shape_cast %111 : vector<1x16x128xbf16> to vector<16x128xbf16>
    %113 = vector.shape_cast %109 : vector<16x128xbf16> to vector<1x16x128xbf16>
    tpu.vector_store %arg6[%110, %c0_32, %c0_33], %113 {strides = array<i32>} : memref<8x16x128xbf16, #tpu.memory_space<vmem>>, vector<1x16x128xbf16>,
    %c7_i32_34 = arith.constant 7 : i32
    %114 = arith.cmpi eq, %c2_i32, %c7_i32_34 : i32
    %115 = arith.andi %5, %114 : i1
    %116 = arith.extui %115 : i1 to i32
    %c0_i32_35 = arith.constant 0 : i32
    %117 = arith.cmpi ne, %116, %c0_i32_35 : i32
    scf.if %117 {
      %c0_89 = arith.constant 0 : index
      %c0_90 = arith.constant 0 : index
      %304 = vector.load %arg7[%c0_89, %c0_90] : memref<16x128xf32, #tpu.memory_space<vmem>>, vector<16x128xf32>
      tpu.vector_store %arg7[%c0_89, %c0_90], %108 {strides = array<i32>} : memref<16x128xf32, #tpu.memory_space<vmem>>, vector<16x128xf32>,
    } else {
    }
    %c3_i32 = arith.constant 3 : i32
    %118 = arith.truncf %108 : vector<16x128xf32> to vector<16x128xbf16>
    %cst_36 = arith.constant dense<0.000000e+00> : vector<16x384xf32>
    %119 = tpu.matmul %118, %3, %cst_36 {dimension_numbers = #tpu.dot_dimension_numbers<[1], [0], [0], [1], [0, 0, 1, 1], [], []>} : vector<16x128xbf16>, vector<128x384xbf16>, vector<16x384xf32> -> vector<16x384xf32>
    %120 = vector.broadcast %4 : vector<1x384xf32> to vector<16x384xf32>
    %121 = arith.addf %119, %120 : vector<16x384xf32>
    %122 = arith.index_cast %c3_i32 : i32 to index
    %c0_37 = arith.constant 0 : index
    %c0_38 = arith.constant 0 : index
    %123 = vector.load %arg2[%122, %c0_37, %c0_38] : memref<8x16x384xbf16, #tpu.memory_space<vmem>>, vector<1x16x384xbf16>
    %124 = vector.shape_cast %123 : vector<1x16x384xbf16> to vector<16x384xbf16>
    %125 = arith.extf %124 : vector<16x384xbf16> to vector<16x384xf32>
    %126 = vector.extract_strided_slice %125 {offsets = [0, 0], sizes = [16, 256], strides = [1, 1]} : vector<16x384xf32> to vector<16x256xf32>
    %127 = vector.extract_strided_slice %121 {offsets = [0, 0], sizes = [16, 256], strides = [1, 1]} : vector<16x384xf32> to vector<16x256xf32>
    %128 = arith.addf %126, %127 : vector<16x256xf32>
    %cst_39 = arith.constant 5.000000e-01 : f32
    %129 = vector.broadcast %cst_39 : f32 to vector<16x256xf32>
    %130 = arith.mulf %129, %128 : vector<16x256xf32>
    %131 = math.tanh %130 : vector<16x256xf32>
    %cst_40 = arith.constant 1.000000e+00 : f32
    %132 = vector.broadcast %cst_40 : f32 to vector<16x256xf32>
    %133 = arith.addf %131, %132 : vector<16x256xf32>
    %cst_41 = arith.constant 5.000000e-01 : f32
    %134 = vector.broadcast %cst_41 : f32 to vector<16x256xf32>
    %135 = arith.mulf %134, %133 : vector<16x256xf32>
    %136 = vector.extract_strided_slice %135 {offsets = [0, 0], sizes = [16, 128], strides = [1, 1]} : vector<16x256xf32> to vector<16x128xf32>
    %137 = vector.extract_strided_slice %135 {offsets = [0, 128], sizes = [16, 128], strides = [1, 1]} : vector<16x256xf32> to vector<16x128xf32>
    %138 = vector.extract_strided_slice %125 {offsets = [0, 256], sizes = [16, 128], strides = [1, 1]} : vector<16x384xf32> to vector<16x128xf32>
    %139 = vector.extract_strided_slice %121 {offsets = [0, 256], sizes = [16, 128], strides = [1, 1]} : vector<16x384xf32> to vector<16x128xf32>
    %140 = arith.mulf %136, %139 : vector<16x128xf32>
    %141 = arith.addf %138, %140 : vector<16x128xf32>
    %142 = math.tanh %141 : vector<16x128xf32>
    %143 = arith.subf %108, %142 : vector<16x128xf32>
    %144 = arith.mulf %137, %143 : vector<16x128xf32>
    %145 = arith.addf %142, %144 : vector<16x128xf32>
    %146 = arith.truncf %145 : vector<16x128xf32> to vector<16x128xbf16>
    %147 = arith.index_cast %c3_i32 : i32 to index
    %c0_42 = arith.constant 0 : index
    %c0_43 = arith.constant 0 : index
    %148 = vector.load %arg6[%147, %c0_42, %c0_43] : memref<8x16x128xbf16, #tpu.memory_space<vmem>>, vector<1x16x128xbf16>
    %149 = vector.shape_cast %148 : vector<1x16x128xbf16> to vector<16x128xbf16>
    %150 = vector.shape_cast %146 : vector<16x128xbf16> to vector<1x16x128xbf16>
    tpu.vector_store %arg6[%147, %c0_42, %c0_43], %150 {strides = array<i32>} : memref<8x16x128xbf16, #tpu.memory_space<vmem>>, vector<1x16x128xbf16>,
    %c7_i32_44 = arith.constant 7 : i32
    %151 = arith.cmpi eq, %c3_i32, %c7_i32_44 : i32
    %152 = arith.andi %5, %151 : i1
    %153 = arith.extui %152 : i1 to i32
    %c0_i32_45 = arith.constant 0 : i32
    %154 = arith.cmpi ne, %153, %c0_i32_45 : i32
    scf.if %154 {
      %c0_89 = arith.constant 0 : index
      %c0_90 = arith.constant 0 : index
      %304 = vector.load %arg7[%c0_89, %c0_90] : memref<16x128xf32, #tpu.memory_space<vmem>>, vector<16x128xf32>
      tpu.vector_store %arg7[%c0_89, %c0_90], %145 {strides = array<i32>} : memref<16x128xf32, #tpu.memory_space<vmem>>, vector<16x128xf32>,
    } else {
    }
    %c4_i32 = arith.constant 4 : i32
    %155 = arith.truncf %145 : vector<16x128xf32> to vector<16x128xbf16>
    %cst_46 = arith.constant dense<0.000000e+00> : vector<16x384xf32>
    %156 = tpu.matmul %155, %3, %cst_46 {dimension_numbers = #tpu.dot_dimension_numbers<[1], [0], [0], [1], [0, 0, 1, 1], [], []>} : vector<16x128xbf16>, vector<128x384xbf16>, vector<16x384xf32> -> vector<16x384xf32>
    %157 = vector.broadcast %4 : vector<1x384xf32> to vector<16x384xf32>
    %158 = arith.addf %156, %157 : vector<16x384xf32>
    %159 = arith.index_cast %c4_i32 : i32 to index
    %c0_47 = arith.constant 0 : index
    %c0_48 = arith.constant 0 : index
    %160 = vector.load %arg2[%159, %c0_47, %c0_48] : memref<8x16x384xbf16, #tpu.memory_space<vmem>>, vector<1x16x384xbf16>
    %161 = vector.shape_cast %160 : vector<1x16x384xbf16> to vector<16x384xbf16>
    %162 = arith.extf %161 : vector<16x384xbf16> to vector<16x384xf32>
    %163 = vector.extract_strided_slice %162 {offsets = [0, 0], sizes = [16, 256], strides = [1, 1]} : vector<16x384xf32> to vector<16x256xf32>
    %164 = vector.extract_strided_slice %158 {offsets = [0, 0], sizes = [16, 256], strides = [1, 1]} : vector<16x384xf32> to vector<16x256xf32>
    %165 = arith.addf %163, %164 : vector<16x256xf32>
    %cst_49 = arith.constant 5.000000e-01 : f32
    %166 = vector.broadcast %cst_49 : f32 to vector<16x256xf32>
    %167 = arith.mulf %166, %165 : vector<16x256xf32>
    %168 = math.tanh %167 : vector<16x256xf32>
    %cst_50 = arith.constant 1.000000e+00 : f32
    %169 = vector.broadcast %cst_50 : f32 to vector<16x256xf32>
    %170 = arith.addf %168, %169 : vector<16x256xf32>
    %cst_51 = arith.constant 5.000000e-01 : f32
    %171 = vector.broadcast %cst_51 : f32 to vector<16x256xf32>
    %172 = arith.mulf %171, %170 : vector<16x256xf32>
    %173 = vector.extract_strided_slice %172 {offsets = [0, 0], sizes = [16, 128], strides = [1, 1]} : vector<16x256xf32> to vector<16x128xf32>
    %174 = vector.extract_strided_slice %172 {offsets = [0, 128], sizes = [16, 128], strides = [1, 1]} : vector<16x256xf32> to vector<16x128xf32>
    %175 = vector.extract_strided_slice %162 {offsets = [0, 256], sizes = [16, 128], strides = [1, 1]} : vector<16x384xf32> to vector<16x128xf32>
    %176 = vector.extract_strided_slice %158 {offsets = [0, 256], sizes = [16, 128], strides = [1, 1]} : vector<16x384xf32> to vector<16x128xf32>
    %177 = arith.mulf %173, %176 : vector<16x128xf32>
    %178 = arith.addf %175, %177 : vector<16x128xf32>
    %179 = math.tanh %178 : vector<16x128xf32>
    %180 = arith.subf %145, %179 : vector<16x128xf32>
    %181 = arith.mulf %174, %180 : vector<16x128xf32>
    %182 = arith.addf %179, %181 : vector<16x128xf32>
    %183 = arith.truncf %182 : vector<16x128xf32> to vector<16x128xbf16>
    %184 = arith.index_cast %c4_i32 : i32 to index
    %c0_52 = arith.constant 0 : index
    %c0_53 = arith.constant 0 : index
    %185 = vector.load %arg6[%184, %c0_52, %c0_53] : memref<8x16x128xbf16, #tpu.memory_space<vmem>>, vector<1x16x128xbf16>
    %186 = vector.shape_cast %185 : vector<1x16x128xbf16> to vector<16x128xbf16>
    %187 = vector.shape_cast %183 : vector<16x128xbf16> to vector<1x16x128xbf16>
    tpu.vector_store %arg6[%184, %c0_52, %c0_53], %187 {strides = array<i32>} : memref<8x16x128xbf16, #tpu.memory_space<vmem>>, vector<1x16x128xbf16>,
    %c7_i32_54 = arith.constant 7 : i32
    %188 = arith.cmpi eq, %c4_i32, %c7_i32_54 : i32
    %189 = arith.andi %5, %188 : i1
    %190 = arith.extui %189 : i1 to i32
    %c0_i32_55 = arith.constant 0 : i32
    %191 = arith.cmpi ne, %190, %c0_i32_55 : i32
    scf.if %191 {
      %c0_89 = arith.constant 0 : index
      %c0_90 = arith.constant 0 : index
      %304 = vector.load %arg7[%c0_89, %c0_90] : memref<16x128xf32, #tpu.memory_space<vmem>>, vector<16x128xf32>
      tpu.vector_store %arg7[%c0_89, %c0_90], %182 {strides = array<i32>} : memref<16x128xf32, #tpu.memory_space<vmem>>, vector<16x128xf32>,
    } else {
    }
    %c5_i32 = arith.constant 5 : i32
    %192 = arith.truncf %182 : vector<16x128xf32> to vector<16x128xbf16>
    %cst_56 = arith.constant dense<0.000000e+00> : vector<16x384xf32>
    %193 = tpu.matmul %192, %3, %cst_56 {dimension_numbers = #tpu.dot_dimension_numbers<[1], [0], [0], [1], [0, 0, 1, 1], [], []>} : vector<16x128xbf16>, vector<128x384xbf16>, vector<16x384xf32> -> vector<16x384xf32>
    %194 = vector.broadcast %4 : vector<1x384xf32> to vector<16x384xf32>
    %195 = arith.addf %193, %194 : vector<16x384xf32>
    %196 = arith.index_cast %c5_i32 : i32 to index
    %c0_57 = arith.constant 0 : index
    %c0_58 = arith.constant 0 : index
    %197 = vector.load %arg2[%196, %c0_57, %c0_58] : memref<8x16x384xbf16, #tpu.memory_space<vmem>>, vector<1x16x384xbf16>
    %198 = vector.shape_cast %197 : vector<1x16x384xbf16> to vector<16x384xbf16>
    %199 = arith.extf %198 : vector<16x384xbf16> to vector<16x384xf32>
    %200 = vector.extract_strided_slice %199 {offsets = [0, 0], sizes = [16, 256], strides = [1, 1]} : vector<16x384xf32> to vector<16x256xf32>
    %201 = vector.extract_strided_slice %195 {offsets = [0, 0], sizes = [16, 256], strides = [1, 1]} : vector<16x384xf32> to vector<16x256xf32>
    %202 = arith.addf %200, %201 : vector<16x256xf32>
    %cst_59 = arith.constant 5.000000e-01 : f32
    %203 = vector.broadcast %cst_59 : f32 to vector<16x256xf32>
    %204 = arith.mulf %203, %202 : vector<16x256xf32>
    %205 = math.tanh %204 : vector<16x256xf32>
    %cst_60 = arith.constant 1.000000e+00 : f32
    %206 = vector.broadcast %cst_60 : f32 to vector<16x256xf32>
    %207 = arith.addf %205, %206 : vector<16x256xf32>
    %cst_61 = arith.constant 5.000000e-01 : f32
    %208 = vector.broadcast %cst_61 : f32 to vector<16x256xf32>
    %209 = arith.mulf %208, %207 : vector<16x256xf32>
    %210 = vector.extract_strided_slice %209 {offsets = [0, 0], sizes = [16, 128], strides = [1, 1]} : vector<16x256xf32> to vector<16x128xf32>
    %211 = vector.extract_strided_slice %209 {offsets = [0, 128], sizes = [16, 128], strides = [1, 1]} : vector<16x256xf32> to vector<16x128xf32>
    %212 = vector.extract_strided_slice %199 {offsets = [0, 256], sizes = [16, 128], strides = [1, 1]} : vector<16x384xf32> to vector<16x128xf32>
    %213 = vector.extract_strided_slice %195 {offsets = [0, 256], sizes = [16, 128], strides = [1, 1]} : vector<16x384xf32> to vector<16x128xf32>
    %214 = arith.mulf %210, %213 : vector<16x128xf32>
    %215 = arith.addf %212, %214 : vector<16x128xf32>
    %216 = math.tanh %215 : vector<16x128xf32>
    %217 = arith.subf %182, %216 : vector<16x128xf32>
    %218 = arith.mulf %211, %217 : vector<16x128xf32>
    %219 = arith.addf %216, %218 : vector<16x128xf32>
    %220 = arith.truncf %219 : vector<16x128xf32> to vector<16x128xbf16>
    %221 = arith.index_cast %c5_i32 : i32 to index
    %c0_62 = arith.constant 0 : index
    %c0_63 = arith.constant 0 : index
    %222 = vector.load %arg6[%221, %c0_62, %c0_63] : memref<8x16x128xbf16, #tpu.memory_space<vmem>>, vector<1x16x128xbf16>
    %223 = vector.shape_cast %222 : vector<1x16x128xbf16> to vector<16x128xbf16>
    %224 = vector.shape_cast %220 : vector<16x128xbf16> to vector<1x16x128xbf16>
    tpu.vector_store %arg6[%221, %c0_62, %c0_63], %224 {strides = array<i32>} : memref<8x16x128xbf16, #tpu.memory_space<vmem>>, vector<1x16x128xbf16>,
    %c7_i32_64 = arith.constant 7 : i32
    %225 = arith.cmpi eq, %c5_i32, %c7_i32_64 : i32
    %226 = arith.andi %5, %225 : i1
    %227 = arith.extui %226 : i1 to i32
    %c0_i32_65 = arith.constant 0 : i32
    %228 = arith.cmpi ne, %227, %c0_i32_65 : i32
    scf.if %228 {
      %c0_89 = arith.constant 0 : index
      %c0_90 = arith.constant 0 : index
      %304 = vector.load %arg7[%c0_89, %c0_90] : memref<16x128xf32, #tpu.memory_space<vmem>>, vector<16x128xf32>
      tpu.vector_store %arg7[%c0_89, %c0_90], %219 {strides = array<i32>} : memref<16x128xf32, #tpu.memory_space<vmem>>, vector<16x128xf32>,
    } else {
    }
    %c6_i32 = arith.constant 6 : i32
    %229 = arith.truncf %219 : vector<16x128xf32> to vector<16x128xbf16>
    %cst_66 = arith.constant dense<0.000000e+00> : vector<16x384xf32>
    %230 = tpu.matmul %229, %3, %cst_66 {dimension_numbers = #tpu.dot_dimension_numbers<[1], [0], [0], [1], [0, 0, 1, 1], [], []>} : vector<16x128xbf16>, vector<128x384xbf16>, vector<16x384xf32> -> vector<16x384xf32>
    %231 = vector.broadcast %4 : vector<1x384xf32> to vector<16x384xf32>
    %232 = arith.addf %230, %231 : vector<16x384xf32>
    %233 = arith.index_cast %c6_i32 : i32 to index
    %c0_67 = arith.constant 0 : index
    %c0_68 = arith.constant 0 : index
    %234 = vector.load %arg2[%233, %c0_67, %c0_68] : memref<8x16x384xbf16, #tpu.memory_space<vmem>>, vector<1x16x384xbf16>
    %235 = vector.shape_cast %234 : vector<1x16x384xbf16> to vector<16x384xbf16>
    %236 = arith.extf %235 : vector<16x384xbf16> to vector<16x384xf32>
    %237 = vector.extract_strided_slice %236 {offsets = [0, 0], sizes = [16, 256], strides = [1, 1]} : vector<16x384xf32> to vector<16x256xf32>
    %238 = vector.extract_strided_slice %232 {offsets = [0, 0], sizes = [16, 256], strides = [1, 1]} : vector<16x384xf32> to vector<16x256xf32>
    %239 = arith.addf %237, %238 : vector<16x256xf32>
    %cst_69 = arith.constant 5.000000e-01 : f32
    %240 = vector.broadcast %cst_69 : f32 to vector<16x256xf32>
    %241 = arith.mulf %240, %239 : vector<16x256xf32>
    %242 = math.tanh %241 : vector<16x256xf32>
    %cst_70 = arith.constant 1.000000e+00 : f32
    %243 = vector.broadcast %cst_70 : f32 to vector<16x256xf32>
    %244 = arith.addf %242, %243 : vector<16x256xf32>
    %cst_71 = arith.constant 5.000000e-01 : f32
    %245 = vector.broadcast %cst_71 : f32 to vector<16x256xf32>
    %246 = arith.mulf %245, %244 : vector<16x256xf32>
    %247 = vector.extract_strided_slice %246 {offsets = [0, 0], sizes = [16, 128], strides = [1, 1]} : vector<16x256xf32> to vector<16x128xf32>
    %248 = vector.extract_strided_slice %246 {offsets = [0, 128], sizes = [16, 128], strides = [1, 1]} : vector<16x256xf32> to vector<16x128xf32>
    %249 = vector.extract_strided_slice %236 {offsets = [0, 256], sizes = [16, 128], strides = [1, 1]} : vector<16x384xf32> to vector<16x128xf32>
    %250 = vector.extract_strided_slice %232 {offsets = [0, 256], sizes = [16, 128], strides = [1, 1]} : vector<16x384xf32> to vector<16x128xf32>
    %251 = arith.mulf %247, %250 : vector<16x128xf32>
    %252 = arith.addf %249, %251 : vector<16x128xf32>
    %253 = math.tanh %252 : vector<16x128xf32>
    %254 = arith.subf %219, %253 : vector<16x128xf32>
    %255 = arith.mulf %248, %254 : vector<16x128xf32>
    %256 = arith.addf %253, %255 : vector<16x128xf32>
    %257 = arith.truncf %256 : vector<16x128xf32> to vector<16x128xbf16>
    %258 = arith.index_cast %c6_i32 : i32 to index
    %c0_72 = arith.constant 0 : index
    %c0_73 = arith.constant 0 : index
    %259 = vector.load %arg6[%258, %c0_72, %c0_73] : memref<8x16x128xbf16, #tpu.memory_space<vmem>>, vector<1x16x128xbf16>
    %260 = vector.shape_cast %259 : vector<1x16x128xbf16> to vector<16x128xbf16>
    %261 = vector.shape_cast %257 : vector<16x128xbf16> to vector<1x16x128xbf16>
    tpu.vector_store %arg6[%258, %c0_72, %c0_73], %261 {strides = array<i32>} : memref<8x16x128xbf16, #tpu.memory_space<vmem>>, vector<1x16x128xbf16>,
    %c7_i32_74 = arith.constant 7 : i32
    %262 = arith.cmpi eq, %c6_i32, %c7_i32_74 : i32
    %263 = arith.andi %5, %262 : i1
    %264 = arith.extui %263 : i1 to i32
    %c0_i32_75 = arith.constant 0 : i32
    %265 = arith.cmpi ne, %264, %c0_i32_75 : i32
    scf.if %265 {
      %c0_89 = arith.constant 0 : index
      %c0_90 = arith.constant 0 : index
      %304 = vector.load %arg7[%c0_89, %c0_90] : memref<16x128xf32, #tpu.memory_space<vmem>>, vector<16x128xf32>
      tpu.vector_store %arg7[%c0_89, %c0_90], %256 {strides = array<i32>} : memref<16x128xf32, #tpu.memory_space<vmem>>, vector<16x128xf32>,
    } else {
    }
    %c7_i32_76 = arith.constant 7 : i32
    %266 = arith.truncf %256 : vector<16x128xf32> to vector<16x128xbf16>
    %cst_77 = arith.constant dense<0.000000e+00> : vector<16x384xf32>
    %267 = tpu.matmul %266, %3, %cst_77 {dimension_numbers = #tpu.dot_dimension_numbers<[1], [0], [0], [1], [0, 0, 1, 1], [], []>} : vector<16x128xbf16>, vector<128x384xbf16>, vector<16x384xf32> -> vector<16x384xf32>
    %268 = vector.broadcast %4 : vector<1x384xf32> to vector<16x384xf32>
    %269 = arith.addf %267, %268 : vector<16x384xf32>
    %270 = arith.index_cast %c7_i32_76 : i32 to index
    %c0_78 = arith.constant 0 : index
    %c0_79 = arith.constant 0 : index
    %271 = vector.load %arg2[%270, %c0_78, %c0_79] : memref<8x16x384xbf16, #tpu.memory_space<vmem>>, vector<1x16x384xbf16>
    %272 = vector.shape_cast %271 : vector<1x16x384xbf16> to vector<16x384xbf16>
    %273 = arith.extf %272 : vector<16x384xbf16> to vector<16x384xf32>
    %274 = vector.extract_strided_slice %273 {offsets = [0, 0], sizes = [16, 256], strides = [1, 1]} : vector<16x384xf32> to vector<16x256xf32>
    %275 = vector.extract_strided_slice %269 {offsets = [0, 0], sizes = [16, 256], strides = [1, 1]} : vector<16x384xf32> to vector<16x256xf32>
    %276 = arith.addf %274, %275 : vector<16x256xf32>
    %cst_80 = arith.constant 5.000000e-01 : f32
    %277 = vector.broadcast %cst_80 : f32 to vector<16x256xf32>
    %278 = arith.mulf %277, %276 : vector<16x256xf32>
    %279 = math.tanh %278 : vector<16x256xf32>
    %cst_81 = arith.constant 1.000000e+00 : f32
    %280 = vector.broadcast %cst_81 : f32 to vector<16x256xf32>
    %281 = arith.addf %279, %280 : vector<16x256xf32>
    %cst_82 = arith.constant 5.000000e-01 : f32
    %282 = vector.broadcast %cst_82 : f32 to vector<16x256xf32>
    %283 = arith.mulf %282, %281 : vector<16x256xf32>
    %284 = vector.extract_strided_slice %283 {offsets = [0, 0], sizes = [16, 128], strides = [1, 1]} : vector<16x256xf32> to vector<16x128xf32>
    %285 = vector.extract_strided_slice %283 {offsets = [0, 128], sizes = [16, 128], strides = [1, 1]} : vector<16x256xf32> to vector<16x128xf32>
    %286 = vector.extract_strided_slice %273 {offsets = [0, 256], sizes = [16, 128], strides = [1, 1]} : vector<16x384xf32> to vector<16x128xf32>
    %287 = vector.extract_strided_slice %269 {offsets = [0, 256], sizes = [16, 128], strides = [1, 1]} : vector<16x384xf32> to vector<16x128xf32>
    %288 = arith.mulf %284, %287 : vector<16x128xf32>
    %289 = arith.addf %286, %288 : vector<16x128xf32>
    %290 = math.tanh %289 : vector<16x128xf32>
    %291 = arith.subf %256, %290 : vector<16x128xf32>
    %292 = arith.mulf %285, %291 : vector<16x128xf32>
    %293 = arith.addf %290, %292 : vector<16x128xf32>
    %294 = arith.truncf %293 : vector<16x128xf32> to vector<16x128xbf16>
    %295 = arith.index_cast %c7_i32_76 : i32 to index
    %c0_83 = arith.constant 0 : index
    %c0_84 = arith.constant 0 : index
    %296 = vector.load %arg6[%295, %c0_83, %c0_84] : memref<8x16x128xbf16, #tpu.memory_space<vmem>>, vector<1x16x128xbf16>
    %297 = vector.shape_cast %296 : vector<1x16x128xbf16> to vector<16x128xbf16>
    %298 = vector.shape_cast %294 : vector<16x128xbf16> to vector<1x16x128xbf16>
    tpu.vector_store %arg6[%295, %c0_83, %c0_84], %298 {strides = array<i32>} : memref<8x16x128xbf16, #tpu.memory_space<vmem>>, vector<1x16x128xbf16>,
    %c7_i32_85 = arith.constant 7 : i32
    %299 = arith.cmpi eq, %c7_i32_76, %c7_i32_85 : i32
    %300 = arith.andi %5, %299 : i1
    %301 = arith.extui %300 : i1 to i32
    %c0_i32_86 = arith.constant 0 : i32
    %302 = arith.cmpi ne, %301, %c0_i32_86 : i32
    scf.if %302 {
      %c0_89 = arith.constant 0 : index
      %c0_90 = arith.constant 0 : index
      %304 = vector.load %arg7[%c0_89, %c0_90] : memref<16x128xf32, #tpu.memory_space<vmem>>, vector<16x128xf32>
      tpu.vector_store %arg7[%c0_89, %c0_90], %293 {strides = array<i32>} : memref<16x128xf32, #tpu.memory_space<vmem>>, vector<16x128xf32>,
    } else {
    }
    %c8_i32 = arith.constant 8 : i32
    %c0_87 = arith.constant 0 : index
    %c0_88 = arith.constant 0 : index
    %303 = vector.load %arg8[%c0_87, %c0_88] : memref<16x128xf32, #tpu.memory_space<vmem>>, vector<16x128xf32>
    tpu.vector_store %arg8[%c0_87, %c0_88], %293 {strides = array<i32>} : memref<16x128xf32, #tpu.memory_space<vmem>>, vector<16x128xf32>,
    return
  }
  func.func @transform_0(%arg0: i32, %arg1: i32) -> (i32, i32, i32) {
    %c0_i32 = arith.constant 0 : i32
    %c0_i32_0 = arith.constant 0 : i32
    return %arg1, %arg0, %c0_i32 : i32, i32, i32
  }
  func.func @transform_1(%arg0: i32, %arg1: i32) -> (i32, i32) {
    %c0_i32 = arith.constant 0 : i32
    %c0_i32_0 = arith.constant 0 : i32
    return %arg0, %c0_i32 : i32, i32
  }
  func.func @transform_2(%arg0: i32, %arg1: i32) -> (i32, i32) {
    %c0_i32 = arith.constant 0 : i32
    %c0_i32_0 = arith.constant 0 : i32
    %c0_i32_1 = arith.constant 0 : i32
    return %c0_i32, %c0_i32_0 : i32, i32
  }
  func.func @transform_3(%arg0: i32, %arg1: i32) -> (i32, i32) {
    %c0_i32 = arith.constant 0 : i32
    %c0_i32_0 = arith.constant 0 : i32
    %c0_i32_1 = arith.constant 0 : i32
    return %c0_i32, %c0_i32_0 : i32, i32
  }
  func.func @transform_4(%arg0: i32, %arg1: i32) -> (i32, i32, i32) {
    %c0_i32 = arith.constant 0 : i32
    %c0_i32_0 = arith.constant 0 : i32
    return %arg1, %arg0, %c0_i32 : i32, i32, i32
  }
  func.func @transform_5(%arg0: i32, %arg1: i32) -> (i32, i32) {
    %c0_i32 = arith.constant 0 : i32
    %c0_i32_0 = arith.constant 0 : i32
    return %arg0, %c0_i32 : i32, i32
  }
}

module attributes {stable_mosaic.version = 11 : i64} {
  func.func @_linear_kernel(%arg0: i32, %arg1: i32, %arg2: memref<128x128xbf16, #tpu.memory_space<vmem>>, %arg3: memref<128x384xbf16, #tpu.memory_space<vmem>>, %arg4: memref<1x384xf32, #tpu.memory_space<vmem>>, %arg5: memref<128x384xbf16, #tpu.memory_space<vmem>>) attributes {dimension_semantics = [#tpu.dimension_semantics<parallel>, #tpu.dimension_semantics<parallel>], iteration_bounds = array<i64: 1, 1>, scalar_prefetch = 0 : i64, scratch_operands = 0 : i64, tpu.core_type = #tpu.core_type<tc>, window_params = [{transform_indices = @transform_0, window_bounds = array<i64: 128, 128>}, {transform_indices = @transform_1, window_bounds = array<i64: 128, 384>}, {transform_indices = @transform_2, window_bounds = array<i64: 1, 384>}, {transform_indices = @transform_3, window_bounds = array<i64: 128, 384>}]} {
    %c0 = arith.constant 0 : index
    %c0_0 = arith.constant 0 : index
    %0 = vector.load %arg2[%c0, %c0_0] : memref<128x128xbf16, #tpu.memory_space<vmem>>, vector<128x128xbf16>
    %c0_1 = arith.constant 0 : index
    %c0_2 = arith.constant 0 : index
    %1 = vector.load %arg3[%c0_1, %c0_2] : memref<128x384xbf16, #tpu.memory_space<vmem>>, vector<128x384xbf16>
    %cst = arith.constant dense<0.000000e+00> : vector<128x384xf32>
    %2 = tpu.matmul %0, %1, %cst {dimension_numbers = #tpu.dot_dimension_numbers<[1], [0], [0], [1], [0, 0, 1, 1], [], []>} : vector<128x128xbf16>, vector<128x384xbf16>, vector<128x384xf32> -> vector<128x384xf32>
    %c0_3 = arith.constant 0 : index
    %c0_4 = arith.constant 0 : index
    %3 = vector.load %arg4[%c0_3, %c0_4] : memref<1x384xf32, #tpu.memory_space<vmem>>, vector<1x384xf32>
    %4 = vector.broadcast %3 : vector<1x384xf32> to vector<128x384xf32>
    %5 = arith.addf %2, %4 : vector<128x384xf32>
    %6 = arith.truncf %5 : vector<128x384xf32> to vector<128x384xbf16>
    %c0_5 = arith.constant 0 : index
    %c0_6 = arith.constant 0 : index
    %7 = vector.load %arg5[%c0_5, %c0_6] : memref<128x384xbf16, #tpu.memory_space<vmem>>, vector<128x384xbf16>
    tpu.vector_store %arg5[%c0_5, %c0_6], %6 {strides = array<i32>} : memref<128x384xbf16, #tpu.memory_space<vmem>>, vector<128x384xbf16>,
    return
  }
  func.func @transform_0(%arg0: i32, %arg1: i32) -> (i32, i32) {
    %c0_i32 = arith.constant 0 : i32
    %c0_i32_0 = arith.constant 0 : i32
    return %arg0, %c0_i32 : i32, i32
  }
  func.func @transform_1(%arg0: i32, %arg1: i32) -> (i32, i32) {
    %c0_i32 = arith.constant 0 : i32
    %c0_i32_0 = arith.constant 0 : i32
    return %c0_i32, %arg1 : i32, i32
  }
  func.func @transform_2(%arg0: i32, %arg1: i32) -> (i32, i32) {
    %c0_i32 = arith.constant 0 : i32
    %c0_i32_0 = arith.constant 0 : i32
    return %c0_i32, %arg1 : i32, i32
  }
  func.func @transform_3(%arg0: i32, %arg1: i32) -> (i32, i32) {
    %c0_i32 = arith.constant 0 : i32
    return %arg0, %arg1 : i32, i32
  }
}

module attributes {stable_mosaic.version = 11 : i64} {
  func.func @_linear_kernel(%arg0: i32, %arg1: i32, %arg2: memref<128x128xbf16, #tpu.memory_space<vmem>>, %arg3: memref<128x128xbf16, #tpu.memory_space<vmem>>, %arg4: memref<1x128xf32, #tpu.memory_space<vmem>>, %arg5: memref<128x128xf32, #tpu.memory_space<vmem>>) attributes {dimension_semantics = [#tpu.dimension_semantics<parallel>, #tpu.dimension_semantics<parallel>], iteration_bounds = array<i64: 1, 1>, scalar_prefetch = 0 : i64, scratch_operands = 0 : i64, tpu.core_type = #tpu.core_type<tc>, window_params = [{transform_indices = @transform_0, window_bounds = array<i64: 128, 128>}, {transform_indices = @transform_1, window_bounds = array<i64: 128, 128>}, {transform_indices = @transform_2, window_bounds = array<i64: 1, 128>}, {transform_indices = @transform_3, window_bounds = array<i64: 128, 128>}]} {
    %c0 = arith.constant 0 : index
    %c0_0 = arith.constant 0 : index
    %0 = vector.load %arg2[%c0, %c0_0] : memref<128x128xbf16, #tpu.memory_space<vmem>>, vector<128x128xbf16>
    %c0_1 = arith.constant 0 : index
    %c0_2 = arith.constant 0 : index
    %1 = vector.load %arg3[%c0_1, %c0_2] : memref<128x128xbf16, #tpu.memory_space<vmem>>, vector<128x128xbf16>
    %cst = arith.constant dense<0.000000e+00> : vector<128x128xf32>
    %2 = tpu.matmul %0, %1, %cst {dimension_numbers = #tpu.dot_dimension_numbers<[1], [0], [0], [1], [0, 0, 1, 1], [], []>} : vector<128x128xbf16>, vector<128x128xbf16>, vector<128x128xf32> -> vector<128x128xf32>
    %c0_3 = arith.constant 0 : index
    %c0_4 = arith.constant 0 : index
    %3 = vector.load %arg4[%c0_3, %c0_4] : memref<1x128xf32, #tpu.memory_space<vmem>>, vector<1x128xf32>
    %4 = vector.broadcast %3 : vector<1x128xf32> to vector<128x128xf32>
    %5 = arith.addf %2, %4 : vector<128x128xf32>
    %c0_5 = arith.constant 0 : index
    %c0_6 = arith.constant 0 : index
    %6 = vector.load %arg5[%c0_5, %c0_6] : memref<128x128xf32, #tpu.memory_space<vmem>>, vector<128x128xf32>
    tpu.vector_store %arg5[%c0_5, %c0_6], %5 {strides = array<i32>} : memref<128x128xf32, #tpu.memory_space<vmem>>, vector<128x128xf32>,
    return
  }
  func.func @transform_0(%arg0: i32, %arg1: i32) -> (i32, i32) {
    %c0_i32 = arith.constant 0 : i32
    %c0_i32_0 = arith.constant 0 : i32
    return %arg0, %c0_i32 : i32, i32
  }
  func.func @transform_1(%arg0: i32, %arg1: i32) -> (i32, i32) {
    %c0_i32 = arith.constant 0 : i32
    %c0_i32_0 = arith.constant 0 : i32
    return %c0_i32, %arg1 : i32, i32
  }
  func.func @transform_2(%arg0: i32, %arg1: i32) -> (i32, i32) {
    %c0_i32 = arith.constant 0 : i32
    %c0_i32_0 = arith.constant 0 : i32
    return %c0_i32, %arg1 : i32, i32
  }
  func.func @transform_3(%arg0: i32, %arg1: i32) -> (i32, i32) {
    %c0_i32 = arith.constant 0 : i32
    return %arg0, %arg1 : i32, i32
  }
}

module attributes {stable_mosaic.version = 11 : i64} {
  func.func @_linear_kernel(%arg0: i32, %arg1: i32, %arg2: memref<128x16xbf16, #tpu.memory_space<vmem>>, %arg3: memref<16x384xbf16, #tpu.memory_space<vmem>>, %arg4: memref<1x384xf32, #tpu.memory_space<vmem>>, %arg5: memref<128x384xbf16, #tpu.memory_space<vmem>>) attributes {dimension_semantics = [#tpu.dimension_semantics<parallel>, #tpu.dimension_semantics<parallel>], iteration_bounds = array<i64: 1, 1>, scalar_prefetch = 0 : i64, scratch_operands = 0 : i64, tpu.core_type = #tpu.core_type<tc>, window_params = [{transform_indices = @transform_0, window_bounds = array<i64: 128, 16>}, {transform_indices = @transform_1, window_bounds = array<i64: 16, 384>}, {transform_indices = @transform_2, window_bounds = array<i64: 1, 384>}, {transform_indices = @transform_3, window_bounds = array<i64: 128, 384>}]} {
    %c0 = arith.constant 0 : index
    %c0_0 = arith.constant 0 : index
    %0 = vector.load %arg2[%c0, %c0_0] : memref<128x16xbf16, #tpu.memory_space<vmem>>, vector<128x16xbf16>
    %c0_1 = arith.constant 0 : index
    %c0_2 = arith.constant 0 : index
    %1 = vector.load %arg3[%c0_1, %c0_2] : memref<16x384xbf16, #tpu.memory_space<vmem>>, vector<16x384xbf16>
    %cst = arith.constant dense<0.000000e+00> : vector<128x384xf32>
    %2 = tpu.matmul %0, %1, %cst {dimension_numbers = #tpu.dot_dimension_numbers<[1], [0], [0], [1], [0, 0, 1, 1], [], []>} : vector<128x16xbf16>, vector<16x384xbf16>, vector<128x384xf32> -> vector<128x384xf32>
    %c0_3 = arith.constant 0 : index
    %c0_4 = arith.constant 0 : index
    %3 = vector.load %arg4[%c0_3, %c0_4] : memref<1x384xf32, #tpu.memory_space<vmem>>, vector<1x384xf32>
    %4 = vector.broadcast %3 : vector<1x384xf32> to vector<128x384xf32>
    %5 = arith.addf %2, %4 : vector<128x384xf32>
    %6 = arith.truncf %5 : vector<128x384xf32> to vector<128x384xbf16>
    %c0_5 = arith.constant 0 : index
    %c0_6 = arith.constant 0 : index
    %7 = vector.load %arg5[%c0_5, %c0_6] : memref<128x384xbf16, #tpu.memory_space<vmem>>, vector<128x384xbf16>
    tpu.vector_store %arg5[%c0_5, %c0_6], %6 {strides = array<i32>} : memref<128x384xbf16, #tpu.memory_space<vmem>>, vector<128x384xbf16>,
    return
  }
  func.func @transform_0(%arg0: i32, %arg1: i32) -> (i32, i32) {
    %c0_i32 = arith.constant 0 : i32
    %c0_i32_0 = arith.constant 0 : i32
    return %arg0, %c0_i32 : i32, i32
  }
  func.func @transform_1(%arg0: i32, %arg1: i32) -> (i32, i32) {
    %c0_i32 = arith.constant 0 : i32
    %c0_i32_0 = arith.constant 0 : i32
    return %c0_i32, %arg1 : i32, i32
  }
  func.func @transform_2(%arg0: i32, %arg1: i32) -> (i32, i32) {
    %c0_i32 = arith.constant 0 : i32
    %c0_i32_0 = arith.constant 0 : i32
    return %c0_i32, %arg1 : i32, i32
  }
  func.func @transform_3(%arg0: i32, %arg1: i32) -> (i32, i32) {
    %c0_i32 = arith.constant 0 : i32
    return %arg0, %arg1 : i32, i32
  }
}

</mosaic_0001>

<bundles_post_ra>
// kernel: tpu_custom_call.1
= control target key start
LH: loop header
LB: loop body
LE: loop exit
PB: predicated region body
PF: predicated region fallthrough
CT: control target
= control target key end

     0   :  { %7 = vsyncpa [#allocation3], 0  ;;  %s690_s0 = inlined_call_operand.hbm [shape: f32[16,128], index: 0, kind: input, shape index: {}]   ;;  %s691_s1 = inlined_call_operand.hbm [shape: f32[8,128], index: 1, kind: input, shape index: {}]   ;;  %s692_s2 = inlined_call_operand.hbm [shape: f32[16,128], index: 2, kind: output, shape index: {}]  }
   0x1   :  { %9 = vsyncpa [#allocation3 + $0x1], 0 }
   0x2   :  { %10 = vsyncpa [#allocation6], 0 }
   0x3   :  { %11 = vsyncpa [#allocation4], 0 }
   0x4   :  { %13 = vsyncpa [#allocation4 + $0x1], 0  ;;  %s489_s9 = smov 0   ;;  %s491_s10 = smov 0  }
   0x5   :  { %s493_s11 = smov 0   ;;  %s495_s12 = smov 0  }
   0x6 LB: > { %s510_s13 = sadd.s32 4294967295, %s469_s12   ;;  %s270_s14 = sadd.s32 4294967294, %s469_s12   ;;  %s469_s12 = sphi %s495_s12, %s716_s12   ;;  %s465_s11 = sphi %s493_s11, %s715_s11   ;;  %s461_s10 = sphi %s491_s10, %s714_s10   ;;  %s457_s9 = sphi %s489_s9, %s713_s9  }
   0x7   : > { %p39_p0 = scmp.ne.s32.totalorder %s461_s10, %s457_s9  ;;  %p693_p1 = scmp.eq.s32.totalorder %s510_s13, 0 }
   0x8   : > { %p90_p3 = scmp.eq.s32.totalorder %s270_s14, 1  ;;  %p271_p5 = scmp.ge.s32.totalorder %s469_s12, 1 }
   0x9   : > { %p519_p4 = por %p693_p1, %p39_p0  ;;  %p97_p7 = scmp.lt.s32.totalorder %s469_s12, 3 }
   0xa   : > { %p524_p6 = por %p90_p3, %p39_p0  ;;  %s471_s18 = smov [#allocation5]  }
   0xb   : > { %s696_s15 = scalar_select %p519_p4, 1, 0 }
   0xc   : > { %s697_s16 = scalar_select %p524_p6, 1, 0 }
   0xd   : > { %p529_p8 = pnand %p271_p5, %p97_p7  ;;  %s110_s19 = sshll.u32 %s471_s18, 4  ;;  %s111_s19 = int_to_ptr.vmem [resolvable:$true] %s110_s19 }
   0xe   : > { %s537_s20 = sadd.s32 1, %s469_s12   ;;  %s26_s24 = sadd.s32 1, %s465_s11 }
   0xf   : > { %s698_s17 = scalar_select %p529_p8, 1, 0 }
  0x10   : > { %p292_p10 = pneg %p529_p8  ;;  %s23_s22 = ssub.s32 %s469_s12, %s537_s20 }
  0x11   : > { %p547_p12 = scmp.eq.s32.totalorder %s23_s22, 0  ;;  %s341_s27 = scalar_lea.hbm %s691_s1, 128 }
  0x12   : > { %p541_p11 = pnand %p292_p10, %p693_p1  ;;  %p342_p0 = scmp.ne.s32.totalorder %s691_s1, %s341_s27 }
  0x13   : > { %s700_s23 = scalar_select %p547_p12, 1, 0 }
  0x14   : > { %p343_p3 = pneg %p541_p11  ;;  %p348_p10 = scmp.lt.u32.totalorder %s341_s27, %s691_s1 }
  0x16   : > { %p344_p5 = pnand %p343_p3, %p342_p0 }
  0x18   : > { %p345_p7 = pneg %p344_p5 }
  0x1a   : > { %p350_p9 = pnand %p348_p10, %p345_p7 }
  0x1c   : > { %353 = shalt.err (!%p350_p9)
}
  0x1d   : > { %s354_s4 = scalar_lea.vmem %s111_s19, 128  ;;  %p362_p6 = scmp.lt.s32.totalorder %s111_s19, %s111_s19 }
  0x1e   : > { %p355_p1 = scmp.ne.s32.totalorder %s111_s19, %s354_s4  ;;  %p363_p4 = scmp.lt.s32.totalorder %s354_s4, %s354_s4 }
  0x20   : > { %p357_p2 = pnand %p355_p1, %p343_p3  ;;  %p364_p8 = por %p363_p4, %p362_p6 }
  0x22   : > { %p358_p13 = pneg %p357_p2 }
  0x24   : > { %p365_p12 = pnand %p364_p8, %p358_p13 }
  0x26   : > { %368 = shalt.err (!%p365_p12)
}
  0x27   : > { %295 = dma.hbm_to_vmem [thread:$0]  (!%p541_p11), %s691_s1, 128, %s111_s19, [#allocation6]  }
  0x28   : > { %p701_p1 = scmp.ne.s32.totalorder %s700_s23, 0  ;;  %p34_p2 = scmp.eq.s32.totalorder %s469_s12, 0 }
  0x29   : > { %p702_p4 = scmp.ne.s32.totalorder %s465_s11, %s461_s10  ;;  %p703_p6 = scmp.eq.s32.totalorder %s510_s13, 1 }
  0x2a   : > { %s573_s7 = scalar_select %p701_p1, %s465_s11, %s26_s24  }
  0x2b   : > { %p581_p8 = por %p703_p6, %p702_p4  ;;  %p305_p9 = scmp.lt.s32.totalorder %s469_s12, 2 }
  0x2c   : > { %s121_s14 = sand.u32 1, %s465_s11   ;;  %p705_p12 = pmov %p702_p4 }
  0x2d   : > { %s274_s18 = sshll.u32 %s121_s14, 3  ;;  %s275_s21 = sshll.u32 %s469_s12, 7 }
  0x2e   : > { %p35_p13 = por %p34_p2, %p705_p12  ;;  %s594_s19 = scalar_lea.hbm %s690_s0, %s275_s21 }
  0x2f   : > { %s125_s23 = scalar_lea.vmem [#allocation2], %s274_s18  ;;  %s122_s27 = scalar_lea.sflag [#allocation3], %s121_s14 }
  0x30   : > { %s132_s24 = sshll.u32 %s125_s23, 4  ;;  %p596_p11 = pnand %p305_p9, %p35_p13  ;;  %s600_s24 = int_to_ptr.vmem [resolvable:$true] %s132_s24 }
  0x31   : > { %s369_s28 = scalar_lea.hbm %s594_s19, 128  ;;  %s374_s3 = scalar_lea.hbm %s690_s0, 256 }
  0x32   : > { %p370_p0 = scmp.ne.s32.totalorder %s594_s19, %s369_s28  ;;  %p371_p3 = pneg %p596_p11 }
  0x33   : > { %p375_p10 = scmp.lt.u32.totalorder %s594_s19, %s690_s0  ;;  %p376_p1 = scmp.lt.u32.totalorder %s374_s3, %s369_s28 }
  0x34   : > { %p372_p5 = pnand %p371_p3, %p370_p0  ;;  %p378_p4 = scmp.lt.u32.totalorder %s369_s28, %s594_s19 }
  0x35   : > { %p377_p2 = por %p376_p1, %p375_p10 }
  0x36   : > { %p373_p7 = pneg %p372_p5 }
  0x37   : > { %p379_p6 = por %p378_p4, %p377_p2 }
  0x39   : > { %p380_p9 = pnand %p379_p6, %p373_p7 }
  0x3b   : > { %383 = shalt.err (!%p380_p9)
}
  0x3c   : > { %s384_s6 = scalar_lea.vmem %s600_s24, 128  ;;  %s472_s14 = smov [#allocation2]  }
  0x3d   : > { %p385_p12 = scmp.ne.s32.totalorder %s600_s24, %s384_s6  ;;  %s389_s18 = sshll.u32 %s472_s14, 4  ;;  %s390_s18 = int_to_ptr.vmem [resolvable:$false] %s389_s18 }
  0x3e   : > { %s391_s21 = scalar_lea.vmem %s390_s18, 256  ;;  %p392_p5 = scmp.lt.s32.totalorder %s600_s24, %s390_s18 }
  0x3f   : > { %p387_p13 = pnand %p385_p12, %p371_p3  ;;  %p393_p10 = scmp.lt.s32.totalorder %s391_s21, %s384_s6 }
  0x41   : > { %p388_p0 = pneg %p387_p13  ;;  %p394_p1 = por %p393_p10, %p392_p5 }
  0x43   : > { %p395_p2 = pnand %p394_p1, %p388_p0 }
  0x45   : > { %398 = shalt.err (!%p395_p2)
}
  0x46   : > { %299 = dma.hbm_to_vmem [thread:$0]  (!%p596_p11), %s594_s19, 128, %s600_s24, %s122_s27  }
  0x47   : > { %p707_p7 = scmp.ne.s32.totalorder %s698_s17, 0 }
  0x48   : > { %s630_s22 = sand.u32 (!%p707_p7), 1, %s461_s10   ;;  %p708_p3 = scmp.ne.s32.totalorder (!%p707_p7), %s696_s15, 0 }
  0x49   : > { %141 = sbr.rel (%p707_p7) target bundleno = 109 (0x6d), region = 28  ;;  %s277_s25 = sshll.u32 (!%p707_p7), %s630_s22, 3 }
  0x4a   : > { %s144_s23 = scalar_lea.sflag (!%p707_p7), [#allocation3], %s630_s22  ;;  %s147_s28 = scalar_lea.vmem (!%p707_p7), [#allocation2], %s277_s25 }
  0x50   : > { %444 = dma.done.wait (%p708_p3), %s144_s23, 128  }
  0x51   : > { %446 = vsyncadd (%p708_p3), %s144_s23, 4294967168  ;;  %p709_p4 = scmp.eq.s32.totalorder %s510_s13, 0 }
  0x53   : > { %448 = dma.done.wait (%p709_p4), [#allocation6], 128   ;;  %p710_p11 = pmov %p709_p4 }
  0x54   : > { %s171_s17 = scalar_lea.vmem [#allocation7], %s277_s25  ;;  %s281_s24 = sshll.u32 %s510_s13, 7  ;;  %v172_v0 = vld [vmem:[%s147_s28] sm:$0xff]  ;;  %v173_v1 = vld [vmem:[#allocation5] sm:$0xff] }
  0x55   : > { %450 = vsyncadd (%p710_p11), [#allocation6], 4294967168  ;;  %s190_s19 = sshll.u32 %s171_s17, 4  ;;  %v174_v2 = vadd.f32 %v173_v1, %v172_v0  ;;  %s648_s27 = scalar_lea.hbm %s692_s2, %s281_s24  ;;  %s643_s19 = int_to_ptr.vmem [resolvable:$true] %s190_s19 }
  0x56   : > { %s177_s29 = scalar_lea.sflag [#allocation4], %s630_s22  ;;  %s399_s30 = scalar_lea.vmem %s643_s19, 128 }
  0x57   : > { %175 = vst [vmem:[%s171_s17] sm:$0xff] %v174_v2  ;;  %p400_p6 = scmp.ne.s32.totalorder %s643_s19, %s399_s30  ;;  %s473_s13 = smov [#allocation7]  }
  0x58   : > { %s403_s3 = sshll.u32 %s473_s13, 4  ;;  %s404_s3 = int_to_ptr.vmem [resolvable:$false] %s403_s3 }
  0x59   : > { %p401_p9 = pnand %p400_p6, %p581_p8  ;;  %s405_s4 = scalar_lea.vmem %s404_s3, 256 }
  0x5a   : > { %p406_p13 = scmp.lt.s32.totalorder %s643_s19, %s404_s3  ;;  %p407_p0 = scmp.lt.s32.totalorder %s405_s4, %s399_s30 }
  0x5b   : > { %p402_p12 = pneg %p401_p9 }
  0x5c   : > { %p408_p5 = por %p407_p0, %p406_p13 }
  0x5e   : > { %p409_p10 = pnand %p408_p5, %p402_p12 }
  0x60   : > { %412 = shalt.err (!%p409_p10)
}
  0x61   : > { %s413_s5 = scalar_lea.hbm %s648_s27, 128  ;;  %s417_s18 = scalar_lea.hbm %s692_s2, 256 }
  0x62   : > { %p414_p1 = scmp.ne.s32.totalorder %s648_s27, %s413_s5  ;;  %p418_p3 = scmp.lt.u32.totalorder %s648_s27, %s692_s2 }
  0x63   : > { %p419_p4 = scmp.lt.u32.totalorder %s417_s18, %s413_s5  ;;  %p421_p6 = scmp.lt.u32.totalorder %s413_s5, %s648_s27 }
  0x64   : > { %p415_p2 = pnand %p414_p1, %p581_p8 }
  0x65   : > { %p420_p11 = por %p419_p4, %p418_p3 }
  0x66   : > { %p416_p7 = pneg %p415_p2 }
  0x67   : > { %p422_p9 = por %p421_p6, %p420_p11 }
  0x69   : > { %p423_p12 = pnand %p422_p9, %p416_p7 }
  0x6b   : > { %426 = shalt.err (!%p423_p12)
}
  0x6c   : > { %290 = dma.vmem_to_hbm [thread:$0]  (%p581_p8), %s643_s19, 128, %s648_s27, %s177_s29  }
  0x6d PF: > { %s202_s25 = sand.u32 1, %s457_s9   ;;  %p711_p13 = scmp.ne.s32.totalorder %s697_s16, 0 }
  0x6e   : > { %p712_p0 = scmp.ge.s32.totalorder %s469_s12, 2  ;;  %s203_s23 = scalar_lea.sflag [#allocation4], %s202_s25 }
  0x70   : > { %p301_p5 = pnand %p712_p0, %p711_p13 }
  0x72   : > { %452 = dma.done.wait (!%p301_p5), %s203_s23, 128  }
  0x73   : > { %454 = vsyncadd (!%p301_p5), %s203_s23, 4294967168  ;;  %p16_p10 = scmp.ge.s32.totalorder %s537_s20, 4   ;;  %s713_s9 = smov %s461_s10 }
  0x74   : > { %s714_s10 = smov %s465_s11  ;;  %s715_s11 = smov %s573_s7 }
  0x75   : > { %s716_s12 = smov %s537_s20  ;;  %18 = sbr.rel (!%p16_p10) target bundleno = 6 (0x6), region = 77 }
  0x7c   :  { %208 = vsyncpa [#allocation3], 1 }
  0x7d   :  { %210 = vsyncpa [#allocation3 + $0x1], 1 }
  0x7e   :  { %211 = vsyncpa [#allocation6], 1 }
  0x7f   :  { %212 = vsyncpa [#allocation4], 1 }
  0x80   :  { %214 = vsyncpa [#allocation4 + $0x1], 1 }

// kernel: rnn_model_forward.9
= control target key start
LH: loop header
LB: loop body
LE: loop exit
PB: predicated region body
PF: predicated region fallthrough
CT: control target
= control target key end

     0   :  { %s483_s1 = inlined_call_operand.vmem [shape: bf16[128,128], index: 1, kind: input, shape index: {}]   ;;  %s484_s0 = inlined_call_operand.vmem [shape: bf16[128,128], index: 0, kind: input, shape index: {}]   ;;  %s485_s2 = inlined_call_operand.vmem [shape: f32[1,128], index: 2, kind: input, shape index: {}]   ;;  %s486_s3 = inlined_call_operand.vmem [shape: f32[128,128], index: 3, kind: output, shape index: {}]  }
   0x1   :  { %v348_v0 = vld [vmem:[%s483_s1] sm:$0xff]   ;;  %v349_v1 = vld [vmem:[%s483_s1 + $0x8] sm:$0xff]   ;;  %v350_v2 = vld [vmem:[%s483_s1 + $0x10] sm:$0xff]  }
   0x2   :  { %300 = vmatprep.subr.bf16.mxu0 %v348_v0  ;;  %332 = vmatprep.subr.bf16.mxu1 %v348_v0  ;;  %v351_v3 = vld [vmem:[%s483_s1 + $0x18] sm:$0xff]   ;;  %v356_v4 = vld [vmem:[%s484_s0] sm:$0xff]   ;;  %v353_v7 = vld [vmem:[%s483_s1 + $0x28] sm:$0xff]  }
   0x3   :  { %301 = vmatpush3.bf16.msra.mxu0 %v348_v0  ;;  %340 = vmatpush3.bf16.msra.mxu1 %v348_v0  ;;  %v357_v5 = vld [vmem:[%s484_s0 + $0x20] sm:$0xff]   ;;  %v354_v8 = vld [vmem:[%s483_s1 + $0x30] sm:$0xff]   ;;  %v355_v9 = vld [vmem:[%s483_s1 + $0x38] sm:$0xff]  }
   0x4   :  { %302 = vmatprep.subr.bf16.mxu0 %v349_v1  ;;  %333 = vmatprep.subr.bf16.mxu1 %v349_v1  ;;  %v352_v6 = vld [vmem:[%s483_s1 + $0x20] sm:$0xff]   ;;  %v358_v10 = vld [vmem:[%s484_s0 + $0x8] sm:$0xff]   ;;  %v360_v12 = vld [vmem:[%s484_s0 + $0x10] sm:$0xff]  }
   0x5   :  { %316 = vmatprep.mubr.bf16.mxu0 %v356_v4  ;;  %324 = vmatprep.mubr.bf16.mxu1 %v357_v5  ;;  %v359_v11 = vld [vmem:[%s484_s0 + $0x28] sm:$0xff]   ;;  %v361_v13 = vld [vmem:[%s484_s0 + $0x30] sm:$0xff]   ;;  %v362_v14 = vld [vmem:[%s484_s0 + $0x18] sm:$0xff]  }
   0x6   :  { %v363_v15 = vld [vmem:[%s484_s0 + $0x38] sm:$0xff]   ;;  %v267_v16 = vld [vmem:[%s485_s2] ss:$0 sm:$0xff] }
   0x7   :  { %303 = vmatpush3.bf16.msra.mxu0 %v349_v1  ;;  %341 = vmatpush3.bf16.msra.mxu1 %v349_v1 }
   0x8   :  { %304 = vmatprep.subr.bf16.mxu0 %v350_v2  ;;  %334 = vmatprep.subr.bf16.mxu1 %v350_v2 }
   0xb   :  { %305 = vmatpush3.bf16.msra.mxu0 %v350_v2  ;;  %342 = vmatpush3.bf16.msra.mxu1 %v350_v2 }
   0xc   :  { %306 = vmatprep.subr.bf16.mxu0 %v351_v3  ;;  %335 = vmatprep.subr.bf16.mxu1 %v351_v3 }
   0xf   :  { %307 = vmatpush3.bf16.msra.mxu0 %v351_v3  ;;  %343 = vmatpush3.bf16.msra.mxu1 %v351_v3 }
  0x10   :  { %308 = vmatprep.subr.bf16.mxu0 %v352_v6  ;;  %336 = vmatprep.subr.bf16.mxu1 %v352_v6 }
  0x13   :  { %309 = vmatpush3.bf16.msra.mxu0 %v352_v6  ;;  %344 = vmatpush3.bf16.msra.mxu1 %v352_v6 }
  0x14   :  { %310 = vmatprep.subr.bf16.mxu0 %v353_v7  ;;  %337 = vmatprep.subr.bf16.mxu1 %v353_v7 }
  0x17   :  { %311 = vmatpush3.bf16.msra.mxu0 %v353_v7  ;;  %345 = vmatpush3.bf16.msra.mxu1 %v353_v7 }
  0x18   :  { %312 = vmatprep.subr.bf16.mxu0 %v354_v8  ;;  %338 = vmatprep.subr.bf16.mxu1 %v354_v8 }
  0x1b   :  { %313 = vmatpush3.bf16.msra.mxu0 %v354_v8  ;;  %346 = vmatpush3.bf16.msra.mxu1 %v354_v8 }
  0x1c   :  { %314 = vmatprep.subr.bf16.mxu0 %v355_v9  ;;  %339 = vmatprep.subr.bf16.mxu1 %v355_v9 }
  0x1f   :  { %315 = vmatpush3.bf16.msra.mxu0 %v355_v9  ;;  %347 = vmatpush3.bf16.msra.mxu1 %v355_v9 }
  0x22   :  { %317 = vmatmul.mubr.bf16.vlgmr.msra.gmra.mrb[0].mxu0 %v358_v10  ;;  %325 = vmatmul.mubr.bf16.vlgmr.msra.gmra.mrb[0].mxu1 %v359_v11 }
  0x23   :  { %320 = vmatprep.mubr.bf16.mxu0 %v360_v12  ;;  %328 = vmatprep.mubr.bf16.mxu1 %v361_v13 }
  0x2a   :  { %321 = vmatmul.mubr.bf16.gmra.mrb[4].mxu0 %v362_v14  ;;  %329 = vmatmul.mubr.bf16.gmra.mrb[4].mxu1 %v363_v15 }
  0xf5   :  { %v318_v17 = vpop.f32.mrb[0].mxu0  ;;  %v326_v18 = vpop.f32.mrb[0].mxu1 }
  0xf6   :  { %v193_v19 = vadd.f32 %v318_v17, %v267_v16  ;;  %v225_v20 = vadd.f32 %v326_v18, %v267_v16  ;;  %v184_v21 = vpop.f32.mrb[1].mxu0  ;;  %v216_v22 = vpop.f32.mrb[1].mxu1 }
  0xf7   :  { %v185_v23 = vadd.f32 %v267_v16, %v184_v21  ;;  %v217_v24 = vadd.f32 %v267_v16, %v216_v22  ;;  %v319_v25 = vpop.f32.mrb[2].mxu0  ;;  %v327_v26 = vpop.f32.mrb[2].mxu1 }
  0xf8   :  { %249 = vst [vmem:[%s486_s3 + $0x10] sm:$0xff] %v193_v19  ;;  %257 = vst [vmem:[%s486_s3 + $0x50] sm:$0xff] %v225_v20  ;;  %v196_v27 = vadd.f32 %v319_v25, %v267_v16  ;;  %v228_v28 = vadd.f32 %v327_v26, %v267_v16  ;;  %v187_v29 = vpop.f32.mrb[3].mxu0  ;;  %v219_v30 = vpop.f32.mrb[3].mxu1 }
  0xf9   :  { %247 = vst [vmem:[%s486_s3] sm:$0xff] %v185_v23  ;;  %255 = vst [vmem:[%s486_s3 + $0x40] sm:$0xff] %v217_v24  ;;  %v188_v31 = vadd.f32 %v267_v16, %v187_v29  ;;  %v220_v32 = vadd.f32 %v267_v16, %v219_v30 }
  0xfa   :  { %250 = vst [vmem:[%s486_s3 + $0x18] sm:$0xff] %v196_v27  ;;  %258 = vst [vmem:[%s486_s3 + $0x58] sm:$0xff] %v228_v28 }
  0xfb   :  { %248 = vst [vmem:[%s486_s3 + $0x8] sm:$0xff] %v188_v31  ;;  %256 = vst [vmem:[%s486_s3 + $0x48] sm:$0xff] %v220_v32 }
  0xfd   :  { %v322_v33 = vpop.f32.mrb[4].mxu0  ;;  %v330_v34 = vpop.f32.mrb[4].mxu1 }
  0xfe   :  { %v209_v35 = vadd.f32 %v322_v33, %v267_v16  ;;  %v241_v36 = vadd.f32 %v330_v34, %v267_v16  ;;  %v200_v37 = vpop.f32.mrb[5].mxu0  ;;  %v232_v38 = vpop.f32.mrb[5].mxu1 }
  0xff   :  { %v201_v39 = vadd.f32 %v267_v16, %v200_v37  ;;  %v233_v40 = vadd.f32 %v267_v16, %v232_v38  ;;  %v323_v41 = vpop.f32.mrb[6].mxu0  ;;  %v331_v42 = vpop.f32.mrb[6].mxu1 }
 0x100   :  { %253 = vst [vmem:[%s486_s3 + $0x30] sm:$0xff] %v209_v35  ;;  %261 = vst [vmem:[%s486_s3 + $0x70] sm:$0xff] %v241_v36  ;;  %v212_v43 = vadd.f32 %v323_v41, %v267_v16  ;;  %v244_v44 = vadd.f32 %v331_v42, %v267_v16  ;;  %v203_v45 = vpop.f32.mrb[7].mxu0  ;;  %v235_v46 = vpop.f32.mrb[7].mxu1 }
 0x101   :  { %251 = vst [vmem:[%s486_s3 + $0x20] sm:$0xff] %v201_v39  ;;  %259 = vst [vmem:[%s486_s3 + $0x60] sm:$0xff] %v233_v40  ;;  %v204_v47 = vadd.f32 %v267_v16, %v203_v45  ;;  %v236_v48 = vadd.f32 %v267_v16, %v235_v46 }
 0x102   :  { %254 = vst [vmem:[%s486_s3 + $0x38] sm:$0xff] %v212_v43  ;;  %262 = vst [vmem:[%s486_s3 + $0x78] sm:$0xff] %v244_v44 }
 0x103   :  { %252 = vst [vmem:[%s486_s3 + $0x28] sm:$0xff] %v204_v47  ;;  %260 = vst [vmem:[%s486_s3 + $0x68] sm:$0xff] %v236_v48 }

// kernel: rnn_model_forward.7
= control target key start
LH: loop header
LB: loop body
LE: loop exit
PB: predicated region body
PF: predicated region fallthrough
CT: control target
= control target key end

     0   :  { %v847_v1 = vmov 0   ;;  %v65_v33 = vlaneseq  ;;  %s1125_s1 = inlined_call_operand.vmem [shape: bf16[128,384], index: 1, kind: input, shape index: {}]   ;;  %s1126_s0 = inlined_call_operand.vmem [shape: bf16[128,128], index: 0, kind: input, shape index: {}]   ;;  %s1127_s2 = inlined_call_operand.vmem [shape: f32[1,384], index: 2, kind: input, shape index: {}]   ;;  %s1128_s3 = inlined_call_operand.vmem [shape: bf16[128,384], index: 3, kind: output, shape index: {}]  }
   0x1   :  { %v807_v0 = vld [vmem:[%s1125_s1 + $0x4] ss:$12 sps:$4 sm:$0xff]   ;;  %288 = vmatprep.mubr.bf16.mxu0 %v847_v1  ;;  %v809_v2 = vld [vmem:[%s1125_s1] ss:$12 sps:$4 sm:$0xff]   ;;  %v810_v3 = vld [vmem:[%s1125_s1 + $0x1c] ss:$12 sps:$4 sm:$0xff]  }
   0x2   :  { %256 = vmatprep.subr.bf16.mxu0 %v807_v0  ;;  %v812_v4 = vld [vmem:[%s1125_s1 + $0x18] ss:$12 sps:$4 sm:$0xff]   ;;  %v813_v5 = vld [vmem:[%s1125_s1 + $0x34] ss:$12 sps:$4 sm:$0xff]   ;;  %v815_v6 = vld [vmem:[%s1125_s1 + $0x30] ss:$12 sps:$4 sm:$0xff]  }
   0x3   :  { %257 = vmatpush1.bf16.msra.mxu0 %v809_v2  ;;  %v816_v7 = vld [vmem:[%s1125_s1 + $0x4c] ss:$12 sps:$4 sm:$0xff]   ;;  %v818_v8 = vld [vmem:[%s1125_s1 + $0x48] ss:$12 sps:$4 sm:$0xff]   ;;  %v819_v9 = vld [vmem:[%s1125_s1 + $0x64] ss:$12 sps:$4 sm:$0xff]  }
   0x4   :  { %258 = vmatprep.subr.bf16.mxu0 %v810_v3  ;;  %v831_v10 = vld [vmem:[%s1125_s1 + $0x8] ss:$12 sps:$4 sm:$0xff]   ;;  %v832_v11 = vld [vmem:[%s1126_s0] sm:$0xff]   ;;  %v836_v17 = vld [vmem:[%s1125_s1 + $0x50] ss:$12 sps:$4 sm:$0xff]   ;;  %v66_v34 = vshrl.u32 %v65_v33, 7 }
   0x5   :  { %774 = vmatprep.subr.bf16.mxu1 %v831_v10  ;;  %v833_v12 = vld [vmem:[%s1125_s1 + $0x20] ss:$12 sps:$4 sm:$0xff]   ;;  %790 = vmatprep.mubr.bf16.mxu1 %v832_v11  ;;  %v834_v14 = vld [vmem:[%s1125_s1 + $0x38] ss:$12 sps:$4 sm:$0xff]   ;;  %v822_v15 = vld [vmem:[%s1125_s1 + $0x7c] ss:$12 sps:$4 sm:$0xff]  }
   0x6   :  { %v821_v13 = vld [vmem:[%s1125_s1 + $0x60] ss:$12 sps:$4 sm:$0xff]   ;;  %775 = vmatpush3.bf16.msra.mxu1 %v831_v10  ;;  %v824_v16 = vld [vmem:[%s1125_s1 + $0x78] ss:$12 sps:$4 sm:$0xff]   ;;  %v827_v19 = vld [vmem:[%s1125_s1 + $0x90] ss:$12 sps:$4 sm:$0xff]  }
   0x7   :  { %259 = vmatpush1.bf16.msra.mxu0 %v812_v4  ;;  %776 = vmatprep.subr.bf16.mxu1 %v833_v12  ;;  %v825_v18 = vld [vmem:[%s1125_s1 + $0x94] ss:$12 sps:$4 sm:$0xff]   ;;  %v828_v21 = vld [vmem:[%s1125_s1 + $0xac] ss:$12 sps:$4 sm:$0xff]   ;;  %v842_v25 = vld [vmem:[%s1125_s1 + $0xb0] ss:$12 sps:$4 sm:$0xff]  }
   0x8   :  { %260 = vmatprep.subr.bf16.mxu0 %v813_v5  ;;  %v837_v20 = vld [vmem:[%s1125_s1 + $0x68] ss:$12 sps:$4 sm:$0xff]   ;;  %v839_v23 = vld [vmem:[%s1125_s1 + $0x80] ss:$12 sps:$4 sm:$0xff]   ;;  %v840_v24 = vld [vmem:[%s1125_s1 + $0x98] ss:$12 sps:$4 sm:$0xff]  }
   0x9   :  { %v830_v22 = vld [vmem:[%s1125_s1 + $0xa8] ss:$12 sps:$4 sm:$0xff]   ;;  %v841_v28 = vld [vmem:[%s1126_s0 + $0x18] sm:$0xff]   ;;  %v843_v29 = vld [vmem:[%s1126_s0 + $0x20] sm:$0xff]   ;;  %v67_v35 = vsub.s32 0, %v66_v34  ;;  %v71_v37 = vsub.s32 1, %v66_v34 }
   0xa   :  { %777 = vmatpush3.bf16.msra.mxu1 %v833_v12  ;;  %v835_v26 = vld [vmem:[%s1126_s0 + $0x8] sm:$0xff]   ;;  %v838_v27 = vld [vmem:[%s1126_s0 + $0x10] sm:$0xff]   ;;  %v846_v32 = vld [vmem:[%s1126_s0 + $0x38] sm:$0xff]   ;;  %v75_v49 = vsub.s32 2, %v66_v34 }
   0xb   :  { %261 = vmatpush1.bf16.msra.mxu0 %v815_v6  ;;  %778 = vmatprep.subr.bf16.mxu1 %v834_v14  ;;  %v844_v30 = vld [vmem:[%s1126_s0 + $0x28] sm:$0xff]   ;;  %v845_v31 = vld [vmem:[%s1126_s0 + $0x30] sm:$0xff]   ;;  %v63_v36 = vld [vmem:[%s1127_s2] sm:$0x7] }
   0xc   :  { %262 = vmatprep.subr.bf16.mxu0 %v816_v7  ;;  %v975_v38 = vrot.slane %v63_v36, %v67_v35  ;;  %v977_v39 = vrot.slane %v63_v36, %v71_v37  ;;  %v989_v52 = vrot.slane %v63_v36, %v75_v49 }
   0xe   :  { %779 = vmatpush3.bf16.msra.mxu1 %v834_v14 }
   0xf   :  { %263 = vmatpush1.bf16.msra.mxu0 %v818_v8  ;;  %780 = vmatprep.subr.bf16.mxu1 %v836_v17 }
  0x10   :  { %264 = vmatprep.subr.bf16.mxu0 %v819_v9 }
  0x12   :  { %781 = vmatpush3.bf16.msra.mxu1 %v836_v17 }
  0x13   :  { %265 = vmatpush1.bf16.msra.mxu0 %v821_v13  ;;  %782 = vmatprep.subr.bf16.mxu1 %v837_v20 }
  0x14   :  { %266 = vmatprep.subr.bf16.mxu0 %v822_v15 }
  0x16   :  { %783 = vmatpush3.bf16.msra.mxu1 %v837_v20 }
  0x17   :  { %267 = vmatpush1.bf16.msra.mxu0 %v824_v16  ;;  %784 = vmatprep.subr.bf16.mxu1 %v839_v23 }
  0x18   :  { %268 = vmatprep.subr.bf16.mxu0 %v825_v18 }
  0x1a   :  { %785 = vmatpush3.bf16.msra.mxu1 %v839_v23 }
  0x1b   :  { %269 = vmatpush1.bf16.msra.mxu0 %v827_v19  ;;  %786 = vmatprep.subr.bf16.mxu1 %v840_v24 }
  0x1c   :  { %270 = vmatprep.subr.bf16.mxu0 %v828_v21 }
  0x1e   :  { %787 = vmatpush3.bf16.msra.mxu1 %v840_v24 }
  0x1f   :  { %271 = vmatpush1.bf16.msra.mxu0 %v830_v22  ;;  %788 = vmatprep.subr.bf16.mxu1 %v842_v25 }
  0x22   :  { %289 = vmatmul.mubr.bf16.vlgmr.msra.gmra.mrb[0].mxu0 %v832_v11  ;;  %789 = vmatpush3.bf16.msra.mxu1 %v842_v25 }
  0x23   :  { %298 = vmatprep.mubr.bf16.mxu0 %v847_v1 }
  0x25   :  { %791 = vmatmul.mubr.bf16.vlgmr.msra.gmra.mrb[0].mxu1 %v835_v26 }
  0x26   :  { %794 = vmatprep.mubr.bf16.mxu1 %v838_v27 }
  0x2a   :  { %299 = vmatmul.mubr.bf16.gmra.mrb[4].mxu0 %v835_v26 }
  0x2b   :  { %308 = vmatprep.mubr.bf16.mxu0 %v847_v1 }
  0x2d   :  { %795 = vmatmul.mubr.bf16.gmra.mrb[4].mxu1 %v841_v28 }
  0x2e   :  { %798 = vmatprep.mubr.bf16.mxu1 %v843_v29 }
  0x32   :  { %309 = vmatmul.mubr.bf16.gmra.mrb[8].mxu0 %v838_v27 }
  0x33   :  { %318 = vmatprep.mubr.bf16.mxu0 %v847_v1 }
  0x35   :  { %799 = vmatmul.mubr.bf16.gmra.mrb[8].mxu1 %v844_v30 }
  0x36   :  { %802 = vmatprep.mubr.bf16.mxu1 %v845_v31 }
  0x3a   :  { %319 = vmatmul.mubr.bf16.gmra.mrb[12].mxu0 %v841_v28 }
  0x3b   :  { %328 = vmatprep.mubr.bf16.mxu0 %v847_v1 }
  0x3d   :  { %803 = vmatmul.mubr.bf16.gmra.mrb[12].mxu1 %v846_v32 }
  0x42   :  { %329 = vmatmul.mubr.bf16.gmra.mrb[16].mxu0 %v843_v29 }
  0x43   :  { %338 = vmatprep.mubr.bf16.mxu0 %v847_v1 }
  0x4a   :  { %339 = vmatmul.mubr.bf16.gmra.mrb[20].mxu0 %v844_v30 }
  0x4b   :  { %348 = vmatprep.mubr.bf16.mxu0 %v847_v1 }
  0x52   :  { %349 = vmatmul.mubr.bf16.gmra.mrb[24].mxu0 %v845_v31 }
  0x53   :  { %358 = vmatprep.mubr.bf16.mxu0 %v847_v1 }
  0x5a   :  { %359 = vmatmul.mubr.bf16.gmra.mrb[28].mxu0 %v846_v32 }
  0xf5   :  { %v290_v40 = vpop.f32.mrb[0].mxu0 }
  0xf6   :  { %v291_v41 = vadd.f32 %v290_v40, %v975_v38  ;;  %v292_v42 = vpop.f32.mrb[1].mxu0 }
  0xf7   :  { %v293_v43 = vadd.f32 %v292_v42, %v977_v39  ;;  %v294_v44 = vpop.f32.mrb[2].mxu0 }
  0xf8   :  { %v295_v45 = vadd.f32 %v294_v44, %v975_v38  ;;  %v296_v46 = vpop.f32.mrb[3].mxu0  ;;  %v792_v59 = vpop.f32.mrb[0].mxu1 }
  0xf9   :  { %v726_v47 = vpack.c.bf16 %v293_v43, %v291_v41  ;;  %v297_v48 = vadd.f32 %v296_v46, %v977_v39  ;;  %v412_v62 = vadd.f32 %v792_v59, %v989_v52  ;;  %v403_v63 = vpop.f32.mrb[1].mxu1 }
  0xfa   :  { %v404_v0 = vadd.f32 %v403_v63, %v989_v52  ;;  %v793_v1 = vpop.f32.mrb[2].mxu1 }
  0xfb   :  { %626 = vst [vmem:[%s1128_s3] sm:$0xff] %v726_v47  ;;  %v728_v50 = vpack.c.bf16 %v297_v48, %v295_v45  ;;  %v731_v3 = vpack.c.bf16 %v412_v62, %v412_v62  ;;  %v415_v4 = vadd.f32 %v793_v1, %v989_v52  ;;  %v406_v5 = vpop.f32.mrb[3].mxu1 }
  0xfc   :  { %v727_v6 = vpack.c.bf16 %v404_v0, %v404_v0  ;;  %v407_v7 = vadd.f32 %v406_v5, %v989_v52 }
  0xfd   :  { %628 = vst [vmem:[%s1128_s3 + $0xc] sm:$0xff] %v728_v50  ;;  %v300_v51 = vpop.f32.mrb[4].mxu0  ;;  %631 = vst [vmem:[%s1128_s3 + $0x20] sm:$0xf] %v731_v3  ;;  %v733_v9 = vpack.c.bf16 %v415_v4, %v415_v4 }
  0xfe   :  { %v301_v53 = vadd.f32 %v300_v51, %v975_v38  ;;  %v302_v54 = vpop.f32.mrb[5].mxu0  ;;  %627 = vst [vmem:[%s1128_s3 + $0x8] sm:$0xf] %v727_v6  ;;  %v729_v12 = vpack.c.bf16 %v407_v7, %v407_v7 }
  0xff   :  { %v303_v55 = vadd.f32 %v302_v54, %v977_v39  ;;  %v304_v56 = vpop.f32.mrb[6].mxu0  ;;  %633 = vst [vmem:[%s1128_s3 + $0x2c] sm:$0xf] %v733_v9 }
 0x100   :  { %v305_v57 = vadd.f32 %v304_v56, %v975_v38  ;;  %v306_v58 = vpop.f32.mrb[7].mxu0  ;;  %629 = vst [vmem:[%s1128_s3 + $0x14] sm:$0xf] %v729_v12  ;;  %v796_v17 = vpop.f32.mrb[4].mxu1 }
 0x101   :  { %v730_v60 = vpack.c.bf16 %v303_v55, %v301_v53  ;;  %v307_v61 = vadd.f32 %v306_v58, %v977_v39  ;;  %v428_v20 = vadd.f32 %v796_v17, %v989_v52  ;;  %v419_v21 = vpop.f32.mrb[5].mxu1 }
 0x102   :  { %v420_v22 = vadd.f32 %v419_v21, %v989_v52  ;;  %v797_v23 = vpop.f32.mrb[6].mxu1 }
 0x103   :  { %630 = vst [vmem:[%s1128_s3 + $0x18] sm:$0xff] %v730_v60  ;;  %v732_v2 = vpack.c.bf16 %v307_v61, %v305_v57  ;;  %v739_v25 = vpack.c.bf16 %v428_v20, %v428_v20  ;;  %v431_v26 = vadd.f32 %v797_v23, %v989_v52  ;;  %v422_v27 = vpop.f32.mrb[7].mxu1 }
 0x104   :  { %v735_v28 = vpack.c.bf16 %v420_v22, %v420_v22  ;;  %v423_v29 = vadd.f32 %v422_v27, %v989_v52 }
 0x105   :  { %632 = vst [vmem:[%s1128_s3 + $0x24] sm:$0xff] %v732_v2  ;;  %v310_v8 = vpop.f32.mrb[8].mxu0  ;;  %639 = vst [vmem:[%s1128_s3 + $0x50] sm:$0xf] %v739_v25  ;;  %v741_v31 = vpack.c.bf16 %v431_v26, %v431_v26 }
 0x106   :  { %v311_v10 = vadd.f32 %v310_v8, %v975_v38  ;;  %v312_v11 = vpop.f32.mrb[9].mxu0  ;;  %635 = vst [vmem:[%s1128_s3 + $0x38] sm:$0xf] %v735_v28  ;;  %v737_v34 = vpack.c.bf16 %v423_v29, %v423_v29 }
 0x107   :  { %v313_v13 = vadd.f32 %v312_v11, %v977_v39  ;;  %v314_v14 = vpop.f32.mrb[10].mxu0  ;;  %641 = vst [vmem:[%s1128_s3 + $0x5c] sm:$0xf] %v741_v31 }
 0x108   :  { %v315_v15 = vadd.f32 %v314_v14, %v975_v38  ;;  %v316_v16 = vpop.f32.mrb[11].mxu0  ;;  %637 = vst [vmem:[%s1128_s3 + $0x44] sm:$0xf] %v737_v34  ;;  %v800_v41 = vpop.f32.mrb[8].mxu1 }
 0x109   :  { %v734_v18 = vpack.c.bf16 %v313_v13, %v311_v10  ;;  %v317_v19 = vadd.f32 %v316_v16, %v977_v39  ;;  %v444_v44 = vadd.f32 %v800_v41, %v989_v52  ;;  %v435_v45 = vpop.f32.mrb[9].mxu1 }
 0x10a   :  { %v436_v46 = vadd.f32 %v435_v45, %v989_v52  ;;  %v801_v47 = vpop.f32.mrb[10].mxu1 }
 0x10b   :  { %634 = vst [vmem:[%s1128_s3 + $0x30] sm:$0xff] %v734_v18  ;;  %v736_v24 = vpack.c.bf16 %v317_v19, %v315_v15  ;;  %v747_v49 = vpack.c.bf16 %v444_v44, %v444_v44  ;;  %v447_v50 = vadd.f32 %v801_v47, %v989_v52  ;;  %v438_v51 = vpop.f32.mrb[11].mxu1 }
 0x10c   :  { %v743_v53 = vpack.c.bf16 %v436_v46, %v436_v46  ;;  %v439_v54 = vadd.f32 %v438_v51, %v989_v52 }
 0x10d   :  { %636 = vst [vmem:[%s1128_s3 + $0x3c] sm:$0xff] %v736_v24  ;;  %v320_v30 = vpop.f32.mrb[12].mxu0  ;;  %647 = vst [vmem:[%s1128_s3 + $0x80] sm:$0xf] %v747_v49  ;;  %v749_v56 = vpack.c.bf16 %v447_v50, %v447_v50 }
 0x10e   :  { %v321_v32 = vadd.f32 %v320_v30, %v975_v38  ;;  %v322_v33 = vpop.f32.mrb[13].mxu0  ;;  %643 = vst [vmem:[%s1128_s3 + $0x68] sm:$0xf] %v743_v53  ;;  %v745_v59 = vpack.c.bf16 %v439_v54, %v439_v54 }
 0x10f   :  { %v323_v35 = vadd.f32 %v322_v33, %v977_v39  ;;  %v324_v36 = vpop.f32.mrb[14].mxu0  ;;  %649 = vst [vmem:[%s1128_s3 + $0x8c] sm:$0xf] %v749_v56 }
 0x110   :  { %v325_v37 = vadd.f32 %v324_v36, %v975_v38  ;;  %v326_v40 = vpop.f32.mrb[15].mxu0  ;;  %645 = vst [vmem:[%s1128_s3 + $0x74] sm:$0xf] %v745_v59  ;;  %v804_v0 = vpop.f32.mrb[12].mxu1 }
 0x111   :  { %v738_v42 = vpack.c.bf16 %v323_v35, %v321_v32  ;;  %v327_v43 = vadd.f32 %v326_v40, %v977_v39  ;;  %v460_v3 = vadd.f32 %v804_v0, %v989_v52  ;;  %v451_v4 = vpop.f32.mrb[13].mxu1 }
 0x112   :  { %v452_v5 = vadd.f32 %v451_v4, %v989_v52  ;;  %v805_v6 = vpop.f32.mrb[14].mxu1 }
 0x113   :  { %638 = vst [vmem:[%s1128_s3 + $0x48] sm:$0xff] %v738_v42  ;;  %v740_v48 = vpack.c.bf16 %v327_v43, %v325_v37  ;;  %v755_v8 = vpack.c.bf16 %v460_v3, %v460_v3  ;;  %v463_v9 = vadd.f32 %v805_v6, %v989_v52  ;;  %v454_v10 = vpop.f32.mrb[15].mxu1 }
 0x114   :  { %v751_v11 = vpack.c.bf16 %v452_v5, %v452_v5  ;;  %v455_v12 = vadd.f32 %v454_v10, %v989_v52 }
 0x115   :  { %640 = vst [vmem:[%s1128_s3 + $0x54] sm:$0xff] %v740_v48  ;;  %v330_v55 = vpop.f32.mrb[16].mxu0  ;;  %655 = vst [vmem:[%s1128_s3 + $0xb0] sm:$0xf] %v755_v8  ;;  %v757_v14 = vpack.c.bf16 %v463_v9, %v463_v9 }
 0x116   :  { %v331_v57 = vadd.f32 %v330_v55, %v975_v38  ;;  %v332_v58 = vpop.f32.mrb[17].mxu0  ;;  %651 = vst [vmem:[%s1128_s3 + $0x98] sm:$0xf] %v751_v11  ;;  %v753_v17 = vpack.c.bf16 %v455_v12, %v455_v12 }
 0x117   :  { %v333_v60 = vadd.f32 %v332_v58, %v977_v39  ;;  %v334_v61 = vpop.f32.mrb[18].mxu0  ;;  %657 = vst [vmem:[%s1128_s3 + $0xbc] sm:$0xf] %v757_v14 }
 0x118   :  { %v335_v62 = vadd.f32 %v334_v61, %v975_v38  ;;  %v336_v63 = vpop.f32.mrb[19].mxu0  ;;  %653 = vst [vmem:[%s1128_s3 + $0xa4] sm:$0xf] %v753_v17 }
 0x119   :  { %v742_v1 = vpack.c.bf16 %v333_v60, %v331_v57  ;;  %v337_v2 = vadd.f32 %v336_v63, %v977_v39 }
 0x11b   :  { %642 = vst [vmem:[%s1128_s3 + $0x60] sm:$0xff] %v742_v1  ;;  %v744_v7 = vpack.c.bf16 %v337_v2, %v335_v62 }
 0x11d   :  { %644 = vst [vmem:[%s1128_s3 + $0x6c] sm:$0xff] %v744_v7  ;;  %v340_v13 = vpop.f32.mrb[20].mxu0 }
 0x11e   :  { %v341_v15 = vadd.f32 %v340_v13, %v975_v38  ;;  %v342_v16 = vpop.f32.mrb[21].mxu0 }
 0x11f   :  { %v343_v52 = vadd.f32 %v342_v16, %v977_v39  ;;  %v344_v18 = vpop.f32.mrb[22].mxu0 }
 0x120   :  { %v345_v19 = vadd.f32 %v344_v18, %v975_v38  ;;  %v346_v20 = vpop.f32.mrb[23].mxu0 }
 0x121   :  { %v746_v21 = vpack.c.bf16 %v343_v52, %v341_v15  ;;  %v347_v22 = vadd.f32 %v346_v20, %v977_v39 }
 0x123   :  { %646 = vst [vmem:[%s1128_s3 + $0x78] sm:$0xff] %v746_v21  ;;  %v748_v23 = vpack.c.bf16 %v347_v22, %v345_v19 }
 0x125   :  { %648 = vst [vmem:[%s1128_s3 + $0x84] sm:$0xff] %v748_v23  ;;  %v350_v24 = vpop.f32.mrb[24].mxu0 }
 0x126   :  { %v351_v25 = vadd.f32 %v350_v24, %v975_v38  ;;  %v352_v26 = vpop.f32.mrb[25].mxu0 }
 0x127   :  { %v353_v27 = vadd.f32 %v352_v26, %v977_v39  ;;  %v354_v28 = vpop.f32.mrb[26].mxu0 }
 0x128   :  { %v355_v29 = vadd.f32 %v354_v28, %v975_v38  ;;  %v356_v30 = vpop.f32.mrb[27].mxu0 }
 0x129   :  { %v750_v31 = vpack.c.bf16 %v353_v27, %v351_v25  ;;  %v357_v32 = vadd.f32 %v356_v30, %v977_v39 }
 0x12b   :  { %650 = vst [vmem:[%s1128_s3 + $0x90] sm:$0xff] %v750_v31  ;;  %v752_v33 = vpack.c.bf16 %v357_v32, %v355_v29 }
 0x12d   :  { %652 = vst [vmem:[%s1128_s3 + $0x9c] sm:$0xff] %v752_v33  ;;  %v360_v34 = vpop.f32.mrb[28].mxu0 }
 0x12e   :  { %v361_v35 = vadd.f32 %v360_v34, %v975_v38  ;;  %v362_v36 = vpop.f32.mrb[29].mxu0 }
 0x12f   :  { %v363_v37 = vadd.f32 %v362_v36, %v977_v39  ;;  %v364_v40 = vpop.f32.mrb[30].mxu0 }
 0x130   :  { %v365_v41 = vadd.f32 %v364_v40, %v975_v38  ;;  %v366_v42 = vpop.f32.mrb[31].mxu0 }
 0x131   :  { %v754_v43 = vpack.c.bf16 %v363_v37, %v361_v35  ;;  %v367_v44 = vadd.f32 %v366_v42, %v977_v39 }
 0x133   :  { %654 = vst [vmem:[%s1128_s3 + $0xa8] sm:$0xff] %v754_v43  ;;  %v756_v45 = vpack.c.bf16 %v367_v44, %v365_v41 }
 0x135   :  { %656 = vst [vmem:[%s1128_s3 + $0xb4] sm:$0xff] %v756_v45 }

// kernel: rnn_model_forward.5
= control target key start
LH: loop header
LB: loop body
LE: loop exit
PB: predicated region body
PF: predicated region fallthrough
CT: control target
= control target key end

     0   :  { %v672_v1 = vmov 0   ;;  %vm108_vm0 = vcmask 130048   ;;  %v37_v12 = vlaneseq  ;;  %s895_s1 = inlined_call_operand.vmem [shape: bf16[16,384], index: 1, kind: input, shape index: {}]   ;;  %s896_s0 = inlined_call_operand.vmem [shape: bf16[128,16], index: 0, kind: input, shape index: {}]   ;;  %s897_s2 = inlined_call_operand.vmem [shape: f32[1,384], index: 2, kind: input, shape index: {}]   ;;  %s898_s3 = inlined_call_operand.vmem [shape: bf16[128,384], index: 3, kind: output, shape index: {}]  }
   0x1   :  { %v660_v0 = vld [vmem:[%s895_s1 + $0x4] ss:$12 sps:$4 sm:$0xff]   ;;  %165 = vmatprep.mubr.bf16.mxu0 %v672_v1  ;;  %225 = vmatprep.mubr.bf16.mxu1 %v672_v1  ;;  %v662_v2 = vld [vmem:[%s895_s1] ss:$12 sps:$4 sm:$0xff]   ;;  %v665_v5 = vld [vmem:[%s895_s1 + $0x8] ss:$12 sps:$4 sm:$0xff]  }
   0x2   :  { %133 = vmatprep.subr.bf16.mxu0 %v660_v0  ;;  %657 = vmatprep.subr.bf16.mxu1 %v660_v0  ;;  %v663_v3 = vld [vmem:[%s896_s0] sm:$0xff]   ;;  %v664_v4 = vld [vmem:[%s896_s0 + $0x30] sm:$0xff]   ;;  %v666_v6 = vld [vmem:[%s896_s0 + $0x8] sm:$0xff]   ;;  %v38_v13 = vshrl.u32 %v37_v12, 7 }
   0x3   :  { %134 = vmatpush1.bf16.msra.mxu0 %v662_v2  ;;  %658 = vmatpush1.bf16.msra.mxu1 %v662_v2  ;;  %v667_v7 = vld [vmem:[%s896_s0 + $0x38] sm:$0xff]   ;;  %v668_v8 = vld [vmem:[%s896_s0 + $0x10] sm:$0xff]   ;;  %v670_v10 = vld [vmem:[%s896_s0 + $0x20] sm:$0xff]  }
   0x4   :  { %639 = vmatprep.subr.bf16.mxu1 %v665_v5  ;;  %v669_v9 = vld [vmem:[%s896_s0 + $0x18] sm:$0xff]   ;;  %v671_v11 = vld [vmem:[%s896_s0 + $0x28] sm:$0xff]   ;;  %v39_v14 = vsub.s32 0, %v38_v13  ;;  %v35_v15 = vld [vmem:[%s897_s2] sm:$0x7]  ;;  %v43_v16 = vsub.s32 1, %v38_v13 }
   0x5   :  { %v47_v45 = vsub.s32 2, %v38_v13 }
   0x6   :  { %550 = vmatmul.mubr.msk.bf16.vlgmr.msra.gmra.mrb[0].mxu0 %vm108_vm0, %v663_v3  ;;  %556 = vmatmul.mubr.msk.bf16.vlgmr.msra.gmra.mrb[0].mxu1 %vm108_vm0, %v664_v4  ;;  %v745_v17 = vrot.slane %v35_v15, %v39_v14  ;;  %v747_v18 = vrot.slane %v35_v15, %v43_v16 }
   0x7   :  { %175 = vmatprep.mubr.bf16.mxu0 %v672_v1  ;;  %640 = vmatpush3.bf16.msra.mxu1 %v665_v5  ;;  %v777_v58 = vrot.slane %v35_v15, %v47_v45 }
   0x8   :  { %235 = vmatprep.mubr.bf16.mxu1 %v672_v1 }
   0xe   :  { %551 = vmatmul.mubr.msk.bf16.gmra.mrb[4].mxu0 %vm108_vm0, %v666_v6  ;;  %557 = vmatmul.mubr.msk.bf16.gmra.mrb[4].mxu1 %vm108_vm0, %v667_v7 }
   0xf   :  { %185 = vmatprep.mubr.bf16.mxu0 %v672_v1  ;;  %641 = vmatprep.mubr.msk.bf16.mxu1 %vm108_vm0, %v663_v3 }
  0x16   :  { %552 = vmatmul.mubr.msk.bf16.gmra.mrb[8].mxu0 %vm108_vm0, %v668_v8  ;;  %642 = vmatmul.mubr.msk.bf16.vlgmr.msra.gmra.mrb[8].mxu1 %vm108_vm0, %v666_v6 }
  0x17   :  { %195 = vmatprep.mubr.bf16.mxu0 %v672_v1  ;;  %645 = vmatprep.mubr.msk.bf16.mxu1 %vm108_vm0, %v668_v8 }
  0x1e   :  { %553 = vmatmul.mubr.msk.bf16.gmra.mrb[12].mxu0 %vm108_vm0, %v669_v9  ;;  %646 = vmatmul.mubr.msk.bf16.gmra.mrb[12].mxu1 %vm108_vm0, %v669_v9 }
  0x1f   :  { %205 = vmatprep.mubr.bf16.mxu0 %v672_v1  ;;  %649 = vmatprep.mubr.msk.bf16.mxu1 %vm108_vm0, %v670_v10 }
  0x26   :  { %554 = vmatmul.mubr.msk.bf16.gmra.mrb[16].mxu0 %vm108_vm0, %v670_v10  ;;  %650 = vmatmul.mubr.msk.bf16.gmra.mrb[16].mxu1 %vm108_vm0, %v671_v11 }
  0x27   :  { %215 = vmatprep.mubr.bf16.mxu0 %v672_v1  ;;  %653 = vmatprep.mubr.msk.bf16.mxu1 %vm108_vm0, %v664_v4 }
  0x2e   :  { %555 = vmatmul.mubr.msk.bf16.gmra.mrb[20].mxu0 %vm108_vm0, %v671_v11  ;;  %654 = vmatmul.mubr.msk.bf16.gmra.mrb[20].mxu1 %vm108_vm0, %v667_v7 }
  0xd9   :  { %v167_v19 = vpop.f32.mrb[0].mxu0  ;;  %v227_v20 = vpop.f32.mrb[0].mxu1 }
  0xda   :  { %v168_v21 = vadd.f32 %v167_v19, %v745_v17  ;;  %v228_v22 = vadd.f32 %v227_v20, %v745_v17  ;;  %v169_v23 = vpop.f32.mrb[1].mxu0  ;;  %v229_v24 = vpop.f32.mrb[1].mxu1 }
  0xdb   :  { %v170_v25 = vadd.f32 %v169_v23, %v747_v18  ;;  %v230_v26 = vadd.f32 %v229_v24, %v747_v18  ;;  %v171_v27 = vpop.f32.mrb[2].mxu0  ;;  %v231_v28 = vpop.f32.mrb[2].mxu1 }
  0xdc   :  { %v172_v29 = vadd.f32 %v171_v27, %v745_v17  ;;  %v232_v30 = vadd.f32 %v231_v28, %v745_v17  ;;  %v173_v31 = vpop.f32.mrb[3].mxu0  ;;  %v233_v32 = vpop.f32.mrb[3].mxu1 }
  0xdd   :  { %v598_v33 = vpack.c.bf16 %v170_v25, %v168_v21  ;;  %v622_v34 = vpack.c.bf16 %v230_v26, %v228_v22  ;;  %v174_v35 = vadd.f32 %v173_v31, %v747_v18  ;;  %v234_v36 = vadd.f32 %v233_v32, %v747_v18 }
  0xdf   :  { %503 = vst [vmem:[%s898_s3] sm:$0xff] %v598_v33  ;;  %527 = vst [vmem:[%s898_s3 + $0x90] sm:$0xff] %v622_v34  ;;  %v600_v37 = vpack.c.bf16 %v174_v35, %v172_v29  ;;  %v624_v38 = vpack.c.bf16 %v234_v36, %v232_v30 }
  0xe1   :  { %505 = vst [vmem:[%s898_s3 + $0xc] sm:$0xff] %v600_v37  ;;  %529 = vst [vmem:[%s898_s3 + $0x9c] sm:$0xff] %v624_v38  ;;  %v177_v39 = vpop.f32.mrb[4].mxu0  ;;  %v237_v40 = vpop.f32.mrb[4].mxu1 }
  0xe2   :  { %v178_v41 = vadd.f32 %v177_v39, %v745_v17  ;;  %v238_v42 = vadd.f32 %v237_v40, %v745_v17  ;;  %v179_v43 = vpop.f32.mrb[5].mxu0  ;;  %v239_v44 = vpop.f32.mrb[5].mxu1 }
  0xe3   :  { %v180_v46 = vadd.f32 %v179_v43, %v747_v18  ;;  %v240_v47 = vadd.f32 %v239_v44, %v747_v18  ;;  %v181_v48 = vpop.f32.mrb[6].mxu0  ;;  %v241_v49 = vpop.f32.mrb[6].mxu1 }
  0xe4   :  { %v182_v50 = vadd.f32 %v181_v48, %v745_v17  ;;  %v242_v51 = vadd.f32 %v241_v49, %v745_v17  ;;  %v183_v52 = vpop.f32.mrb[7].mxu0  ;;  %v243_v53 = vpop.f32.mrb[7].mxu1 }
  0xe5   :  { %v602_v54 = vpack.c.bf16 %v180_v46, %v178_v41  ;;  %v626_v55 = vpack.c.bf16 %v240_v47, %v238_v42  ;;  %v184_v56 = vadd.f32 %v183_v52, %v747_v18  ;;  %v244_v57 = vadd.f32 %v243_v53, %v747_v18 }
  0xe7   :  { %507 = vst [vmem:[%s898_s3 + $0x18] sm:$0xff] %v602_v54  ;;  %531 = vst [vmem:[%s898_s3 + $0xa8] sm:$0xff] %v626_v55  ;;  %v604_v59 = vpack.c.bf16 %v184_v56, %v182_v50  ;;  %v628_v60 = vpack.c.bf16 %v244_v57, %v242_v51 }
  0xe9   :  { %509 = vst [vmem:[%s898_s3 + $0x24] sm:$0xff] %v604_v59  ;;  %533 = vst [vmem:[%s898_s3 + $0xb4] sm:$0xff] %v628_v60  ;;  %v187_v61 = vpop.f32.mrb[8].mxu0  ;;  %v643_v62 = vpop.f32.mrb[8].mxu1 }
  0xea   :  { %v188_v63 = vadd.f32 %v187_v61, %v745_v17  ;;  %v289_v0 = vadd.f32 %v643_v62, %v777_v58  ;;  %v189_v1 = vpop.f32.mrb[9].mxu0  ;;  %v280_v2 = vpop.f32.mrb[9].mxu1 }
  0xeb   :  { %v190_v3 = vadd.f32 %v189_v1, %v747_v18  ;;  %v281_v4 = vadd.f32 %v280_v2, %v777_v58  ;;  %v191_v5 = vpop.f32.mrb[10].mxu0  ;;  %v644_v6 = vpop.f32.mrb[10].mxu1 }
  0xec   :  { %v603_v7 = vpack.c.bf16 %v289_v0, %v289_v0  ;;  %v192_v8 = vadd.f32 %v191_v5, %v745_v17  ;;  %v292_v9 = vadd.f32 %v644_v6, %v777_v58  ;;  %v193_v10 = vpop.f32.mrb[11].mxu0  ;;  %v283_v11 = vpop.f32.mrb[11].mxu1 }
  0xed   :  { %v606_v12 = vpack.c.bf16 %v190_v3, %v188_v63  ;;  %v599_v13 = vpack.c.bf16 %v281_v4, %v281_v4  ;;  %v194_v14 = vadd.f32 %v193_v10, %v747_v18  ;;  %v284_v15 = vadd.f32 %v283_v11, %v777_v58 }
  0xee   :  { %508 = vst [vmem:[%s898_s3 + $0x20] sm:$0xf] %v603_v7  ;;  %v605_v16 = vpack.c.bf16 %v292_v9, %v292_v9 }
  0xef   :  { %511 = vst [vmem:[%s898_s3 + $0x30] sm:$0xff] %v606_v12  ;;  %504 = vst [vmem:[%s898_s3 + $0x8] sm:$0xf] %v599_v13  ;;  %v608_v19 = vpack.c.bf16 %v194_v14, %v192_v8  ;;  %v601_v20 = vpack.c.bf16 %v284_v15, %v284_v15 }
  0xf0   :  { %510 = vst [vmem:[%s898_s3 + $0x2c] sm:$0xf] %v605_v16 }
  0xf1   :  { %513 = vst [vmem:[%s898_s3 + $0x3c] sm:$0xff] %v608_v19  ;;  %506 = vst [vmem:[%s898_s3 + $0x14] sm:$0xf] %v601_v20  ;;  %v197_v21 = vpop.f32.mrb[12].mxu0  ;;  %v647_v22 = vpop.f32.mrb[12].mxu1 }
  0xf2   :  { %v198_v23 = vadd.f32 %v197_v21, %v745_v17  ;;  %v305_v24 = vadd.f32 %v647_v22, %v777_v58  ;;  %v199_v25 = vpop.f32.mrb[13].mxu0  ;;  %v296_v26 = vpop.f32.mrb[13].mxu1 }
  0xf3   :  { %v200_v27 = vadd.f32 %v199_v25, %v747_v18  ;;  %v297_v28 = vadd.f32 %v296_v26, %v777_v58  ;;  %v201_v29 = vpop.f32.mrb[14].mxu0  ;;  %v648_v30 = vpop.f32.mrb[14].mxu1 }
  0xf4   :  { %v611_v31 = vpack.c.bf16 %v305_v24, %v305_v24  ;;  %v202_v32 = vadd.f32 %v201_v29, %v745_v17  ;;  %v308_v33 = vadd.f32 %v648_v30, %v777_v58  ;;  %v203_v34 = vpop.f32.mrb[15].mxu0  ;;  %v299_v35 = vpop.f32.mrb[15].mxu1 }
  0xf5   :  { %v610_v36 = vpack.c.bf16 %v200_v27, %v198_v23  ;;  %v607_v37 = vpack.c.bf16 %v297_v28, %v297_v28  ;;  %v204_v38 = vadd.f32 %v203_v34, %v747_v18  ;;  %v300_v39 = vadd.f32 %v299_v35, %v777_v58 }
  0xf6   :  { %516 = vst [vmem:[%s898_s3 + $0x50] sm:$0xf] %v611_v31  ;;  %v613_v40 = vpack.c.bf16 %v308_v33, %v308_v33 }
  0xf7   :  { %515 = vst [vmem:[%s898_s3 + $0x48] sm:$0xff] %v610_v36  ;;  %512 = vst [vmem:[%s898_s3 + $0x38] sm:$0xf] %v607_v37  ;;  %v612_v41 = vpack.c.bf16 %v204_v38, %v202_v32  ;;  %v609_v42 = vpack.c.bf16 %v300_v39, %v300_v39 }
  0xf8   :  { %518 = vst [vmem:[%s898_s3 + $0x5c] sm:$0xf] %v613_v40 }
  0xf9   :  { %517 = vst [vmem:[%s898_s3 + $0x54] sm:$0xff] %v612_v41  ;;  %514 = vst [vmem:[%s898_s3 + $0x44] sm:$0xf] %v609_v42  ;;  %v207_v43 = vpop.f32.mrb[16].mxu0  ;;  %v651_v44 = vpop.f32.mrb[16].mxu1 }
  0xfa   :  { %v208_v45 = vadd.f32 %v207_v43, %v745_v17  ;;  %v321_v46 = vadd.f32 %v651_v44, %v777_v58  ;;  %v209_v47 = vpop.f32.mrb[17].mxu0  ;;  %v312_v48 = vpop.f32.mrb[17].mxu1 }
  0xfb   :  { %v210_v49 = vadd.f32 %v209_v47, %v747_v18  ;;  %v313_v50 = vadd.f32 %v312_v48, %v777_v58  ;;  %v211_v51 = vpop.f32.mrb[18].mxu0  ;;  %v652_v52 = vpop.f32.mrb[18].mxu1 }
  0xfc   :  { %v619_v53 = vpack.c.bf16 %v321_v46, %v321_v46  ;;  %v212_v54 = vadd.f32 %v211_v51, %v745_v17  ;;  %v324_v55 = vadd.f32 %v652_v52, %v777_v58  ;;  %v213_v56 = vpop.f32.mrb[19].mxu0  ;;  %v315_v57 = vpop.f32.mrb[19].mxu1 }
  0xfd   :  { %v614_v59 = vpack.c.bf16 %v210_v49, %v208_v45  ;;  %v615_v60 = vpack.c.bf16 %v313_v50, %v313_v50  ;;  %v214_v61 = vadd.f32 %v213_v56, %v747_v18  ;;  %v316_v62 = vadd.f32 %v315_v57, %v777_v58 }
  0xfe   :  { %524 = vst [vmem:[%s898_s3 + $0x80] sm:$0xf] %v619_v53  ;;  %v621_v63 = vpack.c.bf16 %v324_v55, %v324_v55 }
  0xff   :  { %519 = vst [vmem:[%s898_s3 + $0x60] sm:$0xff] %v614_v59  ;;  %520 = vst [vmem:[%s898_s3 + $0x68] sm:$0xf] %v615_v60  ;;  %v616_v0 = vpack.c.bf16 %v214_v61, %v212_v54  ;;  %v617_v1 = vpack.c.bf16 %v316_v62, %v316_v62 }
 0x100   :  { %526 = vst [vmem:[%s898_s3 + $0x8c] sm:$0xf] %v621_v63 }
 0x101   :  { %521 = vst [vmem:[%s898_s3 + $0x6c] sm:$0xff] %v616_v0  ;;  %522 = vst [vmem:[%s898_s3 + $0x74] sm:$0xf] %v617_v1  ;;  %v217_v2 = vpop.f32.mrb[20].mxu0  ;;  %v655_v3 = vpop.f32.mrb[20].mxu1 }
 0x102   :  { %v218_v4 = vadd.f32 %v217_v2, %v745_v17  ;;  %v337_v5 = vadd.f32 %v655_v3, %v777_v58  ;;  %v219_v6 = vpop.f32.mrb[21].mxu0  ;;  %v328_v7 = vpop.f32.mrb[21].mxu1 }
 0x103   :  { %v220_v8 = vadd.f32 %v219_v6, %v747_v18  ;;  %v329_v9 = vadd.f32 %v328_v7, %v777_v58  ;;  %v221_v10 = vpop.f32.mrb[22].mxu0  ;;  %v656_v11 = vpop.f32.mrb[22].mxu1 }
 0x104   :  { %v627_v12 = vpack.c.bf16 %v337_v5, %v337_v5  ;;  %v222_v13 = vadd.f32 %v221_v10, %v745_v17  ;;  %v340_v14 = vadd.f32 %v656_v11, %v777_v58  ;;  %v223_v15 = vpop.f32.mrb[23].mxu0  ;;  %v331_v16 = vpop.f32.mrb[23].mxu1 }
 0x105   :  { %v618_v19 = vpack.c.bf16 %v220_v8, %v218_v4  ;;  %v623_v20 = vpack.c.bf16 %v329_v9, %v329_v9  ;;  %v224_v21 = vadd.f32 %v223_v15, %v747_v18  ;;  %v332_v22 = vadd.f32 %v331_v16, %v777_v58 }
 0x106   :  { %532 = vst [vmem:[%s898_s3 + $0xb0] sm:$0xf] %v627_v12  ;;  %v629_v23 = vpack.c.bf16 %v340_v14, %v340_v14 }
 0x107   :  { %523 = vst [vmem:[%s898_s3 + $0x78] sm:$0xff] %v618_v19  ;;  %528 = vst [vmem:[%s898_s3 + $0x98] sm:$0xf] %v623_v20  ;;  %v620_v17 = vpack.c.bf16 %v224_v21, %v222_v13  ;;  %v625_v24 = vpack.c.bf16 %v332_v22, %v332_v22 }
 0x108   :  { %534 = vst [vmem:[%s898_s3 + $0xbc] sm:$0xf] %v629_v23 }
 0x109   :  { %525 = vst [vmem:[%s898_s3 + $0x84] sm:$0xff] %v620_v17  ;;  %530 = vst [vmem:[%s898_s3 + $0xa4] sm:$0xf] %v625_v24 }

// kernel: rnn_model_forward.6
= control target key start
LH: loop header
LB: loop body
LE: loop exit
PB: predicated region body
PF: predicated region fallthrough
CT: control target
= control target key end

     0   :  { %v1857_v1 = vmov 0.0   ;;  %v1858_v2 = vmov 0   ;;  %vm1859_vm0 = vmmov 0   ;;  %v65_v29 = vlaneseq  ;;  %s2642_s2 = inlined_call_operand.vmem [shape: bf16[128,384], index: 2, kind: input, shape index: {}]   ;;  %s2643_s1 = inlined_call_operand.vmem [shape: f32[16,128], index: 1, kind: input, shape index: {}]   ;;  %s2644_s3 = inlined_call_operand.vmem [shape: f32[1,384], index: 3, kind: input, shape index: {}]   ;;  %s2645_s0 = inlined_call_operand.vmem [shape: bf16[8,16,384], index: 0, kind: input, shape index: {}]   ;;  %s2646_s4 = inlined_call_operand.vmem [shape: bf16[8,16,128], index: 4, kind: output, shape index: {0}]   ;;  %s2647_s5 = inlined_call_operand.vmem [shape: f32[16,128], index: 5, kind: output, shape index: {1}]  }
   0x1   :  { %v1893_v0 = vld [vmem:[%s2642_s2 + $0x4] ss:$12 sps:$4 sm:$0xff]   ;;  %1542 = vmatprep.subr.bf16.mxu1 %v1857_v1  ;;  %240 = vmatprep.mubr.bf16.mxu0 %v1858_v2  ;;  %v1900_v3 = vld [vmem:[%s2642_s2] ss:$12 sps:$4 sm:$0xff]   ;;  %v1908_v4 = vld [vmem:[%s2642_s2 + $0x1c] ss:$12 sps:$4 sm:$0xff]  }
   0x2   :  { %1558 = vmatprep.mubr.msk.bf16.mxu1 %vm1859_vm0, %v1857_v1  ;;  %208 = vmatprep.subr.bf16.mxu0 %v1893_v0  ;;  %v1914_v5 = vld [vmem:[%s2642_s2 + $0x18] ss:$12 sps:$4 sm:$0xff]   ;;  %v1920_v6 = vld [vmem:[%s2642_s2 + $0x34] ss:$12 sps:$4 sm:$0xff]   ;;  %v1925_v7 = vld [vmem:[%s2642_s2 + $0x30] ss:$12 sps:$4 sm:$0xff]  }
   0x3   :  { %209 = vmatpush1.bf16.msra.mxu0 %v1900_v3  ;;  %v1931_v8 = vld [vmem:[%s2642_s2 + $0x8] ss:$12 sps:$4 sm:$0xff]   ;;  %v1937_v9 = vld [vmem:[%s2642_s2 + $0x4c] ss:$12 sps:$4 sm:$0xff]   ;;  %v1956_v12 = vld [vmem:[%s2642_s2 + $0x64] ss:$12 sps:$4 sm:$0xff]  }
   0x4   :  { %210 = vmatprep.subr.bf16.mxu0 %v1908_v4  ;;  %1543 = vmatpush3.bf16.msra.mxu1 %v1931_v8  ;;  %v1943_v10 = vld [vmem:[%s2642_s2 + $0x20] ss:$12 sps:$4 sm:$0xff]   ;;  %v1950_v11 = vld [vmem:[%s2642_s2 + $0x48] ss:$12 sps:$4 sm:$0xff]   ;;  %v1962_v13 = vld [vmem:[%s2642_s2 + $0x38] ss:$12 sps:$4 sm:$0xff]  }
   0x5   :  { %1544 = vmatprep.subr.bf16.mxu1 %v1857_v1  ;;  %v1969_v14 = vld [vmem:[%s2642_s2 + $0x60] ss:$12 sps:$4 sm:$0xff]   ;;  %v1975_v15 = vld [vmem:[%s2642_s2 + $0x7c] ss:$12 sps:$4 sm:$0xff]   ;;  %v1988_v17 = vld [vmem:[%s2642_s2 + $0x78] ss:$12 sps:$4 sm:$0xff]  }
   0x6   :  { %v1981_v16 = vld [vmem:[%s2642_s2 + $0x50] ss:$12 sps:$4 sm:$0xff]   ;;  %v1994_v18 = vld [vmem:[%s2642_s2 + $0x94] ss:$12 sps:$4 sm:$0xff]   ;;  %v2013_v21 = vld [vmem:[%s2642_s2 + $0xac] ss:$12 sps:$4 sm:$0xff]  }
   0x7   :  { %211 = vmatpush1.bf16.msra.mxu0 %v1914_v5  ;;  %v2000_v19 = vld [vmem:[%s2642_s2 + $0x68] ss:$12 sps:$4 sm:$0xff]   ;;  %v2007_v20 = vld [vmem:[%s2642_s2 + $0x90] ss:$12 sps:$4 sm:$0xff]   ;;  %v2019_v22 = vld [vmem:[%s2642_s2 + $0x80] ss:$12 sps:$4 sm:$0xff]  }
   0x8   :  { %212 = vmatprep.subr.bf16.mxu0 %v1920_v6  ;;  %1545 = vmatpush3.bf16.msra.mxu1 %v1943_v10  ;;  %v2026_v23 = vld [vmem:[%s2642_s2 + $0xa8] ss:$12 sps:$4 sm:$0xff]   ;;  %v2031_v24 = vld [vmem:[%s2643_s1] sm:$0xff]  ;;  %v2054_v28 = vld [vmem:[%s2642_s2 + $0xb0] ss:$12 sps:$4 sm:$0xff]   ;;  %v66_v30 = vshrl.u32 %v65_v29, 7 }
   0x9   :  { %1546 = vmatprep.subr.bf16.mxu1 %v1857_v1  ;;  %v2036_v25 = vld [vmem:[%s2643_s1 + $0x8] sm:$0xff]  ;;  %v2043_v26 = vld [vmem:[%s2642_s2 + $0x98] ss:$12 sps:$4 sm:$0xff]   ;;  %v60_v32 = vld [vmem:[%s2644_s3] sm:$0x7] }
   0xa   :  { %v63_v27 = vpack.c.bf16 %v2036_v25, %v2031_v24  ;;  %v67_v31 = vsub.s32 0, %v66_v30  ;;  %v292_v33 = vld [vmem:[%s2645_s0] sm:$0xff]  ;;  %v294_v35 = vld [vmem:[%s2645_s0 + $0xc] sm:$0xff]  ;;  %v71_v38 = vsub.s32 1, %v66_v30  ;;  %v75_v58 = vsub.s32 2, %v66_v30 }
   0xb   :  { %213 = vmatpush1.bf16.msra.mxu0 %v1925_v7  ;;  %v296_v36 = vunpack.c.l.bf16 %v292_v33  ;;  %v299_v41 = vunpack.c.l.bf16 %v294_v35  ;;  %v297_v53 = vunpack.c.h.bf16 %v292_v33  ;;  %v300_v57 = vunpack.c.h.bf16 %v294_v35 }
   0xc   :  { %214 = vmatprep.subr.bf16.mxu0 %v1937_v9  ;;  %1547 = vmatpush3.bf16.msra.mxu1 %v1962_v13  ;;  %v2100_v34 = vrot.slane %v60_v32, %v67_v31  ;;  %v2107_v46 = vrot.slane %v60_v32, %v71_v38  ;;  %v2111_v61 = vrot.slane %v60_v32, %v75_v58 }
   0xd   :  { %1548 = vmatprep.subr.bf16.mxu1 %v1857_v1 }
   0xf   :  { %215 = vmatpush1.bf16.msra.mxu0 %v1950_v11 }
  0x10   :  { %216 = vmatprep.subr.bf16.mxu0 %v1956_v12  ;;  %1549 = vmatpush3.bf16.msra.mxu1 %v1981_v16 }
  0x11   :  { %1550 = vmatprep.subr.bf16.mxu1 %v1857_v1 }
  0x13   :  { %217 = vmatpush1.bf16.msra.mxu0 %v1969_v14 }
  0x14   :  { %218 = vmatprep.subr.bf16.mxu0 %v1975_v15  ;;  %1551 = vmatpush3.bf16.msra.mxu1 %v2000_v19 }
  0x15   :  { %1552 = vmatprep.subr.bf16.mxu1 %v1857_v1 }
  0x17   :  { %219 = vmatpush1.bf16.msra.mxu0 %v1988_v17 }
  0x18   :  { %220 = vmatprep.subr.bf16.mxu0 %v1994_v18  ;;  %1553 = vmatpush3.bf16.msra.mxu1 %v2019_v22 }
  0x19   :  { %1554 = vmatprep.subr.bf16.mxu1 %v1857_v1 }
  0x1b   :  { %221 = vmatpush1.bf16.msra.mxu0 %v2007_v20 }
  0x1c   :  { %222 = vmatprep.subr.bf16.mxu0 %v2013_v21  ;;  %1555 = vmatpush3.bf16.msra.mxu1 %v2043_v26 }
  0x1d   :  { %1556 = vmatprep.subr.bf16.mxu1 %v1857_v1 }
  0x1f   :  { %223 = vmatpush1.bf16.msra.mxu0 %v2026_v23 }
  0x20   :  { %344 = vmatprep.subr.bf16.mxu0 %v1893_v0  ;;  %1557 = vmatpush3.bf16.msra.mxu1 %v2054_v28 }
  0x21   :  { %1562 = vmatprep.subr.bf16.mxu1 %v1857_v1 }
  0x22   :  { %241 = vmatmul.mubr.bf16.vlgmr.msra.gmra.mrb[0].mxu0 %v63_v27 }
  0x23   :  { %345 = vmatpush1.bf16.msra.mxu0 %v1900_v3  ;;  %376 = vmatprep.mubr.bf16.mxu0 %v1858_v2 }
  0x24   :  { %346 = vmatprep.subr.bf16.mxu0 %v1908_v4  ;;  %1559 = vmatmul.mubr.bf16.vlgmr.msra.gmra.mrb[0].mxu1 %v63_v27  ;;  %v293_v27 = vld [vmem:[%s2645_s0 + $0x8] ss:$12 sps:$4 sm:$0xff]  }
  0x25   :  { %1563 = vmatpush3.bf16.msra.mxu1 %v1931_v8  ;;  %1578 = vmatprep.mubr.msk.bf16.mxu1 %vm1859_vm0, %v1857_v1  ;;  %v301_v30 = vunpack.c.h.bf16 %v293_v27 }
  0x26   :  { %1564 = vmatprep.subr.bf16.mxu1 %v1857_v1 }
  0x27   :  { %347 = vmatpush1.bf16.msra.mxu0 %v1914_v5 }
  0x28   :  { %348 = vmatprep.subr.bf16.mxu0 %v1920_v6 }
  0x29   :  { %1565 = vmatpush3.bf16.msra.mxu1 %v1943_v10 }
  0x2a   :  { %1566 = vmatprep.subr.bf16.mxu1 %v1857_v1 }
  0x2b   :  { %349 = vmatpush1.bf16.msra.mxu0 %v1925_v7 }
  0x2c   :  { %350 = vmatprep.subr.bf16.mxu0 %v1937_v9 }
  0x2d   :  { %1567 = vmatpush3.bf16.msra.mxu1 %v1962_v13 }
  0x2e   :  { %1568 = vmatprep.subr.bf16.mxu1 %v1857_v1 }
  0x2f   :  { %351 = vmatpush1.bf16.msra.mxu0 %v1950_v11 }
  0x30   :  { %352 = vmatprep.subr.bf16.mxu0 %v1956_v12 }
  0x31   :  { %1569 = vmatpush3.bf16.msra.mxu1 %v1981_v16 }
  0x32   :  { %1570 = vmatprep.subr.bf16.mxu1 %v1857_v1 }
  0x33   :  { %353 = vmatpush1.bf16.msra.mxu0 %v1969_v14 }
  0x34   :  { %354 = vmatprep.subr.bf16.mxu0 %v1975_v15 }
  0x35   :  { %1571 = vmatpush3.bf16.msra.mxu1 %v2000_v19 }
  0x36   :  { %1572 = vmatprep.subr.bf16.mxu1 %v1857_v1 }
  0x37   :  { %355 = vmatpush1.bf16.msra.mxu0 %v1988_v17 }
  0x38   :  { %356 = vmatprep.subr.bf16.mxu0 %v1994_v18 }
  0x39   :  { %1573 = vmatpush3.bf16.msra.mxu1 %v2019_v22 }
  0x3a   :  { %1574 = vmatprep.subr.bf16.mxu1 %v1857_v1 }
  0x3b   :  { %357 = vmatpush1.bf16.msra.mxu0 %v2007_v20 }
  0x3c   :  { %358 = vmatprep.subr.bf16.mxu0 %v2013_v21 }
  0x3d   :  { %1575 = vmatpush3.bf16.msra.mxu1 %v2043_v26 }
  0x3e   :  { %1576 = vmatprep.subr.bf16.mxu1 %v1857_v1 }
  0x3f   :  { %359 = vmatpush1.bf16.msra.mxu0 %v2026_v23 }
  0x40   :  { %482 = vmatprep.subr.bf16.mxu0 %v1893_v0 }
  0x41   :  { %1577 = vmatpush3.bf16.msra.mxu1 %v2054_v28 }
  0x42   :  { %1582 = vmatprep.subr.bf16.mxu1 %v1857_v1 }
  0xf5   :  { %v242_v37 = vpop.f32.mrb[0].mxu0 }
  0xf6   :  { %v243_v39 = vadd.f32 %v242_v37, %v2100_v34  ;;  %v244_v40 = vpop.f32.mrb[1].mxu0  ;;  %v298_v37 = vunpack.c.l.bf16 %v293_v27 }
  0xf7   :  { %v246_v42 = vpop.f32.mrb[2].mxu0  ;;  %v285_v49 = vpop.f32.mrb[0].mxu1  ;;  %v245_v52 = vadd.f32 %v244_v40, %v2107_v46 }
  0xf8   :  { %v302_v43 = vadd.f32 %v296_v36, %v243_v39  ;;  %v247_v44 = vadd.f32 %v246_v42, %v2100_v34  ;;  %v248_v45 = vpop.f32.mrb[3].mxu0  ;;  %v1560_v51 = vpop.f32.mrb[1].mxu1  ;;  %v286_v31 = vadd.f32 %v285_v49, %v2111_v61 }
  0xf9   :  { %v288_v54 = vpop.f32.mrb[2].mxu1  ;;  %v249_v56 = vadd.f32 %v248_v45, %v2107_v46  ;;  %v303_v59 = vadd.f32 %v297_v53, %v245_v52 }
  0xfa   :  { %v306_v47 = vmul.f32 0.5, %v302_v43  ;;  %v304_v48 = vadd.f32 %v299_v41, %v247_v44  ;;  %v1561_v55 = vpop.f32.mrb[3].mxu1  ;;  %v289_v32 = vadd.f32 %v288_v54, %v2111_v61 }
  0xfb   :  { %v305_v60 = vadd.f32 %v300_v57, %v249_v56  ;;  %v307_v62 = vmul.f32 0.5, %v303_v59 }
  0xfc   :  { %1737 = vtanh.f32 %v306_v47  ;;  %v308_v50 = vmul.f32 0.5, %v304_v48 }
  0xfd   :  { %v309_v29 = vmul.f32 0.5, %v305_v60 }
  0xfe   :  { %1739 = vtanh.f32 %v308_v50 }
  0xff   :  { %1741 = vtanh.f32 %v307_v62 }
 0x100   :  { %1743 = vtanh.f32 %v309_v29 }
 0x106   :  { %v1738_v63 = vpop.eup %1737 }
 0x107   :  { %v314_v33 = vadd.f32 1.0, %v1738_v63 }
 0x108   :  { %v1740_v36 = vpop.eup %1739 }
 0x109   :  { %v318_v38 = vmul.f32 0.5, %v314_v33  ;;  %v316_v35 = vadd.f32 1.0, %v1740_v36  ;;  %v1742_v44 = vpop.eup %1741 }
 0x10a   :  { %v1744_v45 = vpop.eup %1743  ;;  %v315_v47 = vadd.f32 1.0, %v1742_v44 }
 0x10b   :  { %v322_v39 = vmul.f32 %v318_v38, %v286_v31  ;;  %v320_v40 = vmul.f32 0.5, %v316_v35  ;;  %v317_v48 = vadd.f32 1.0, %v1744_v45 }
 0x10c   :  { %v319_v50 = vmul.f32 0.5, %v315_v47 }
 0x10d   :  { %v324_v41 = vadd.f32 %v322_v39, %v298_v37  ;;  %v323_v42 = vmul.f32 %v320_v40, %v289_v32  ;;  %v321_v53 = vmul.f32 0.5, %v317_v48 }
 0x10f   :  { %1745 = vtanh.f32 %v324_v41  ;;  %v325_v43 = vadd.f32 %v323_v42, %v301_v30 }
 0x111   :  { %1747 = vtanh.f32 %v325_v43 }
 0x119   :  { %v1746_v49 = vpop.eup %1745 }
 0x11a   :  { %v328_v51 = vsub.f32 %v2031_v24, %v1746_v49  ;;  %v1351_v24 = vld [vmem:[%s2645_s0 + $0x18] sm:$0xff] }
 0x11b   :  { %v1748_v52 = vpop.eup %1747  ;;  %v433_v60 = vunpack.c.l.bf16 %v1351_v24  ;;  %v434_v43 = vunpack.c.h.bf16 %v1351_v24 }
 0x11c   :  { %v329_v55 = vsub.f32 %v2036_v25, %v1748_v52  ;;  %v330_v56 = vmul.f32 %v328_v51, %v319_v50  ;;  %v1353_v25 = vld [vmem:[%s2645_s0 + $0x24] sm:$0xff] }
 0x11d   :  { %v436_v33 = vunpack.c.l.bf16 %v1353_v25  ;;  %v437_v45 = vunpack.c.h.bf16 %v1353_v25 }
 0x11e   :  { %v331_v54 = vmul.f32 %v329_v55, %v321_v53  ;;  %v2120_v57 = vadd.f32 %v1746_v49, %v330_v56  ;;  %v1352_v49 = vld [vmem:[%s2645_s0 + $0x20] ss:$12 sps:$4 sm:$0xff]  }
 0x11f   :  { %v435_v56 = vunpack.c.l.bf16 %v1352_v49 }
 0x120   :  { %v2122_v58 = vadd.f32 %v1748_v52, %v331_v54 }
 0x122   :  { %v334_v59 = vpack.c.bf16 %v2122_v58, %v2120_v57 }
 0x124   :  { %1427 = vst [vmem:[%s2646_s4] sm:$0xff] %v334_v59   ;;  %377 = vmatmul.mubr.bf16.vlgmr.msra.gmra.mrb[4].mxu0 %v334_v59  ;;  %1579 = vmatmul.mubr.bf16.vlgmr.msra.gmra.mrb[4].mxu1 %v334_v59 }
 0x125   :  { %483 = vmatpush1.bf16.msra.mxu0 %v1900_v3  ;;  %1583 = vmatpush3.bf16.msra.mxu1 %v1931_v8 }
 0x126   :  { %484 = vmatprep.subr.bf16.mxu0 %v1908_v4  ;;  %1584 = vmatprep.subr.bf16.mxu1 %v1857_v1 }
 0x127   :  { %514 = vmatprep.mubr.bf16.mxu0 %v1858_v2  ;;  %1598 = vmatprep.mubr.msk.bf16.mxu1 %vm1859_vm0, %v1857_v1 }
 0x129   :  { %485 = vmatpush1.bf16.msra.mxu0 %v1914_v5  ;;  %1585 = vmatpush3.bf16.msra.mxu1 %v1943_v10 }
 0x12a   :  { %486 = vmatprep.subr.bf16.mxu0 %v1920_v6  ;;  %1586 = vmatprep.subr.bf16.mxu1 %v1857_v1 }
 0x12d   :  { %487 = vmatpush1.bf16.msra.mxu0 %v1925_v7  ;;  %1587 = vmatpush3.bf16.msra.mxu1 %v1962_v13 }
 0x12e   :  { %488 = vmatprep.subr.bf16.mxu0 %v1937_v9  ;;  %1588 = vmatprep.subr.bf16.mxu1 %v1857_v1 }
 0x131   :  { %489 = vmatpush1.bf16.msra.mxu0 %v1950_v11  ;;  %1589 = vmatpush3.bf16.msra.mxu1 %v1981_v16 }
 0x132   :  { %490 = vmatprep.subr.bf16.mxu0 %v1956_v12  ;;  %1590 = vmatprep.subr.bf16.mxu1 %v1857_v1 }
 0x135   :  { %491 = vmatpush1.bf16.msra.mxu0 %v1969_v14  ;;  %1591 = vmatpush3.bf16.msra.mxu1 %v2000_v19 }
 0x136   :  { %492 = vmatprep.subr.bf16.mxu0 %v1975_v15  ;;  %1592 = vmatprep.subr.bf16.mxu1 %v1857_v1 }
 0x139   :  { %493 = vmatpush1.bf16.msra.mxu0 %v1988_v17  ;;  %1593 = vmatpush3.bf16.msra.mxu1 %v2019_v22 }
 0x13a   :  { %494 = vmatprep.subr.bf16.mxu0 %v1994_v18  ;;  %1594 = vmatprep.subr.bf16.mxu1 %v1857_v1 }
 0x13d   :  { %495 = vmatpush1.bf16.msra.mxu0 %v2007_v20  ;;  %1595 = vmatpush3.bf16.msra.mxu1 %v2043_v26 }
 0x13e   :  { %496 = vmatprep.subr.bf16.mxu0 %v2013_v21  ;;  %1596 = vmatprep.subr.bf16.mxu1 %v1857_v1 }
 0x141   :  { %497 = vmatpush1.bf16.msra.mxu0 %v2026_v23  ;;  %1597 = vmatpush3.bf16.msra.mxu1 %v2054_v28 }
 0x142   :  { %620 = vmatprep.subr.bf16.mxu0 %v1893_v0  ;;  %1602 = vmatprep.subr.bf16.mxu1 %v1857_v1 }
 0x1f7   :  { %v378_v62 = vpop.f32.mrb[4].mxu0  ;;  %v421_v63 = vpop.f32.mrb[4].mxu1 }
 0x1f8   :  { %v379_v27 = vadd.f32 %v378_v62, %v2100_v34  ;;  %v380_v29 = vpop.f32.mrb[5].mxu0  ;;  %v1580_v31 = vpop.f32.mrb[5].mxu1  ;;  %v422_v54 = vadd.f32 %v421_v63, %v2111_v61 }
 0x1f9   :  { %v382_v36 = vpop.f32.mrb[6].mxu0  ;;  %v424_v37 = vpop.f32.mrb[6].mxu1  ;;  %v381_v42 = vadd.f32 %v380_v29, %v2107_v46 }
 0x1fa   :  { %v439_v38 = vadd.f32 %v433_v60, %v379_v27  ;;  %v383_v35 = vadd.f32 %v382_v36, %v2100_v34  ;;  %v384_v30 = vpop.f32.mrb[7].mxu0  ;;  %v1581_v39 = vpop.f32.mrb[7].mxu1  ;;  %v438_v60 = vunpack.c.h.bf16 %v1352_v49  ;;  %v425_v25 = vadd.f32 %v424_v37, %v2111_v61 }
 0x1fb   :  { %v385_v44 = vadd.f32 %v384_v30, %v2107_v46  ;;  %v440_v47 = vadd.f32 %v434_v43, %v381_v42 }
 0x1fc   :  { %v443_v32 = vmul.f32 0.5, %v439_v38  ;;  %v441_v40 = vadd.f32 %v436_v33, %v383_v35 }
 0x1fd   :  { %v442_v48 = vadd.f32 %v437_v45, %v385_v44  ;;  %v444_v50 = vmul.f32 0.5, %v440_v47 }
 0x1fe   :  { %1749 = vtanh.f32 %v443_v32  ;;  %v445_v41 = vmul.f32 0.5, %v441_v40 }
 0x1ff   :  { %v446_v53 = vmul.f32 0.5, %v442_v48 }
 0x200   :  { %1751 = vtanh.f32 %v445_v41 }
 0x201   :  { %1753 = vtanh.f32 %v444_v50 }
 0x202   :  { %1755 = vtanh.f32 %v446_v53 }
 0x208   :  { %v1750_v51 = vpop.eup %1749 }
 0x209   :  { %v451_v52 = vadd.f32 1.0, %v1750_v51 }
 0x20a   :  { %v1752_v55 = vpop.eup %1751 }
 0x20b   :  { %v455_v59 = vmul.f32 0.5, %v451_v52  ;;  %v453_v24 = vadd.f32 1.0, %v1752_v55  ;;  %v1754_v36 = vpop.eup %1753 }
 0x20c   :  { %v1756_v38 = vpop.eup %1755  ;;  %v452_v35 = vadd.f32 1.0, %v1754_v36 }
 0x20d   :  { %v459_v62 = vmul.f32 %v455_v59, %v422_v54  ;;  %v457_v27 = vmul.f32 0.5, %v453_v24  ;;  %v454_v30 = vadd.f32 1.0, %v1756_v38 }
 0x20e   :  { %v456_v63 = vmul.f32 0.5, %v452_v35 }
 0x20f   :  { %v461_v29 = vadd.f32 %v459_v62, %v435_v56  ;;  %v460_v31 = vmul.f32 %v457_v27, %v425_v25  ;;  %v458_v42 = vmul.f32 0.5, %v454_v30 }
 0x211   :  { %1757 = vtanh.f32 %v461_v29  ;;  %v462_v33 = vadd.f32 %v460_v31, %v438_v60 }
 0x213   :  { %1759 = vtanh.f32 %v462_v33 }
 0x21b   :  { %v1758_v39 = vpop.eup %1757 }
 0x21c   :  { %v465_v32 = vsub.f32 %v2120_v57, %v1758_v39  ;;  %v1359_v57 = vld [vmem:[%s2645_s0 + $0x30] sm:$0xff] }
 0x21d   :  { %v1760_v40 = vpop.eup %1759  ;;  %v571_v48 = vunpack.c.l.bf16 %v1359_v57  ;;  %v572_v33 = vunpack.c.h.bf16 %v1359_v57 }
 0x21e   :  { %v467_v41 = vmul.f32 %v465_v32, %v456_v63  ;;  %v466_v37 = vsub.f32 %v2122_v58, %v1760_v40  ;;  %v1361_v58 = vld [vmem:[%s2645_s0 + $0x3c] sm:$0xff] }
 0x21f   :  { %v574_v55 = vunpack.c.l.bf16 %v1361_v58  ;;  %v575_v38 = vunpack.c.h.bf16 %v1361_v58 }
 0x220   :  { %v468_v43 = vmul.f32 %v466_v37, %v458_v42  ;;  %v2181_v44 = vadd.f32 %v1758_v39, %v467_v41  ;;  %v1360_v39 = vld [vmem:[%s2645_s0 + $0x38] ss:$12 sps:$4 sm:$0xff]  }
 0x221   :  { %v573_v37 = vunpack.c.l.bf16 %v1360_v39 }
 0x222   :  { %v2183_v45 = vadd.f32 %v1760_v40, %v468_v43 }
 0x224   :  { %v471_v47 = vpack.c.bf16 %v2183_v45, %v2181_v44 }
 0x226   :  { %1463 = vst [vmem:[%s2646_s4 + $0x8] sm:$0xff] %v471_v47   ;;  %515 = vmatmul.mubr.bf16.vlgmr.msra.gmra.mrb[8].mxu0 %v471_v47  ;;  %1599 = vmatmul.mubr.bf16.vlgmr.msra.gmra.mrb[8].mxu1 %v471_v47 }
 0x227   :  { %621 = vmatpush1.bf16.msra.mxu0 %v1900_v3  ;;  %1603 = vmatpush3.bf16.msra.mxu1 %v1931_v8 }
 0x228   :  { %622 = vmatprep.subr.bf16.mxu0 %v1908_v4  ;;  %1604 = vmatprep.subr.bf16.mxu1 %v1857_v1 }
 0x229   :  { %652 = vmatprep.mubr.bf16.mxu0 %v1858_v2  ;;  %1618 = vmatprep.mubr.msk.bf16.mxu1 %vm1859_vm0, %v1857_v1 }
 0x22b   :  { %623 = vmatpush1.bf16.msra.mxu0 %v1914_v5  ;;  %1605 = vmatpush3.bf16.msra.mxu1 %v1943_v10 }
 0x22c   :  { %624 = vmatprep.subr.bf16.mxu0 %v1920_v6  ;;  %1606 = vmatprep.subr.bf16.mxu1 %v1857_v1 }
 0x22f   :  { %625 = vmatpush1.bf16.msra.mxu0 %v1925_v7  ;;  %1607 = vmatpush3.bf16.msra.mxu1 %v1962_v13 }
 0x230   :  { %626 = vmatprep.subr.bf16.mxu0 %v1937_v9  ;;  %1608 = vmatprep.subr.bf16.mxu1 %v1857_v1 }
 0x233   :  { %627 = vmatpush1.bf16.msra.mxu0 %v1950_v11  ;;  %1609 = vmatpush3.bf16.msra.mxu1 %v1981_v16 }
 0x234   :  { %628 = vmatprep.subr.bf16.mxu0 %v1956_v12  ;;  %1610 = vmatprep.subr.bf16.mxu1 %v1857_v1 }
 0x237   :  { %629 = vmatpush1.bf16.msra.mxu0 %v1969_v14  ;;  %1611 = vmatpush3.bf16.msra.mxu1 %v2000_v19 }
 0x238   :  { %630 = vmatprep.subr.bf16.mxu0 %v1975_v15  ;;  %1612 = vmatprep.subr.bf16.mxu1 %v1857_v1 }
 0x23b   :  { %631 = vmatpush1.bf16.msra.mxu0 %v1988_v17  ;;  %1613 = vmatpush3.bf16.msra.mxu1 %v2019_v22 }
 0x23c   :  { %632 = vmatprep.subr.bf16.mxu0 %v1994_v18  ;;  %1614 = vmatprep.subr.bf16.mxu1 %v1857_v1 }
 0x23f   :  { %633 = vmatpush1.bf16.msra.mxu0 %v2007_v20  ;;  %1615 = vmatpush3.bf16.msra.mxu1 %v2043_v26 }
 0x240   :  { %634 = vmatprep.subr.bf16.mxu0 %v2013_v21  ;;  %1616 = vmatprep.subr.bf16.mxu1 %v1857_v1 }
 0x243   :  { %635 = vmatpush1.bf16.msra.mxu0 %v2026_v23  ;;  %1617 = vmatpush3.bf16.msra.mxu1 %v2054_v28 }
 0x244   :  { %758 = vmatprep.subr.bf16.mxu0 %v1893_v0  ;;  %1622 = vmatprep.subr.bf16.mxu1 %v1857_v1 }
 0x2f9   :  { %v516_v49 = vpop.f32.mrb[8].mxu0  ;;  %v559_v50 = vpop.f32.mrb[8].mxu1 }
 0x2fa   :  { %v517_v51 = vadd.f32 %v516_v49, %v2100_v34  ;;  %v518_v52 = vpop.f32.mrb[9].mxu0  ;;  %v1600_v53 = vpop.f32.mrb[9].mxu1  ;;  %v560_v43 = vadd.f32 %v559_v50, %v2111_v61 }
 0x2fb   :  { %v520_v56 = vpop.f32.mrb[10].mxu0  ;;  %v562_v54 = vpop.f32.mrb[10].mxu1  ;;  %v519_v31 = vadd.f32 %v518_v52, %v2107_v46 }
 0x2fc   :  { %v577_v59 = vadd.f32 %v571_v48, %v517_v51  ;;  %v521_v24 = vadd.f32 %v520_v56, %v2100_v34  ;;  %v522_v60 = vpop.f32.mrb[11].mxu0  ;;  %v1601_v62 = vpop.f32.mrb[11].mxu1  ;;  %v576_v48 = vunpack.c.h.bf16 %v1360_v39  ;;  %v563_v58 = vadd.f32 %v562_v54, %v2111_v61 }
 0x2fd   :  { %v523_v36 = vadd.f32 %v522_v60, %v2107_v46  ;;  %v578_v35 = vadd.f32 %v572_v33, %v519_v31 }
 0x2fe   :  { %v581_v25 = vmul.f32 0.5, %v577_v59  ;;  %v579_v27 = vadd.f32 %v574_v55, %v521_v24 }
 0x2ff   :  { %v580_v30 = vadd.f32 %v575_v38, %v523_v36  ;;  %v582_v63 = vmul.f32 0.5, %v578_v35 }
 0x300   :  { %1761 = vtanh.f32 %v581_v25  ;;  %v583_v29 = vmul.f32 0.5, %v579_v27 }
 0x301   :  { %v584_v41 = vmul.f32 0.5, %v580_v30 }
 0x302   :  { %1763 = vtanh.f32 %v583_v29 }
 0x303   :  { %1765 = vtanh.f32 %v582_v63 }
 0x304   :  { %1767 = vtanh.f32 %v584_v41 }
 0x30a   :  { %v1762_v32 = vpop.eup %1761 }
 0x30b   :  { %v589_v40 = vadd.f32 1.0, %v1762_v32 }
 0x30c   :  { %v1764_v42 = vpop.eup %1763 }
 0x30d   :  { %v593_v47 = vmul.f32 0.5, %v589_v40  ;;  %v591_v57 = vadd.f32 1.0, %v1764_v42  ;;  %v1766_v56 = vpop.eup %1765 }
 0x30e   :  { %v1768_v59 = vpop.eup %1767  ;;  %v590_v24 = vadd.f32 1.0, %v1766_v56 }
 0x30f   :  { %v597_v49 = vmul.f32 %v593_v47, %v560_v43  ;;  %v595_v51 = vmul.f32 0.5, %v591_v57  ;;  %v592_v60 = vadd.f32 1.0, %v1768_v59 }
 0x310   :  { %v594_v50 = vmul.f32 0.5, %v590_v24 }
 0x311   :  { %v599_v52 = vadd.f32 %v597_v49, %v573_v37  ;;  %v598_v53 = vmul.f32 %v595_v51, %v563_v58  ;;  %v596_v31 = vmul.f32 0.5, %v592_v60  ;;  %v1368_v60 = vld [vmem:[%s2645_s0 + $0x50] ss:$12 sps:$4 sm:$0xff]  }
 0x313   :  { %1769 = vtanh.f32 %v599_v52  ;;  %v600_v55 = vadd.f32 %v598_v53, %v576_v48 }
 0x315   :  { %1771 = vtanh.f32 %v600_v55 }
 0x31d   :  { %v1770_v62 = vpop.eup %1769 }
 0x31e   :  { %v603_v25 = vsub.f32 %v2181_v44, %v1770_v62  ;;  %v1367_v44 = vld [vmem:[%s2645_s0 + $0x48] sm:$0xff] }
 0x31f   :  { %v1772_v27 = vpop.eup %1771  ;;  %v709_v30 = vunpack.c.l.bf16 %v1367_v44  ;;  %v710_v53 = vunpack.c.h.bf16 %v1367_v44  ;;  %v714_v44 = vunpack.c.h.bf16 %v1368_v60 }
 0x320   :  { %v605_v29 = vmul.f32 %v603_v25, %v594_v50  ;;  %v604_v54 = vsub.f32 %v2183_v45, %v1772_v27  ;;  %v1369_v45 = vld [vmem:[%s2645_s0 + $0x54] sm:$0xff] }
 0x321   :  { %v712_v42 = vunpack.c.l.bf16 %v1369_v45  ;;  %v713_v56 = vunpack.c.h.bf16 %v1369_v45 }
 0x322   :  { %v606_v33 = vmul.f32 %v604_v54, %v596_v31  ;;  %v2242_v36 = vadd.f32 %v1770_v62, %v605_v29  ;;  %v711_v31 = vunpack.c.l.bf16 %v1368_v60 }
 0x324   :  { %v2244_v38 = vadd.f32 %v1772_v27, %v606_v33 }
 0x326   :  { %v609_v35 = vpack.c.bf16 %v2244_v38, %v2242_v36 }
 0x328   :  { %1464 = vst [vmem:[%s2646_s4 + $0x10] sm:$0xff] %v609_v35   ;;  %653 = vmatmul.mubr.bf16.vlgmr.msra.gmra.mrb[12].mxu0 %v609_v35  ;;  %1619 = vmatmul.mubr.bf16.vlgmr.msra.gmra.mrb[12].mxu1 %v609_v35 }
 0x329   :  { %759 = vmatpush1.bf16.msra.mxu0 %v1900_v3  ;;  %1623 = vmatpush3.bf16.msra.mxu1 %v1931_v8 }
 0x32a   :  { %760 = vmatprep.subr.bf16.mxu0 %v1908_v4  ;;  %1624 = vmatprep.subr.bf16.mxu1 %v1857_v1 }
 0x32b   :  { %790 = vmatprep.mubr.bf16.mxu0 %v1858_v2  ;;  %1638 = vmatprep.mubr.msk.bf16.mxu1 %vm1859_vm0, %v1857_v1 }
 0x32d   :  { %761 = vmatpush1.bf16.msra.mxu0 %v1914_v5  ;;  %1625 = vmatpush3.bf16.msra.mxu1 %v1943_v10 }
 0x32e   :  { %762 = vmatprep.subr.bf16.mxu0 %v1920_v6  ;;  %1626 = vmatprep.subr.bf16.mxu1 %v1857_v1 }
 0x331   :  { %763 = vmatpush1.bf16.msra.mxu0 %v1925_v7  ;;  %1627 = vmatpush3.bf16.msra.mxu1 %v1962_v13 }
 0x332   :  { %764 = vmatprep.subr.bf16.mxu0 %v1937_v9  ;;  %1628 = vmatprep.subr.bf16.mxu1 %v1857_v1 }
 0x335   :  { %765 = vmatpush1.bf16.msra.mxu0 %v1950_v11  ;;  %1629 = vmatpush3.bf16.msra.mxu1 %v1981_v16 }
 0x336   :  { %766 = vmatprep.subr.bf16.mxu0 %v1956_v12  ;;  %1630 = vmatprep.subr.bf16.mxu1 %v1857_v1 }
 0x339   :  { %767 = vmatpush1.bf16.msra.mxu0 %v1969_v14  ;;  %1631 = vmatpush3.bf16.msra.mxu1 %v2000_v19 }
 0x33a   :  { %768 = vmatprep.subr.bf16.mxu0 %v1975_v15  ;;  %1632 = vmatprep.subr.bf16.mxu1 %v1857_v1 }
 0x33d   :  { %769 = vmatpush1.bf16.msra.mxu0 %v1988_v17  ;;  %1633 = vmatpush3.bf16.msra.mxu1 %v2019_v22 }
 0x33e   :  { %770 = vmatprep.subr.bf16.mxu0 %v1994_v18  ;;  %1634 = vmatprep.subr.bf16.mxu1 %v1857_v1 }
 0x341   :  { %771 = vmatpush1.bf16.msra.mxu0 %v2007_v20  ;;  %1635 = vmatpush3.bf16.msra.mxu1 %v2043_v26 }
 0x342   :  { %772 = vmatprep.subr.bf16.mxu0 %v2013_v21  ;;  %1636 = vmatprep.subr.bf16.mxu1 %v1857_v1 }
 0x345   :  { %773 = vmatpush1.bf16.msra.mxu0 %v2026_v23  ;;  %1637 = vmatpush3.bf16.msra.mxu1 %v2054_v28 }
 0x346   :  { %896 = vmatprep.subr.bf16.mxu0 %v1893_v0  ;;  %1642 = vmatprep.subr.bf16.mxu1 %v1857_v1 }
 0x3fb   :  { %v654_v39 = vpop.f32.mrb[12].mxu0  ;;  %v697_v63 = vpop.f32.mrb[12].mxu1 }
 0x3fc   :  { %v655_v32 = vadd.f32 %v654_v39, %v2100_v34  ;;  %v656_v40 = vpop.f32.mrb[13].mxu0  ;;  %v1620_v41 = vpop.f32.mrb[13].mxu1  ;;  %v698_v54 = vadd.f32 %v697_v63, %v2111_v61 }
 0x3fd   :  { %v658_v37 = vpop.f32.mrb[14].mxu0  ;;  %v700_v0 = vpop.f32.mrb[14].mxu1  ;;  %v657_v52 = vadd.f32 %v656_v40, %v2107_v46 }
 0x3fe   :  { %v715_v43 = vadd.f32 %v709_v30, %v655_v32  ;;  %v659_v47 = vadd.f32 %v658_v37, %v2100_v34  ;;  %v660_v57 = vpop.f32.mrb[15].mxu0  ;;  %v1621_v48 = vpop.f32.mrb[15].mxu1  ;;  %v701_v45 = vadd.f32 %v700_v0, %v2111_v61 }
 0x3ff   :  { %v661_v55 = vadd.f32 %v660_v57, %v2107_v46  ;;  %v716_v59 = vadd.f32 %v710_v53, %v657_v52 }
 0x400   :  { %v719_v49 = vmul.f32 0.5, %v715_v43  ;;  %v717_v58 = vadd.f32 %v712_v42, %v659_v47 }
 0x401   :  { %v718_v24 = vadd.f32 %v713_v56, %v661_v55  ;;  %v720_v62 = vmul.f32 0.5, %v716_v59  ;;  %v1376_v59 = vld [vmem:[%s2645_s0 + $0x68] ss:$12 sps:$4 sm:$0xff]  }
 0x402   :  { %1773 = vtanh.f32 %v719_v49  ;;  %v721_v51 = vmul.f32 0.5, %v717_v58 }
 0x403   :  { %v722_v27 = vmul.f32 0.5, %v718_v24 }
 0x404   :  { %1775 = vtanh.f32 %v721_v51 }
 0x405   :  { %1777 = vtanh.f32 %v720_v62 }
 0x406   :  { %1779 = vtanh.f32 %v722_v27  ;;  %v849_v27 = vunpack.c.l.bf16 %v1376_v59 }
 0x40c   :  { %v1774_v50 = vpop.eup %1773 }
 0x40d   :  { %v727_v25 = vadd.f32 1.0, %v1774_v50 }
 0x40e   :  { %v1776_v29 = vpop.eup %1775 }
 0x40f   :  { %v731_v33 = vmul.f32 0.5, %v727_v25  ;;  %v729_v35 = vadd.f32 1.0, %v1776_v29  ;;  %v1778_v42 = vpop.eup %1777 }
 0x410   :  { %v1780_v37 = vpop.eup %1779  ;;  %v728_v43 = vadd.f32 1.0, %v1778_v42 }
 0x411   :  { %v735_v30 = vmul.f32 %v731_v33, %v698_v54  ;;  %v733_v39 = vmul.f32 0.5, %v729_v35  ;;  %v730_v47 = vadd.f32 1.0, %v1780_v37  ;;  %v852_v33 = vunpack.c.h.bf16 %v1376_v59 }
 0x412   :  { %v732_v63 = vmul.f32 0.5, %v728_v43 }
 0x413   :  { %v737_v32 = vadd.f32 %v735_v30, %v711_v31  ;;  %v736_v40 = vmul.f32 %v733_v39, %v701_v45  ;;  %v734_v51 = vmul.f32 0.5, %v730_v47 }
 0x415   :  { %1781 = vtanh.f32 %v737_v32  ;;  %v738_v41 = vadd.f32 %v736_v40, %v714_v44 }
 0x417   :  { %1783 = vtanh.f32 %v738_v41 }
 0x41f   :  { %v1782_v57 = vpop.eup %1781 }
 0x420   :  { %v741_v48 = vsub.f32 %v2242_v36, %v1782_v57 }
 0x421   :  { %v1784_v49 = vpop.eup %1783 }
 0x422   :  { %v743_v58 = vmul.f32 %v741_v48, %v732_v63  ;;  %v742_v0 = vsub.f32 %v2244_v38, %v1784_v49 }
 0x424   :  { %v744_v52 = vmul.f32 %v742_v0, %v734_v51  ;;  %v2303_v53 = vadd.f32 %v1782_v57, %v743_v58 }
 0x426   :  { %v2305_v55 = vadd.f32 %v1784_v49, %v744_v52 }
 0x428   :  { %v747_v56 = vpack.c.bf16 %v2305_v55, %v2303_v53 }
 0x42a   :  { %1465 = vst [vmem:[%s2646_s4 + $0x18] sm:$0xff] %v747_v56   ;;  %791 = vmatmul.mubr.bf16.vlgmr.msra.gmra.mrb[16].mxu0 %v747_v56  ;;  %1639 = vmatmul.mubr.bf16.vlgmr.msra.gmra.mrb[16].mxu1 %v747_v56 }
 0x42b   :  { %897 = vmatpush1.bf16.msra.mxu0 %v1900_v3  ;;  %1643 = vmatpush3.bf16.msra.mxu1 %v1931_v8  ;;  %v2348_v3 = vld [vmem:[%s2642_s2 + $0x4] ss:$12 sps:$4 sm:$0xff]  }
 0x42c   :  { %898 = vmatprep.subr.bf16.mxu0 %v1908_v4  ;;  %1644 = vmatprep.subr.bf16.mxu1 %v1857_v1  ;;  %v1375_v4 = vld [vmem:[%s2645_s0 + $0x60] sm:$0xff] }
 0x42d   :  { %928 = vmatprep.mubr.bf16.mxu0 %v1858_v2  ;;  %1658 = vmatprep.mubr.msk.bf16.mxu1 %vm1859_vm0, %v1857_v1 }
 0x42f   :  { %899 = vmatpush1.bf16.msra.mxu0 %v1914_v5  ;;  %1645 = vmatpush3.bf16.msra.mxu1 %v1943_v10  ;;  %v1377_v5 = vld [vmem:[%s2645_s0 + $0x6c] sm:$0xff] }
 0x430   :  { %900 = vmatprep.subr.bf16.mxu0 %v1920_v6  ;;  %1646 = vmatprep.subr.bf16.mxu1 %v1857_v1  ;;  %v847_v6 = vunpack.c.l.bf16 %v1375_v4 }
 0x433   :  { %901 = vmatpush1.bf16.msra.mxu0 %v1925_v7  ;;  %1647 = vmatpush3.bf16.msra.mxu1 %v1962_v13 }
 0x434   :  { %902 = vmatprep.subr.bf16.mxu0 %v1937_v9  ;;  %1648 = vmatprep.subr.bf16.mxu1 %v1857_v1 }
 0x437   :  { %903 = vmatpush1.bf16.msra.mxu0 %v1950_v11  ;;  %1649 = vmatpush3.bf16.msra.mxu1 %v1981_v16 }
 0x438   :  { %904 = vmatprep.subr.bf16.mxu0 %v1956_v12  ;;  %1650 = vmatprep.subr.bf16.mxu1 %v1857_v1  ;;  %v850_v12 = vunpack.c.l.bf16 %v1377_v5 }
 0x43b   :  { %905 = vmatpush1.bf16.msra.mxu0 %v1969_v14  ;;  %1651 = vmatpush3.bf16.msra.mxu1 %v2000_v19 }
 0x43c   :  { %906 = vmatprep.subr.bf16.mxu0 %v1975_v15  ;;  %1652 = vmatprep.subr.bf16.mxu1 %v1857_v1 }
 0x43f   :  { %907 = vmatpush1.bf16.msra.mxu0 %v1988_v17  ;;  %1653 = vmatpush3.bf16.msra.mxu1 %v2019_v22 }
 0x440   :  { %908 = vmatprep.subr.bf16.mxu0 %v1994_v18  ;;  %1654 = vmatprep.subr.bf16.mxu1 %v1857_v1 }
 0x443   :  { %909 = vmatpush1.bf16.msra.mxu0 %v2007_v20  ;;  %1655 = vmatpush3.bf16.msra.mxu1 %v2043_v26 }
 0x444   :  { %910 = vmatprep.subr.bf16.mxu0 %v2013_v21  ;;  %1656 = vmatprep.subr.bf16.mxu1 %v1857_v1 }
 0x447   :  { %911 = vmatpush1.bf16.msra.mxu0 %v2026_v23  ;;  %1657 = vmatpush3.bf16.msra.mxu1 %v2054_v28  ;;  %v848_v23 = vunpack.c.h.bf16 %v1375_v4  ;;  %v851_v28 = vunpack.c.h.bf16 %v1377_v5  ;;  %v2393_v4 = vld [vmem:[%s2642_s2 + $0x1c] ss:$12 sps:$4 sm:$0xff]   ;;  %v2403_v5 = vld [vmem:[%s2642_s2 + $0x18] ss:$12 sps:$4 sm:$0xff]  }
 0x448   :  { %1034 = vmatprep.subr.bf16.mxu0 %v2348_v3  ;;  %1662 = vmatprep.subr.bf16.mxu1 %v1857_v1 }
 0x4fd   :  { %v792_v7 = vpop.f32.mrb[16].mxu0  ;;  %v835_v8 = vpop.f32.mrb[16].mxu1 }
 0x4fe   :  { %v793_v9 = vadd.f32 %v792_v7, %v2100_v34  ;;  %v794_v10 = vpop.f32.mrb[17].mxu0  ;;  %v1640_v11 = vpop.f32.mrb[17].mxu1  ;;  %v836_v29 = vadd.f32 %v835_v8, %v2111_v61  ;;  %v2415_v7 = vld [vmem:[%s2642_s2 + $0x34] ss:$12 sps:$4 sm:$0xff]   ;;  %v2422_v8 = vld [vmem:[%s2642_s2 + $0x30] ss:$12 sps:$4 sm:$0xff]  }
 0x4ff   :  { %v796_v13 = vpop.f32.mrb[18].mxu0  ;;  %v838_v14 = vpop.f32.mrb[18].mxu1  ;;  %v795_v22 = vadd.f32 %v794_v10, %v2107_v46  ;;  %v2434_v10 = vld [vmem:[%s2642_s2 + $0x4c] ss:$12 sps:$4 sm:$0xff]   ;;  %v2441_v11 = vld [vmem:[%s2642_s2 + $0x48] ss:$12 sps:$4 sm:$0xff]  }
 0x500   :  { %v853_v15 = vadd.f32 %v847_v6, %v793_v9  ;;  %v797_v16 = vadd.f32 %v796_v13, %v2100_v34  ;;  %v798_v17 = vpop.f32.mrb[19].mxu0  ;;  %v1641_v18 = vpop.f32.mrb[19].mxu1  ;;  %v839_v44 = vadd.f32 %v838_v14, %v2111_v61  ;;  %v2409_v6 = vld [vmem:[%s2642_s2 + $0x20] ss:$12 sps:$4 sm:$0xff]   ;;  %v2428_v9 = vld [vmem:[%s2642_s2 + $0x38] ss:$12 sps:$4 sm:$0xff]  }
 0x501   :  { %v799_v26 = vadd.f32 %v798_v17, %v2107_v46  ;;  %v854_v36 = vadd.f32 %v848_v23, %v795_v22  ;;  %v2453_v13 = vld [vmem:[%s2642_s2 + $0x64] ss:$12 sps:$4 sm:$0xff]   ;;  %v2460_v14 = vld [vmem:[%s2642_s2 + $0x60] ss:$12 sps:$4 sm:$0xff]   ;;  %v2517_v23 = vld [vmem:[%s2642_s2 + $0xa8] ss:$12 sps:$4 sm:$0xff]  }
 0x502   :  { %v857_v19 = vmul.f32 0.5, %v853_v15  ;;  %v855_v20 = vadd.f32 %v850_v12, %v797_v16  ;;  %v2447_v12 = vld [vmem:[%s2642_s2 + $0x50] ss:$12 sps:$4 sm:$0xff]   ;;  %v2466_v15 = vld [vmem:[%s2642_s2 + $0x68] ss:$12 sps:$4 sm:$0xff]  }
 0x503   :  { %v856_v38 = vadd.f32 %v851_v28, %v799_v26  ;;  %v858_v24 = vmul.f32 0.5, %v854_v36  ;;  %v2472_v16 = vld [vmem:[%s2642_s2 + $0x7c] ss:$12 sps:$4 sm:$0xff]   ;;  %v2479_v17 = vld [vmem:[%s2642_s2 + $0x78] ss:$12 sps:$4 sm:$0xff]  }
 0x504   :  { %1785 = vtanh.f32 %v857_v19  ;;  %v859_v21 = vmul.f32 0.5, %v855_v20  ;;  %v2485_v18 = vld [vmem:[%s2642_s2 + $0x80] ss:$12 sps:$4 sm:$0xff]   ;;  %v2498_v20 = vld [vmem:[%s2642_s2 + $0x90] ss:$12 sps:$4 sm:$0xff]   ;;  %v1385_v36 = vld [vmem:[%s2645_s0 + $0x84] sm:$0xff] }
 0x505   :  { %v860_v50 = vmul.f32 0.5, %v856_v38  ;;  %v2491_v19 = vld [vmem:[%s2642_s2 + $0x94] ss:$12 sps:$4 sm:$0xff]   ;;  %v2510_v22 = vld [vmem:[%s2642_s2 + $0xac] ss:$12 sps:$4 sm:$0xff]  }
 0x506   :  { %1787 = vtanh.f32 %v859_v21  ;;  %v2504_v21 = vld [vmem:[%s2642_s2 + $0x98] ss:$12 sps:$4 sm:$0xff]   ;;  %v2523_v26 = vld [vmem:[%s2642_s2 + $0xb0] ss:$12 sps:$4 sm:$0xff]  }
 0x507   :  { %1789 = vtanh.f32 %v858_v24  ;;  %v1383_v28 = vld [vmem:[%s2645_s0 + $0x78] sm:$0xff] }
 0x508   :  { %1791 = vtanh.f32 %v860_v50  ;;  %v985_v38 = vunpack.c.l.bf16 %v1383_v28 }
 0x50e   :  { %v1786_v60 = vpop.eup %1785 }
 0x50f   :  { %v865_v62 = vadd.f32 1.0, %v1786_v60 }
 0x510   :  { %v1788_v25 = vpop.eup %1787 }
 0x511   :  { %v869_v31 = vmul.f32 0.5, %v865_v62  ;;  %v867_v54 = vadd.f32 1.0, %v1788_v25  ;;  %v1790_v40 = vpop.eup %1789  ;;  %v988_v25 = vunpack.c.l.bf16 %v1385_v36 }
 0x512   :  { %v1792_v41 = vpop.eup %1791  ;;  %v866_v42 = vadd.f32 1.0, %v1790_v40  ;;  %v989_v40 = vunpack.c.h.bf16 %v1385_v36 }
 0x513   :  { %v873_v35 = vmul.f32 %v869_v31, %v836_v29  ;;  %v871_v30 = vmul.f32 0.5, %v867_v54  ;;  %v868_v37 = vadd.f32 1.0, %v1792_v41 }
 0x514   :  { %v870_v47 = vmul.f32 0.5, %v866_v42 }
 0x515   :  { %v875_v45 = vadd.f32 %v873_v35, %v849_v27  ;;  %v874_v39 = vmul.f32 %v871_v30, %v839_v44  ;;  %v872_v49 = vmul.f32 0.5, %v868_v37  ;;  %v1384_v37 = vld [vmem:[%s2645_s0 + $0x80] ss:$12 sps:$4 sm:$0xff]  }
 0x517   :  { %1793 = vtanh.f32 %v875_v45  ;;  %v876_v32 = vadd.f32 %v874_v39, %v852_v33  ;;  %v986_v39 = vunpack.c.h.bf16 %v1383_v28  ;;  %v990_v28 = vunpack.c.h.bf16 %v1384_v37 }
 0x519   :  { %1795 = vtanh.f32 %v876_v32 }
 0x521   :  { %v1794_v43 = vpop.eup %1793 }
 0x522   :  { %v879_v57 = vsub.f32 %v2303_v53, %v1794_v43  ;;  %v2381_v53 = vld [vmem:[%s2642_s2] ss:$12 sps:$4 sm:$0xff]  }
 0x523   :  { %v1796_v63 = vpop.eup %1795 }
 0x524   :  { %v881_v48 = vmul.f32 %v879_v57, %v870_v47  ;;  %v880_v58 = vsub.f32 %v2305_v55, %v1796_v63  ;;  %v2387_v55 = vld [vmem:[%s2642_s2 + $0x8] ss:$12 sps:$4 sm:$0xff]  }
 0x526   :  { %v882_v51 = vmul.f32 %v880_v58, %v872_v49  ;;  %v2369_v0 = vadd.f32 %v1794_v43, %v881_v48  ;;  %v987_v49 = vunpack.c.l.bf16 %v1384_v37 }
 0x528   :  { %v2371_v52 = vadd.f32 %v1796_v63, %v882_v51 }
 0x52a   :  { %v885_v56 = vpack.c.bf16 %v2371_v52, %v2369_v0 }
 0x52c   :  { %1466 = vst [vmem:[%s2646_s4 + $0x20] sm:$0xff] %v885_v56   ;;  %929 = vmatmul.mubr.bf16.vlgmr.msra.gmra.mrb[20].mxu0 %v885_v56  ;;  %1659 = vmatmul.mubr.bf16.vlgmr.msra.gmra.mrb[20].mxu1 %v885_v56 }
 0x52d   :  { %1035 = vmatpush1.bf16.msra.mxu0 %v2381_v53  ;;  %1663 = vmatpush3.bf16.msra.mxu1 %v2387_v55 }
 0x52e   :  { %1036 = vmatprep.subr.bf16.mxu0 %v2393_v4  ;;  %1664 = vmatprep.subr.bf16.mxu1 %v1857_v1 }
 0x52f   :  { %1066 = vmatprep.mubr.bf16.mxu0 %v1858_v2  ;;  %1678 = vmatprep.mubr.msk.bf16.mxu1 %vm1859_vm0, %v1857_v1 }
 0x531   :  { %1037 = vmatpush1.bf16.msra.mxu0 %v2403_v5  ;;  %1665 = vmatpush3.bf16.msra.mxu1 %v2409_v6 }
 0x532   :  { %1038 = vmatprep.subr.bf16.mxu0 %v2415_v7  ;;  %1666 = vmatprep.subr.bf16.mxu1 %v1857_v1 }
 0x535   :  { %1039 = vmatpush1.bf16.msra.mxu0 %v2422_v8  ;;  %1667 = vmatpush3.bf16.msra.mxu1 %v2428_v9 }
 0x536   :  { %1040 = vmatprep.subr.bf16.mxu0 %v2434_v10  ;;  %1668 = vmatprep.subr.bf16.mxu1 %v1857_v1 }
 0x539   :  { %1041 = vmatpush1.bf16.msra.mxu0 %v2441_v11  ;;  %1669 = vmatpush3.bf16.msra.mxu1 %v2447_v12 }
 0x53a   :  { %1042 = vmatprep.subr.bf16.mxu0 %v2453_v13  ;;  %1670 = vmatprep.subr.bf16.mxu1 %v1857_v1 }
 0x53d   :  { %1043 = vmatpush1.bf16.msra.mxu0 %v2460_v14  ;;  %1671 = vmatpush3.bf16.msra.mxu1 %v2466_v15 }
 0x53e   :  { %1044 = vmatprep.subr.bf16.mxu0 %v2472_v16  ;;  %1672 = vmatprep.subr.bf16.mxu1 %v1857_v1 }
 0x541   :  { %1045 = vmatpush1.bf16.msra.mxu0 %v2479_v17  ;;  %1673 = vmatpush3.bf16.msra.mxu1 %v2485_v18 }
 0x542   :  { %1046 = vmatprep.subr.bf16.mxu0 %v2491_v19  ;;  %1674 = vmatprep.subr.bf16.mxu1 %v1857_v1 }
 0x545   :  { %1047 = vmatpush1.bf16.msra.mxu0 %v2498_v20  ;;  %1675 = vmatpush3.bf16.msra.mxu1 %v2504_v21 }
 0x546   :  { %1048 = vmatprep.subr.bf16.mxu0 %v2510_v22  ;;  %1676 = vmatprep.subr.bf16.mxu1 %v1857_v1 }
 0x549   :  { %1049 = vmatpush1.bf16.msra.mxu0 %v2517_v23  ;;  %1677 = vmatpush3.bf16.msra.mxu1 %v2523_v26 }
 0x54a   :  { %1172 = vmatprep.subr.bf16.mxu0 %v2348_v3  ;;  %1682 = vmatprep.subr.bf16.mxu1 %v1857_v1 }
 0x5ff   :  { %v930_v59 = vpop.f32.mrb[20].mxu0  ;;  %v973_v24 = vpop.f32.mrb[20].mxu1 }
 0x600   :  { %v931_v60 = vadd.f32 %v930_v59, %v2100_v34  ;;  %v932_v62 = vpop.f32.mrb[21].mxu0  ;;  %v1660_v50 = vpop.f32.mrb[21].mxu1  ;;  %v974_v58 = vadd.f32 %v973_v24, %v2111_v61 }
 0x601   :  { %v934_v27 = vpop.f32.mrb[22].mxu0  ;;  %v976_v3 = vpop.f32.mrb[22].mxu1  ;;  %v933_v45 = vadd.f32 %v932_v62, %v2107_v46 }
 0x602   :  { %v991_v29 = vadd.f32 %v985_v38, %v931_v60  ;;  %v935_v31 = vadd.f32 %v934_v27, %v2100_v34  ;;  %v936_v54 = vpop.f32.mrb[23].mxu0  ;;  %v1661_v33 = vpop.f32.mrb[23].mxu1  ;;  %v977_v36 = vadd.f32 %v976_v3, %v2111_v61 }
 0x603   :  { %v937_v32 = vadd.f32 %v936_v54, %v2107_v46  ;;  %v992_v41 = vadd.f32 %v986_v39, %v933_v45 }
 0x604   :  { %v995_v35 = vmul.f32 0.5, %v991_v29  ;;  %v993_v44 = vadd.f32 %v988_v25, %v935_v31 }
 0x605   :  { %v994_v42 = vadd.f32 %v989_v40, %v937_v32  ;;  %v996_v43 = vmul.f32 0.5, %v992_v41 }
 0x606   :  { %1797 = vtanh.f32 %v995_v35  ;;  %v997_v30 = vmul.f32 0.5, %v993_v44 }
 0x607   :  { %v998_v63 = vmul.f32 0.5, %v994_v42 }
 0x608   :  { %1799 = vtanh.f32 %v997_v30 }
 0x609   :  { %1801 = vtanh.f32 %v996_v43 }
 0x60a   :  { %1803 = vtanh.f32 %v998_v63 }
 0x610   :  { %v1798_v47 = vpop.eup %1797 }
 0x611   :  { %v1003_v57 = vadd.f32 1.0, %v1798_v47 }
 0x612   :  { %v1800_v48 = vpop.eup %1799 }
 0x613   :  { %v1007_v51 = vmul.f32 0.5, %v1003_v57  ;;  %v1005_v56 = vadd.f32 1.0, %v1800_v48  ;;  %v1802_v25 = vpop.eup %1801 }
 0x614   :  { %v1804_v27 = vpop.eup %1803  ;;  %v1004_v29 = vadd.f32 1.0, %v1802_v25 }
 0x615   :  { %v1011_v38 = vmul.f32 %v1007_v51, %v974_v58  ;;  %v1009_v59 = vmul.f32 0.5, %v1005_v56  ;;  %v1006_v31 = vadd.f32 1.0, %v1804_v27 }
 0x616   :  { %v1008_v24 = vmul.f32 0.5, %v1004_v29 }
 0x617   :  { %v1013_v60 = vadd.f32 %v1011_v38, %v987_v49  ;;  %v1012_v62 = vmul.f32 %v1009_v59, %v977_v36  ;;  %v1010_v30 = vmul.f32 0.5, %v1006_v31 }
 0x619   :  { %1805 = vtanh.f32 %v1013_v60  ;;  %v1014_v50 = vadd.f32 %v1012_v62, %v990_v28 }
 0x61b   :  { %1807 = vtanh.f32 %v1014_v50 }
 0x623   :  { %v1806_v54 = vpop.eup %1805 }
 0x624   :  { %v1017_v33 = vsub.f32 %v2369_v0, %v1806_v54  ;;  %v1393_v0 = vld [vmem:[%s2645_s0 + $0x9c] sm:$0xff] }
 0x625   :  { %v1808_v35 = vpop.eup %1807 }
 0x626   :  { %v1019_v44 = vmul.f32 %v1017_v33, %v1008_v24  ;;  %v1018_v3 = vsub.f32 %v2371_v52, %v1808_v35 }
 0x628   :  { %v1020_v45 = vmul.f32 %v1018_v3, %v1010_v30  ;;  %v2545_v39 = vadd.f32 %v1806_v54, %v1019_v44  ;;  %v1399_v3 = vld [vmem:[%s2645_s0 + $0xa8] sm:$0xff] }
 0x62a   :  { %v2547_v32 = vadd.f32 %v1808_v35, %v1020_v45  ;;  %v1401_v45 = vld [vmem:[%s2645_s0 + $0xb4] sm:$0xff] }
 0x62c   :  { %v1023_v40 = vpack.c.bf16 %v2547_v32, %v2545_v39 }
 0x62e   :  { %1467 = vst [vmem:[%s2646_s4 + $0x28] sm:$0xff] %v1023_v40   ;;  %1067 = vmatmul.mubr.bf16.vlgmr.msra.gmra.mrb[24].mxu0 %v1023_v40  ;;  %1679 = vmatmul.mubr.bf16.vlgmr.msra.gmra.mrb[24].mxu1 %v1023_v40 }
 0x62f   :  { %1173 = vmatpush1.bf16.msra.mxu0 %v2381_v53  ;;  %1683 = vmatpush3.bf16.msra.mxu1 %v2387_v55 }
 0x630   :  { %1174 = vmatprep.subr.bf16.mxu0 %v2393_v4  ;;  %1684 = vmatprep.subr.bf16.mxu1 %v1857_v1 }
 0x631   :  { %1204 = vmatprep.mubr.bf16.mxu0 %v1858_v2  ;;  %1698 = vmatprep.mubr.msk.bf16.mxu1 %vm1859_vm0, %v1857_v1  ;;  %v1391_v2 = vld [vmem:[%s2645_s0 + $0x90] sm:$0xff] }
 0x632   :  { %v1123_v52 = vunpack.c.l.bf16 %v1391_v2 }
 0x633   :  { %1175 = vmatpush1.bf16.msra.mxu0 %v2403_v5  ;;  %1685 = vmatpush3.bf16.msra.mxu1 %v2409_v6 }
 0x634   :  { %1176 = vmatprep.subr.bf16.mxu0 %v2415_v7  ;;  %1686 = vmatprep.subr.bf16.mxu1 %v1857_v1 }
 0x637   :  { %1177 = vmatpush1.bf16.msra.mxu0 %v2422_v8  ;;  %1687 = vmatpush3.bf16.msra.mxu1 %v2428_v9 }
 0x638   :  { %1178 = vmatprep.subr.bf16.mxu0 %v2434_v10  ;;  %1688 = vmatprep.subr.bf16.mxu1 %v1857_v1 }
 0x63b   :  { %1179 = vmatpush1.bf16.msra.mxu0 %v2441_v11  ;;  %1689 = vmatpush3.bf16.msra.mxu1 %v2447_v12 }
 0x63c   :  { %1180 = vmatprep.subr.bf16.mxu0 %v2453_v13  ;;  %1690 = vmatprep.subr.bf16.mxu1 %v1857_v1 }
 0x63f   :  { %1181 = vmatpush1.bf16.msra.mxu0 %v2460_v14  ;;  %1691 = vmatpush3.bf16.msra.mxu1 %v2466_v15 }
 0x640   :  { %1182 = vmatprep.subr.bf16.mxu0 %v2472_v16  ;;  %1692 = vmatprep.subr.bf16.mxu1 %v1857_v1 }
 0x643   :  { %1183 = vmatpush1.bf16.msra.mxu0 %v2479_v17  ;;  %1693 = vmatpush3.bf16.msra.mxu1 %v2485_v18  ;;  %v1124_v17 = vunpack.c.h.bf16 %v1391_v2 }
 0x644   :  { %1184 = vmatprep.subr.bf16.mxu0 %v2491_v19  ;;  %1694 = vmatprep.subr.bf16.mxu1 %v1857_v1  ;;  %v1127_v19 = vunpack.c.h.bf16 %v1393_v0 }
 0x647   :  { %1185 = vmatpush1.bf16.msra.mxu0 %v2498_v20  ;;  %1695 = vmatpush3.bf16.msra.mxu1 %v2504_v21 }
 0x648   :  { %1186 = vmatprep.subr.bf16.mxu0 %v2510_v22  ;;  %1696 = vmatprep.subr.bf16.mxu1 %v1857_v1  ;;  %v1126_v1 = vunpack.c.l.bf16 %v1393_v0  ;;  %v1392_v22 = vld [vmem:[%s2645_s0 + $0x98] ss:$12 sps:$4 sm:$0xff]  }
 0x649   :  { %v1125_v43 = vunpack.c.l.bf16 %v1392_v22  ;;  %v1128_v48 = vunpack.c.h.bf16 %v1392_v22 }
 0x64b   :  { %1187 = vmatpush1.bf16.msra.mxu0 %v2517_v23  ;;  %1697 = vmatpush3.bf16.msra.mxu1 %v2523_v26 }
 0x701   :  { %v1068_v53 = vpop.f32.mrb[24].mxu0  ;;  %v1111_v55 = vpop.f32.mrb[24].mxu1 }
 0x702   :  { %v1069_v4 = vadd.f32 %v1068_v53, %v2100_v34  ;;  %v1070_v5 = vpop.f32.mrb[25].mxu0  ;;  %v1680_v6 = vpop.f32.mrb[25].mxu1  ;;  %v1112_v47 = vadd.f32 %v1111_v55, %v2111_v61  ;;  %v1264_v53 = vunpack.c.l.bf16 %v1401_v45 }
 0x703   :  { %v1072_v7 = vpop.f32.mrb[26].mxu0  ;;  %v1114_v8 = vpop.f32.mrb[26].mxu1  ;;  %v1071_v16 = vadd.f32 %v1070_v5, %v2107_v46 }
 0x704   :  { %v1129_v9 = vadd.f32 %v1123_v52, %v1069_v4  ;;  %v1073_v10 = vadd.f32 %v1072_v7, %v2100_v34  ;;  %v1074_v11 = vpop.f32.mrb[27].mxu0  ;;  %v1681_v12 = vpop.f32.mrb[27].mxu1  ;;  %v1115_v58 = vadd.f32 %v1114_v8, %v2111_v61 }
 0x705   :  { %v1075_v18 = vadd.f32 %v1074_v11, %v2107_v46  ;;  %v1130_v20 = vadd.f32 %v1124_v17, %v1071_v16  ;;  %v1262_v12 = vunpack.c.h.bf16 %v1399_v3  ;;  %v1400_v17 = vld [vmem:[%s2645_s0 + $0xb0] sm:$0xf] }
 0x706   :  { %v1133_v13 = vmul.f32 0.5, %v1129_v9  ;;  %v1131_v14 = vadd.f32 %v1126_v1, %v1073_v10 }
 0x707   :  { %v1132_v21 = vadd.f32 %v1127_v19, %v1075_v18  ;;  %v1134_v23 = vmul.f32 0.5, %v1130_v20  ;;  %v1402_v20 = vld [vmem:[%s2645_s0 + $0xbc] sm:$0xf] }
 0x708   :  { %1809 = vtanh.f32 %v1133_v13  ;;  %v1135_v15 = vmul.f32 0.5, %v1131_v14  ;;  %v1265_v14 = vunpack.c.h.bf16 %v1401_v45 }
 0x709   :  { %v1136_v42 = vmul.f32 0.5, %v1132_v21 }
 0x70a   :  { %1811 = vtanh.f32 %v1135_v15 }
 0x70b   :  { %1813 = vtanh.f32 %v1134_v23  ;;  %v1263_v23 = vunpack.c.l.bf16 %v1400_v17 }
 0x70c   :  { %1815 = vtanh.f32 %v1136_v42  ;;  %v1266_v42 = vunpack.c.l.bf16 %v1402_v20 }
 0x712   :  { %v1810_v26 = vpop.eup %1809 }
 0x713   :  { %v1141_v41 = vadd.f32 1.0, %v1810_v26 }
 0x714   :  { %v1812_v37 = vpop.eup %1811 }
 0x715   :  { %v1145_v57 = vmul.f32 0.5, %v1141_v41  ;;  %v1143_v63 = vadd.f32 1.0, %v1812_v37  ;;  %v1814_v36 = vpop.eup %1813 }
 0x716   :  { %v1816_v59 = vpop.eup %1815  ;;  %v1142_v60 = vadd.f32 1.0, %v1814_v36 }
 0x717   :  { %v1149_v49 = vmul.f32 %v1145_v57, %v1112_v47  ;;  %v1147_v51 = vmul.f32 0.5, %v1143_v63  ;;  %v1144_v62 = vadd.f32 1.0, %v1816_v59 }
 0x718   :  { %v1146_v25 = vmul.f32 0.5, %v1142_v60 }
 0x719   :  { %v1151_v56 = vadd.f32 %v1149_v49, %v1125_v43  ;;  %v1150_v28 = vmul.f32 %v1147_v51, %v1115_v58  ;;  %v1148_v54 = vmul.f32 0.5, %v1144_v62 }
 0x71b   :  { %1817 = vtanh.f32 %v1151_v56  ;;  %v1152_v38 = vadd.f32 %v1150_v28, %v1128_v48 }
 0x71d   :  { %1819 = vtanh.f32 %v1152_v38 }
 0x725   :  { %v1818_v50 = vpop.eup %1817 }
 0x726   :  { %v1155_v27 = vsub.f32 %v2545_v39, %v1818_v50  ;;  %v1261_v39 = vunpack.c.l.bf16 %v1399_v3 }
 0x727   :  { %v1820_v29 = vpop.eup %1819 }
 0x728   :  { %v1157_v31 = vmul.f32 %v1155_v27, %v1146_v25  ;;  %v1156_v24 = vsub.f32 %v2547_v32, %v1820_v29 }
 0x72a   :  { %v1158_v33 = vmul.f32 %v1156_v24, %v1148_v54  ;;  %v2604_v35 = vadd.f32 %v1818_v50, %v1157_v31 }
 0x72c   :  { %v2606_v44 = vadd.f32 %v1820_v29, %v1158_v33 }
 0x72e   :  { %v1161_v30 = vpack.c.bf16 %v2606_v44, %v2604_v35 }
 0x730   :  { %1468 = vst [vmem:[%s2646_s4 + $0x30] sm:$0xff] %v1161_v30   ;;  %1205 = vmatmul.mubr.bf16.vlgmr.msra.gmra.mrb[28].mxu0 %v1161_v30  ;;  %1699 = vmatmul.mubr.bf16.vlgmr.msra.gmra.mrb[28].mxu1 %v1161_v30 }
 0x803   :  { %v1206_v32 = vpop.f32.mrb[28].mxu0  ;;  %v1249_v40 = vpop.f32.mrb[28].mxu1 }
 0x804   :  { %v1207_v2 = vadd.f32 %v1206_v32, %v2100_v34  ;;  %v1208_v0 = vpop.f32.mrb[29].mxu0  ;;  %v1700_v52 = vpop.f32.mrb[29].mxu1  ;;  %v1250_v26 = vadd.f32 %v1249_v40, %v2111_v61 }
 0x805   :  { %v1210_v55 = vpop.f32.mrb[30].mxu0  ;;  %v1252_v4 = vpop.f32.mrb[30].mxu1  ;;  %v1209_v11 = vadd.f32 %v1208_v0, %v2107_v46 }
 0x806   :  { %v1267_v5 = vadd.f32 %v1261_v39, %v1207_v2  ;;  %v1211_v6 = vadd.f32 %v1210_v55, %v2100_v34  ;;  %v1212_v1 = vpop.f32.mrb[31].mxu0  ;;  %v1701_v7 = vpop.f32.mrb[31].mxu1  ;;  %v1253_v43 = vadd.f32 %v1252_v4, %v2111_v61 }
 0x807   :  { %v1213_v13 = vadd.f32 %v1212_v1, %v2107_v46  ;;  %v1268_v15 = vadd.f32 %v1262_v12, %v1209_v11 }
 0x808   :  { %v1271_v8 = vmul.f32 0.5, %v1267_v5  ;;  %v1269_v9 = vadd.f32 %v1264_v53, %v1211_v6 }
 0x809   :  { %v1270_v16 = vadd.f32 %v1265_v14, %v1213_v13  ;;  %v1272_v34 = vmul.f32 0.5, %v1268_v15 }
 0x80a   :  { %1821 = vtanh.f32 %v1271_v8  ;;  %v1273_v10 = vmul.f32 0.5, %v1269_v9 }
 0x80b   :  { %v1274_v21 = vmul.f32 0.5, %v1270_v16 }
 0x80c   :  { %1823 = vtanh.f32 %v1273_v10 }
 0x80d   :  { %1825 = vtanh.f32 %v1272_v34 }
 0x80e   :  { %1827 = vtanh.f32 %v1274_v21 }
 0x814   :  { %v1822_v18 = vpop.eup %1821 }
 0x815   :  { %v1279_v19 = vadd.f32 1.0, %v1822_v18 }
 0x816   :  { %v1824_v22 = vpop.eup %1823 }
 0x817   :  { %v1283_v46 = vmul.f32 0.5, %v1279_v19  ;;  %v1281_v41 = vadd.f32 1.0, %v1824_v22  ;;  %v1826_v49 = vpop.eup %1825 }
 0x818   :  { %v1828_v58 = vpop.eup %1827  ;;  %v1280_v51 = vadd.f32 1.0, %v1826_v49 }
 0x819   :  { %v1287_v37 = vmul.f32 %v1283_v46, %v1250_v26  ;;  %v1285_v47 = vmul.f32 0.5, %v1281_v41  ;;  %v1282_v56 = vadd.f32 1.0, %v1828_v58 }
 0x81a   :  { %v1284_v38 = vmul.f32 0.5, %v1280_v51 }
 0x81b   :  { %v1289_v57 = vadd.f32 %v1287_v37, %v1263_v23  ;;  %v1288_v63 = vmul.f32 %v1285_v47, %v1253_v43  ;;  %v1286_v62 = vmul.f32 0.5, %v1282_v56 }
 0x81d   :  { %1829 = vtanh.f32 %v1289_v57  ;;  %v1290_v48 = vadd.f32 %v1288_v63, %v1266_v42 }
 0x81f   :  { %1831 = vtanh.f32 %v1290_v48 }
 0x827   :  { %v1830_v28 = vpop.eup %1829 }
 0x828   :  { %v1293_v36 = vsub.f32 %v2604_v35, %v1830_v28 }
 0x829   :  { %v1832_v59 = vpop.eup %1831 }
 0x82a   :  { %v1295_v60 = vmul.f32 %v1293_v36, %v1284_v38  ;;  %v1294_v61 = vsub.f32 %v2606_v44, %v1832_v59 }
 0x82c   :  { %v1297_v50 = vadd.f32 %v1830_v28, %v1295_v60  ;;  %v1296_v25 = vmul.f32 %v1294_v61, %v1286_v62 }
 0x82e   :  { %1313 = vst [vmem:[%s2647_s5] sm:$0xff] %v1297_v50  ;;  %v1298_v27 = vadd.f32 %v1832_v59, %v1296_v25 }
 0x830   :  { %v1461_v29 = vpack.c.bf16 %v1298_v27, %v1297_v50  ;;  %1314 = vst [vmem:[%s2647_s5 + $0x8] sm:$0xff] %v1298_v27 }
 0x832   :  { %1469 = vst [vmem:[%s2646_s4 + $0x38] sm:$0xff] %v1461_v29  }

</bundles_post_ra>
